<compile_context>
chip_gen: v7x
topology: tpu7x:2x2x1
jax: 0.10.0
libtpu: 0.0.40
codegen_flags: <defaults>
</compile_context>

<pallas_src>
import random

import jax
import jax.numpy as jnp
from jax.experimental import pallas as pl
from jax.experimental.pallas import tpu as pltpu


_VMEM = pl.BlockSpec(memory_space=pltpu.MemorySpace.VMEM)
_SMEM = pl.BlockSpec(memory_space=pltpu.MemorySpace.SMEM)


# ----------------------------------------------------------------------------
# Fused whole-forward kernel (built per static shape configuration)
# ----------------------------------------------------------------------------
def _build_fused_kernel(B, T_in, trg_len, dec_in, H, n_layers, out_dim):
    four_h = 4 * H
    f32 = jnp.float32
    bf16 = jnp.bfloat16

    def kernel(*refs):
        it = iter(refs)
        xproj_ref = next(it)       # [T_in, B, 4H] f32  enc layer-0 x@Wih + b (precomputed)
        dec_x0_ref = next(it)      # [B, 4H] f32        first decoder input @ Wih (no bias)
        trg_proj_ref = next(it)    # [trg_len, B, 4H] f32  trg @ dec_Wih0 (no bias)
        tf_ref = next(it)          # [trg_len] int32 in SMEM (teacher-forcing flags)
        enc_whh0_ref = next(it)    # [H, 4H] bf16
        enc_deep = [(next(it), next(it), next(it)) for _ in range(n_layers - 1)]
        #            (Wih [H,4H] bf16, Whh [H,4H] bf16, b [1,4H] f32)
        dec_wih0_ref = next(it)    # [dec_in, 4H] f32 (tiny K; kept f32)
        dec_whh0_ref = next(it)    # [H, 4H] bf16
        dec_b0_ref = next(it)      # [1, 4H] f32
        dec_deep = [(next(it), next(it), next(it)) for _ in range(n_layers - 1)]
        fc_w_ref = next(it)        # [H, out_dim] f32 (tiny N; kept f32)
        fc_b_ref = next(it)        # [1, out_dim] f32
        out_ref = next(it)         # [trg_len, B, out_dim] f32

        # ---------------- hoisted constants (built once per trace) ----------------
        lane = jax.lax.broadcasted_iota(jnp.int32, (B, four_h), 1)
        is_g = (lane >= 2 * H) & (lane < 3 * H)
        # tanh(x) = 2*sigmoid(2x) - 1  ->  scale g lanes by 2 pre/post sigmoid, offset -1.
        gate_scale = jnp.where(is_g, 2.0, 1.0).astype(f32)    # [B, 4H]
        gate_offset = jnp.where(is_g, -1.0, 0.0).astype(f32)  # [B, 4H]

        def cell(gates, c_prev):
            # Single full-vreg EUP pass (sigmoid) + VPU scale/offset fixup.
            act = jax.nn.sigmoid(gates * gate_scale) * gate_scale + gate_offset
            i_g = act[:, 0 * H:1 * H]
            f_g = act[:, 1 * H:2 * H]
            g_g = act[:, 2 * H:3 * H]
            o_g = act[:, 3 * H:4 * H]
            c_new = f_g * c_prev + i_g * g_g
            h_new = o_g * jnp.tanh(c_new)
            return h_new, c_new

        # ---------------- hoisted weights & biases (read from VMEM once) ----------
        # At H=32 / n_layers=2 all weights fit comfortably in vregs; for much larger
        # H move the deep-layer reads back inside the loops to limit vreg pressure.
        enc_whh = [enc_whh0_ref[...]] + [whh_ref[...] for (_, whh_ref, _) in enc_deep]
        enc_wih_deep = [wih_ref[...] for (wih_ref, _, _) in enc_deep]
        enc_b_deep = [b_ref[...] for (_, _, b_ref) in enc_deep]

        dec_whh = [dec_whh0_ref[...]] + [whh_ref[...] for (_, whh_ref, _) in dec_deep]
        dec_wih_deep = [wih_ref[...] for (wih_ref, _, _) in dec_deep]
        dec_b_deep = [b_ref[...] for (_, _, b_ref) in dec_deep]
        dec_wih0 = dec_wih0_ref[...]
        dec_b0 = dec_b0_ref[...]
        fc_w = fc_w_ref[...]
        fc_b = fc_b_ref[...]

        # Recurrent states stay resident for the whole kernel.
        h = [jnp.zeros((B, H), f32) for _ in range(n_layers)]
        c = [jnp.zeros((B, H), f32) for _ in range(n_layers)]

        def hh_contribs(whh_list):
            # All layers' h @ W_hh depend only on last-step state, so they are
            # issued together at the TOP of the timestep and overlap with the
            # serial per-layer chain. bf16 operands, f32 accumulation.
            return [jnp.dot(h[l].astype(bf16), whh_list[l],
                            preferred_element_type=f32)
                    for l in range(n_layers)]

        def run_deep_layers(x, hc, wih_deep, b_deep):
            for l in range(1, n_layers):
                gates = (jnp.dot(x.astype(bf16), wih_deep[l - 1],
                                 preferred_element_type=f32)
                         + hc[l] + b_deep[l - 1])
                h[l], c[l] = cell(gates, c[l])
                x = h[l]
            return x

        # ------------------------------ encoder ------------------------------
        for t in range(T_in):
            hc = hh_contribs(enc_whh)
            gates = xproj_ref[t] + hc[0]                    # bias folded into xproj
            h[0], c[0] = cell(gates, c[0])
            run_deep_layers(h[0], hc, enc_wih_deep, enc_b_deep)

        # ------------------------------ decoder ------------------------------
        x_contrib = dec_x0_ref[...]                         # [B, 4H], bias-free
        for t in range(trg_len):
            hc = hh_contribs(dec_whh)
            gates = x_contrib + hc[0] + dec_b0
            h[0], c[0] = cell(gates, c[0])
            x = run_deep_layers(h[0], hc, dec_wih_deep, dec_b_deep)

            # FC head fused into the same kernel (tiny [B,H]@[H,out_dim], f32).
            out = jnp.dot(x, fc_w, preferred_element_type=f32) + fc_b
            # NOTE: out_dim=1 -> masked store; if out_dim/trg_len scale, buffer
            # all steps in VMEM scratch and store one lane-dense slab at the end.
            out_ref[t] = out                                # [B, out_dim]

            # Teacher forcing: blend precomputed trg projection with the
            # prediction-based projection (tiny K=dec_in MXU matmul keeps the
            # lane-broadcast off the XLU / critical path).
            tf = (tf_ref[t] != 0).astype(f32)
            pred_contrib = jnp.dot(out, dec_wih0, preferred_element_type=f32)
            x_contrib = tf * trg_proj_ref[t] + (1.0 - tf) * pred_contrib

    return kernel


# ----------------------------------------------------------------------------
# Forward wrapper (mirrors PyTorch Seq2Seq.forward)
# ----------------------------------------------------------------------------
@jax.jit
def seq2seq_forward(enc_params, dec_params, fc_w, fc_b, in_seq, trg_seq, tf_flags):
    """in_seq: [B, T_in, F], trg_seq: [B, trg_len, trg_nvar],
    tf_flags: [trg_len] int32 (1 = teacher forcing). Returns [B, trg_len, out_dim]."""
    B, T_in, F_in = in_seq.shape
    _, trg_len, trg_nvar = trg_seq.shape
    n_layers = len(enc_params)
    H = enc_params[0][1].shape[0]
    out_dim = fc_w.shape[1]

    # Pad batch to a multiple of 8 sublanes (padded rows are independent garbage).
    B_pad = ((B + 7) // 8) * 8
    pad = B_pad - B
    in_seq_p = jnp.pad(in_seq, ((0, pad), (0, 0), (0, 0)))
    trg_p = jnp.pad(trg_seq, ((0, pad), (0, 0), (0, 0)))

    # Encoder layer-0 input projection: one big batched matmul outside the
    # recurrence (doesn't depend on recurrent state), time-major.
    enc_wih0, enc_whh0, enc_b0 = enc_params[0]
    in_tb = jnp.transpose(in_seq_p, (1, 0, 2))                       # [T, B_pad, F]
    xproj = (in_tb.reshape(T_in * B_pad, F_in) @ enc_wih0 + enc_b0)
    xproj = xproj.reshape(T_in, B_pad, 4 * H)

    dec_wih0, dec_whh0, dec_b0 = dec_params[0]
    dec_in = dec_wih0.shape[0]

    # Decoder: first-input projection and teacher-forced input projections are
    # also state-independent -> precompute (bias added in-kernel).
    dec_inp0 = in_seq_p[:, trg_len - 1, 0:1]                         # [B_pad, 1]
    dec_x0 = dec_inp0 @ dec_wih0                                     # [B_pad, 4H]
    trg_tb = jnp.transpose(trg_p, (1, 0, 2))                         # [trg_len, B_pad, nvar]
    trg_proj = (trg_tb.reshape(trg_len * B_pad, trg_nvar) @ dec_wih0)
    trg_proj = trg_proj.reshape(trg_len, B_pad, 4 * H)

    # Pre-cast the recurrent [H,4H] weights to bf16 for the MXU (f32 accumulation
    # in-kernel); odd-shaped tiny weights (dec_wih0, fc_w) and biases stay f32.
    bf16 = jnp.bfloat16
    enc_whh0_bf = enc_whh0.astype(bf16)
    enc_deep = [(wih.astype(bf16), whh.astype(bf16), b) for (wih, whh, b) in enc_params[1:]]
    dec_whh0_bf = dec_whh0.astype(bf16)
    dec_deep = [(wih.astype(bf16), whh.astype(bf16), b) for (wih, whh, b) in dec_params[1:]]

    kernel = _build_fused_kernel(B_pad, T_in, trg_len, dec_in, H, n_layers, out_dim)

    flat_inputs = [xproj, dec_x0, trg_proj, tf_flags.astype(jnp.int32), enc_whh0_bf]
    in_specs = [_VMEM, _VMEM, _VMEM, _SMEM, _VMEM]
    for (wih, whh, b) in enc_deep:
        flat_inputs += [wih, whh, b]
        in_specs += [_VMEM, _VMEM, _VMEM]
    flat_inputs += [dec_wih0, dec_whh0_bf, dec_b0]
    in_specs += [_VMEM, _VMEM, _VMEM]
    for (wih, whh, b) in dec_deep:
        flat_inputs += [wih, whh, b]
        in_specs += [_VMEM, _VMEM, _VMEM]
    flat_inputs += [fc_w, fc_b]
    in_specs += [_VMEM, _VMEM]

    out_tb = pl.pallas_call(
        kernel,
        out_shape=jax.ShapeDtypeStruct((trg_len, B_pad, out_dim), jnp.float32),
        in_specs=in_specs,
        out_specs=_VMEM,
    )(*flat_inputs)

    # [trg_len, B_pad, out_dim] -> [B, trg_len, out_dim]
    return jnp.transpose(out_tb, (1, 0, 2))[:B]


# ----------------------------------------------------------------------------
# Pure-JAX reference (f32) for a loose numerical sanity check
# ----------------------------------------------------------------------------
def seq2seq_reference(enc_params, dec_params, fc_w, fc_b, in_seq, trg_seq, tf_flags):
    B, T_in, _ = in_seq.shape
    _, trg_len, _ = trg_seq.shape
    n_layers = len(enc_params)
    H = enc_params[0][1].shape[0]

    def lstm_cell(x, h, c, wih, whh, b):
        gates = x @ wih + h @ whh + b
        i = jax.nn.sigmoid(gates[:, 0 * H:1 * H])
        f = jax.nn.sigmoid(gates[:, 1 * H:2 * H])
        g = jnp.tanh(gates[:, 2 * H:3 * H])
        o = jax.nn.sigmoid(gates[:, 3 * H:4 * H])
        c_new = f * c + i * g
        return o * jnp.tanh(c_new), c_new

    h = [jnp.zeros((B, H), jnp.float32) for _ in range(n_layers)]
    c = [jnp.zeros((B, H), jnp.float32) for _ in range(n_layers)]
    for t in range(T_in):
        x = in_seq[:, t, :]
        for l, (wih, whh, b) in enumerate(enc_params):
            h[l], c[l] = lstm_cell(x, h[l], c[l], wih, whh, b)
            x = h[l]
    inp = in_seq[:, trg_len - 1, 0:1]
    outs = []
    for t in range(trg_len):
        x = inp
        for l, (wih, whh, b) in enumerate(dec_params):
            h[l], c[l] = lstm_cell(x, h[l], c[l], wih, whh, b)
            x = h[l]
        out = x @ fc_w + fc_b
        outs.append(out)
        inp = jnp.where(tf_flags[t] != 0, trg_seq[:, t, :], out)
    return jnp.stack(outs, axis=1)


# ----------------------------------------------------------------------------
# Deterministic parameter init (uniform(-0.08, 0.08), like the PyTorch module)
# ----------------------------------------------------------------------------
def init_lstm_params(key, in_dim, hid_dim, n_layers):
    params = []
    for l in range(n_layers):
        f = in_dim if l == 0 else hid_dim
        key, k1, k2, k3, k4 = jax.random.split(key, 5)
        wih_t = jax.random.uniform(k1, (f, 4 * hid_dim), jnp.float32, -0.08, 0.08)
        whh_t = jax.random.uniform(k2, (hid_dim, 4 * hid_dim), jnp.float32, -0.08, 0.08)
        b_ih = jax.random.uniform(k3, (1, 4 * hid_dim), jnp.float32, -0.08, 0.08)
        b_hh = jax.random.uniform(k4, (1, 4 * hid_dim), jnp.float32, -0.08, 0.08)
        params.append((wih_t, whh_t, b_ih + b_hh))
    return key, params


if __name__ == "__main__":
    # Small shapes consistent with the module's forward.
    B, IN_LEN, IN_NVAR = 2, 12, 3      # encoder input: [B, T_in, n_features]
    TRG_LEN, TRG_NVAR = 8, 1           # decoder target: [B, T_trg, 1]
    HID, NLAYERS = 32, 2               # hid_dim, n_layers (equal enc/dec)
    DEC_IN = 1                         # decoder consumes a single scalar per step
    OUT_DIM = TRG_NVAR                 # decoder.output_dim

    key = jax.random.PRNGKey(0)
    key, enc_params = init_lstm_params(key, IN_NVAR, HID, NLAYERS)
    key, dec_params = init_lstm_params(key, DEC_IN, HID, NLAYERS)
    key, kw, kb, kx, ky = jax.random.split(key, 5)
    fc_w = jax.random.uniform(kw, (HID, OUT_DIM), jnp.float32, -0.08, 0.08)
    fc_b = jax.random.uniform(kb, (1, OUT_DIM), jnp.float32, -0.08, 0.08)

    in_seq = jax.random.normal(kx, (B, IN_LEN, IN_NVAR), jnp.float32)
    trg_seq = jax.random.normal(ky, (B, TRG_LEN, TRG_NVAR), jnp.float32)

    # Deterministic teacher-forcing coin flips (torch uses random.random()),
    # passed as a traced int32 array -> no recompilation per flip pattern.
    random.seed(0)
    tf_flags = jnp.asarray(
        [1 if random.random() < 0.5 else 0 for _ in range(TRG_LEN)], dtype=jnp.int32)

    out = seq2seq_forward(enc_params, dec_params, fc_w, fc_b,
                          in_seq, trg_seq, tf_flags)
    jax.block_until_ready(out)
    assert out.shape == (B, TRG_LEN, TRG_NVAR)

    # Loose tolerance: kernel uses bf16 MXU operands (f32 accumulation / state).
    ref = seq2seq_reference(enc_params, dec_params, fc_w, fc_b,
                            in_seq, trg_seq, tf_flags)
    max_err = float(jnp.max(jnp.abs(out - ref)))
    assert max_err < 5e-2, f"max abs err vs f32 reference: {max_err}"

    print("KERNEL_OK")
</pallas_src>

<mosaic_0001>
module attributes {stable_mosaic.version = 11 : i64} {
  func.func @kernel(%arg0: memref<12x8x128xf32, #tpu.memory_space<vmem>>, %arg1: memref<8x128xf32, #tpu.memory_space<vmem>>, %arg2: memref<8x8x128xf32, #tpu.memory_space<vmem>>, %arg3: memref<8xi32, #tpu.memory_space<smem>>, %arg4: memref<32x128xbf16, #tpu.memory_space<vmem>>, %arg5: memref<32x128xbf16, #tpu.memory_space<vmem>>, %arg6: memref<32x128xbf16, #tpu.memory_space<vmem>>, %arg7: memref<1x128xf32, #tpu.memory_space<vmem>>, %arg8: memref<1x128xf32, #tpu.memory_space<vmem>>, %arg9: memref<32x128xbf16, #tpu.memory_space<vmem>>, %arg10: memref<1x128xf32, #tpu.memory_space<vmem>>, %arg11: memref<32x128xbf16, #tpu.memory_space<vmem>>, %arg12: memref<32x128xbf16, #tpu.memory_space<vmem>>, %arg13: memref<1x128xf32, #tpu.memory_space<vmem>>, %arg14: memref<32x1xf32, #tpu.memory_space<vmem>>, %arg15: memref<1x1xf32, #tpu.memory_space<vmem>>, %arg16: memref<8x8x1xf32, #tpu.memory_space<vmem>>) attributes {dimension_semantics = [], scalar_prefetch = 0 : i64, scratch_operands = 0 : i64, tpu.core_type = #tpu.core_type<tc>} {
    %0 = tpu.iota {dimensions = array<i32: 1>} : vector<8x128xi32>
    %c64_i32 = arith.constant 64 : i32
    %1 = vector.broadcast %c64_i32 : i32 to vector<8x128xi32>
    %2 = arith.cmpi sge, %0, %1 : vector<8x128xi32>
    %c96_i32 = arith.constant 96 : i32
    %3 = vector.broadcast %c96_i32 : i32 to vector<8x128xi32>
    %4 = arith.cmpi slt, %0, %3 : vector<8x128xi32>
    %5 = arith.andi %2, %4 : vector<8x128xi1>
    %cst = arith.constant 2.000000e+00 : f32
    %cst_0 = arith.constant 1.000000e+00 : f32
    %6 = vector.broadcast %cst : f32 to vector<8x128xf32>
    %7 = vector.broadcast %cst_0 : f32 to vector<8x128xf32>
    %8 = arith.select %5, %6, %7 : vector<8x128xi1>, vector<8x128xf32>
    %cst_1 = arith.constant -1.000000e+00 : f32
    %cst_2 = arith.constant 0.000000e+00 : f32
    %9 = vector.broadcast %cst_1 : f32 to vector<8x128xf32>
    %10 = vector.broadcast %cst_2 : f32 to vector<8x128xf32>
    %11 = arith.select %5, %9, %10 : vector<8x128xi1>, vector<8x128xf32>
    %c0 = arith.constant 0 : index
    %c0_3 = arith.constant 0 : index
    %12 = vector.load %arg4[%c0, %c0_3] : memref<32x128xbf16, #tpu.memory_space<vmem>>, vector<32x128xbf16>
    %c0_4 = arith.constant 0 : index
    %c0_5 = arith.constant 0 : index
    %13 = vector.load %arg6[%c0_4, %c0_5] : memref<32x128xbf16, #tpu.memory_space<vmem>>, vector<32x128xbf16>
    %c0_6 = arith.constant 0 : index
    %c0_7 = arith.constant 0 : index
    %14 = vector.load %arg5[%c0_6, %c0_7] : memref<32x128xbf16, #tpu.memory_space<vmem>>, vector<32x128xbf16>
    %c0_8 = arith.constant 0 : index
    %c0_9 = arith.constant 0 : index
    %15 = vector.load %arg7[%c0_8, %c0_9] : memref<1x128xf32, #tpu.memory_space<vmem>>, vector<1x128xf32>
    %c0_10 = arith.constant 0 : index
    %c0_11 = arith.constant 0 : index
    %16 = vector.load %arg9[%c0_10, %c0_11] : memref<32x128xbf16, #tpu.memory_space<vmem>>, vector<32x128xbf16>
    %c0_12 = arith.constant 0 : index
    %c0_13 = arith.constant 0 : index
    %17 = vector.load %arg12[%c0_12, %c0_13] : memref<32x128xbf16, #tpu.memory_space<vmem>>, vector<32x128xbf16>
    %c0_14 = arith.constant 0 : index
    %c0_15 = arith.constant 0 : index
    %18 = vector.load %arg11[%c0_14, %c0_15] : memref<32x128xbf16, #tpu.memory_space<vmem>>, vector<32x128xbf16>
    %c0_16 = arith.constant 0 : index
    %c0_17 = arith.constant 0 : index
    %19 = vector.load %arg13[%c0_16, %c0_17] : memref<1x128xf32, #tpu.memory_space<vmem>>, vector<1x128xf32>
    %c0_18 = arith.constant 0 : index
    %c0_19 = arith.constant 0 : index
    %20 = vector.load %arg8[%c0_18, %c0_19] : memref<1x128xf32, #tpu.memory_space<vmem>>, vector<1x128xf32>
    %c0_20 = arith.constant 0 : index
    %c0_21 = arith.constant 0 : index
    %21 = vector.load %arg10[%c0_20, %c0_21] : memref<1x128xf32, #tpu.memory_space<vmem>>, vector<1x128xf32>
    %c0_22 = arith.constant 0 : index
    %c0_23 = arith.constant 0 : index
    %22 = vector.load %arg14[%c0_22, %c0_23] : memref<32x1xf32, #tpu.memory_space<vmem>>, vector<32x1xf32>
    %c0_24 = arith.constant 0 : index
    %c0_25 = arith.constant 0 : index
    %23 = vector.load %arg15[%c0_24, %c0_25] : memref<1x1xf32, #tpu.memory_space<vmem>>, vector<1x1xf32>
    %cst_26 = arith.constant 0.000000e+00 : f32
    %24 = vector.broadcast %cst_26 : f32 to vector<8x32xf32>
    %cst_27 = arith.constant 0.000000e+00 : f32
    %25 = vector.broadcast %cst_27 : f32 to vector<8x32xf32>
    %cst_28 = arith.constant 0.000000e+00 : f32
    %26 = vector.broadcast %cst_28 : f32 to vector<8x32xf32>
    %cst_29 = arith.constant 0.000000e+00 : f32
    %27 = vector.broadcast %cst_29 : f32 to vector<8x32xf32>
    %28 = arith.truncf %24 : vector<8x32xf32> to vector<8x32xbf16>
    %cst_30 = arith.constant dense<0.000000e+00> : vector<8x128xf32>
    %29 = tpu.matmul %28, %12, %cst_30 {dimension_numbers = #tpu.dot_dimension_numbers<[1], [0], [0], [1], [0, 0, 1, 1], [], []>} : vector<8x32xbf16>, vector<32x128xbf16>, vector<8x128xf32> -> vector<8x128xf32>
    %30 = arith.truncf %25 : vector<8x32xf32> to vector<8x32xbf16>
    %cst_31 = arith.constant dense<0.000000e+00> : vector<8x128xf32>
    %31 = tpu.matmul %30, %13, %cst_31 {dimension_numbers = #tpu.dot_dimension_numbers<[1], [0], [0], [1], [0, 0, 1, 1], [], []>} : vector<8x32xbf16>, vector<32x128xbf16>, vector<8x128xf32> -> vector<8x128xf32>
    %c0_32 = arith.constant 0 : index
    %c0_33 = arith.constant 0 : index
    %c0_34 = arith.constant 0 : index
    %32 = vector.load %arg0[%c0_32, %c0_33, %c0_34] : memref<12x8x128xf32, #tpu.memory_space<vmem>>, vector<1x8x128xf32>
    %33 = vector.shape_cast %32 : vector<1x8x128xf32> to vector<8x128xf32>
    %34 = arith.addf %33, %29 : vector<8x128xf32>
    %35 = arith.mulf %34, %8 : vector<8x128xf32>
    %36 = arith.negf %35 : vector<8x128xf32>
    %37 = math.exp %36 : vector<8x128xf32>
    %cst_35 = arith.constant 1.000000e+00 : f32
    %38 = vector.broadcast %cst_35 : f32 to vector<8x128xf32>
    %39 = arith.addf %38, %37 : vector<8x128xf32>
    %40 = arith.divf %38, %39 : vector<8x128xf32>
    %41 = arith.mulf %40, %8 : vector<8x128xf32>
    %42 = arith.addf %41, %11 : vector<8x128xf32>
    %43 = vector.extract_strided_slice %42 {offsets = [0, 0], sizes = [8, 32], strides = [1, 1]} : vector<8x128xf32> to vector<8x32xf32>
    %44 = vector.extract_strided_slice %42 {offsets = [0, 32], sizes = [8, 32], strides = [1, 1]} : vector<8x128xf32> to vector<8x32xf32>
    %45 = vector.extract_strided_slice %42 {offsets = [0, 64], sizes = [8, 32], strides = [1, 1]} : vector<8x128xf32> to vector<8x32xf32>
    %46 = vector.extract_strided_slice %42 {offsets = [0, 96], sizes = [8, 32], strides = [1, 1]} : vector<8x128xf32> to vector<8x32xf32>
    %47 = arith.mulf %44, %26 : vector<8x32xf32>
    %48 = arith.mulf %43, %45 : vector<8x32xf32>
    %49 = arith.addf %47, %48 : vector<8x32xf32>
    %50 = math.tanh %49 : vector<8x32xf32>
    %51 = arith.mulf %46, %50 : vector<8x32xf32>
    %52 = arith.truncf %51 : vector<8x32xf32> to vector<8x32xbf16>
    %cst_36 = arith.constant dense<0.000000e+00> : vector<8x128xf32>
    %53 = tpu.matmul %52, %14, %cst_36 {dimension_numbers = #tpu.dot_dimension_numbers<[1], [0], [0], [1], [0, 0, 1, 1], [], []>} : vector<8x32xbf16>, vector<32x128xbf16>, vector<8x128xf32> -> vector<8x128xf32>
    %54 = arith.addf %53, %31 : vector<8x128xf32>
    %55 = vector.broadcast %15 : vector<1x128xf32> to vector<8x128xf32>
    %56 = arith.addf %54, %55 : vector<8x128xf32>
    %57 = arith.mulf %56, %8 : vector<8x128xf32>
    %58 = arith.negf %57 : vector<8x128xf32>
    %59 = math.exp %58 : vector<8x128xf32>
    %cst_37 = arith.constant 1.000000e+00 : f32
    %60 = vector.broadcast %cst_37 : f32 to vector<8x128xf32>
    %61 = arith.addf %60, %59 : vector<8x128xf32>
    %62 = arith.divf %60, %61 : vector<8x128xf32>
    %63 = arith.mulf %62, %8 : vector<8x128xf32>
    %64 = arith.addf %63, %11 : vector<8x128xf32>
    %65 = vector.extract_strided_slice %64 {offsets = [0, 0], sizes = [8, 32], strides = [1, 1]} : vector<8x128xf32> to vector<8x32xf32>
    %66 = vector.extract_strided_slice %64 {offsets = [0, 32], sizes = [8, 32], strides = [1, 1]} : vector<8x128xf32> to vector<8x32xf32>
    %67 = vector.extract_strided_slice %64 {offsets = [0, 64], sizes = [8, 32], strides = [1, 1]} : vector<8x128xf32> to vector<8x32xf32>
    %68 = vector.extract_strided_slice %64 {offsets = [0, 96], sizes = [8, 32], strides = [1, 1]} : vector<8x128xf32> to vector<8x32xf32>
    %69 = arith.mulf %66, %27 : vector<8x32xf32>
    %70 = arith.mulf %65, %67 : vector<8x32xf32>
    %71 = arith.addf %69, %70 : vector<8x32xf32>
    %72 = math.tanh %71 : vector<8x32xf32>
    %73 = arith.mulf %68, %72 : vector<8x32xf32>
    %74 = arith.truncf %51 : vector<8x32xf32> to vector<8x32xbf16>
    %cst_38 = arith.constant dense<0.000000e+00> : vector<8x128xf32>
    %75 = tpu.matmul %74, %12, %cst_38 {dimension_numbers = #tpu.dot_dimension_numbers<[1], [0], [0], [1], [0, 0, 1, 1], [], []>} : vector<8x32xbf16>, vector<32x128xbf16>, vector<8x128xf32> -> vector<8x128xf32>
    %76 = arith.truncf %73 : vector<8x32xf32> to vector<8x32xbf16>
    %cst_39 = arith.constant dense<0.000000e+00> : vector<8x128xf32>
    %77 = tpu.matmul %76, %13, %cst_39 {dimension_numbers = #tpu.dot_dimension_numbers<[1], [0], [0], [1], [0, 0, 1, 1], [], []>} : vector<8x32xbf16>, vector<32x128xbf16>, vector<8x128xf32> -> vector<8x128xf32>
    %c1 = arith.constant 1 : index
    %c0_40 = arith.constant 0 : index
    %c0_41 = arith.constant 0 : index
    %78 = vector.load %arg0[%c1, %c0_40, %c0_41] : memref<12x8x128xf32, #tpu.memory_space<vmem>>, vector<1x8x128xf32>
    %79 = vector.shape_cast %78 : vector<1x8x128xf32> to vector<8x128xf32>
    %80 = arith.addf %79, %75 : vector<8x128xf32>
    %81 = arith.mulf %80, %8 : vector<8x128xf32>
    %82 = arith.negf %81 : vector<8x128xf32>
    %83 = math.exp %82 : vector<8x128xf32>
    %cst_42 = arith.constant 1.000000e+00 : f32
    %84 = vector.broadcast %cst_42 : f32 to vector<8x128xf32>
    %85 = arith.addf %84, %83 : vector<8x128xf32>
    %86 = arith.divf %84, %85 : vector<8x128xf32>
    %87 = arith.mulf %86, %8 : vector<8x128xf32>
    %88 = arith.addf %87, %11 : vector<8x128xf32>
    %89 = vector.extract_strided_slice %88 {offsets = [0, 0], sizes = [8, 32], strides = [1, 1]} : vector<8x128xf32> to vector<8x32xf32>
    %90 = vector.extract_strided_slice %88 {offsets = [0, 32], sizes = [8, 32], strides = [1, 1]} : vector<8x128xf32> to vector<8x32xf32>
    %91 = vector.extract_strided_slice %88 {offsets = [0, 64], sizes = [8, 32], strides = [1, 1]} : vector<8x128xf32> to vector<8x32xf32>
    %92 = vector.extract_strided_slice %88 {offsets = [0, 96], sizes = [8, 32], strides = [1, 1]} : vector<8x128xf32> to vector<8x32xf32>
    %93 = arith.mulf %90, %49 : vector<8x32xf32>
    %94 = arith.mulf %89, %91 : vector<8x32xf32>
    %95 = arith.addf %93, %94 : vector<8x32xf32>
    %96 = math.tanh %95 : vector<8x32xf32>
    %97 = arith.mulf %92, %96 : vector<8x32xf32>
    %98 = arith.truncf %97 : vector<8x32xf32> to vector<8x32xbf16>
    %cst_43 = arith.constant dense<0.000000e+00> : vector<8x128xf32>
    %99 = tpu.matmul %98, %14, %cst_43 {dimension_numbers = #tpu.dot_dimension_numbers<[1], [0], [0], [1], [0, 0, 1, 1], [], []>} : vector<8x32xbf16>, vector<32x128xbf16>, vector<8x128xf32> -> vector<8x128xf32>
    %100 = arith.addf %99, %77 : vector<8x128xf32>
    %101 = vector.broadcast %15 : vector<1x128xf32> to vector<8x128xf32>
    %102 = arith.addf %100, %101 : vector<8x128xf32>
    %103 = arith.mulf %102, %8 : vector<8x128xf32>
    %104 = arith.negf %103 : vector<8x128xf32>
    %105 = math.exp %104 : vector<8x128xf32>
    %cst_44 = arith.constant 1.000000e+00 : f32
    %106 = vector.broadcast %cst_44 : f32 to vector<8x128xf32>
    %107 = arith.addf %106, %105 : vector<8x128xf32>
    %108 = arith.divf %106, %107 : vector<8x128xf32>
    %109 = arith.mulf %108, %8 : vector<8x128xf32>
    %110 = arith.addf %109, %11 : vector<8x128xf32>
    %111 = vector.extract_strided_slice %110 {offsets = [0, 0], sizes = [8, 32], strides = [1, 1]} : vector<8x128xf32> to vector<8x32xf32>
    %112 = vector.extract_strided_slice %110 {offsets = [0, 32], sizes = [8, 32], strides = [1, 1]} : vector<8x128xf32> to vector<8x32xf32>
    %113 = vector.extract_strided_slice %110 {offsets = [0, 64], sizes = [8, 32], strides = [1, 1]} : vector<8x128xf32> to vector<8x32xf32>
    %114 = vector.extract_strided_slice %110 {offsets = [0, 96], sizes = [8, 32], strides = [1, 1]} : vector<8x128xf32> to vector<8x32xf32>
    %115 = arith.mulf %112, %71 : vector<8x32xf32>
    %116 = arith.mulf %111, %113 : vector<8x32xf32>
    %117 = arith.addf %115, %116 : vector<8x32xf32>
    %118 = math.tanh %117 : vector<8x32xf32>
    %119 = arith.mulf %114, %118 : vector<8x32xf32>
    %120 = arith.truncf %97 : vector<8x32xf32> to vector<8x32xbf16>
    %cst_45 = arith.constant dense<0.000000e+00> : vector<8x128xf32>
    %121 = tpu.matmul %120, %12, %cst_45 {dimension_numbers = #tpu.dot_dimension_numbers<[1], [0], [0], [1], [0, 0, 1, 1], [], []>} : vector<8x32xbf16>, vector<32x128xbf16>, vector<8x128xf32> -> vector<8x128xf32>
    %122 = arith.truncf %119 : vector<8x32xf32> to vector<8x32xbf16>
    %cst_46 = arith.constant dense<0.000000e+00> : vector<8x128xf32>
    %123 = tpu.matmul %122, %13, %cst_46 {dimension_numbers = #tpu.dot_dimension_numbers<[1], [0], [0], [1], [0, 0, 1, 1], [], []>} : vector<8x32xbf16>, vector<32x128xbf16>, vector<8x128xf32> -> vector<8x128xf32>
    %c2 = arith.constant 2 : index
    %c0_47 = arith.constant 0 : index
    %c0_48 = arith.constant 0 : index
    %124 = vector.load %arg0[%c2, %c0_47, %c0_48] : memref<12x8x128xf32, #tpu.memory_space<vmem>>, vector<1x8x128xf32>
    %125 = vector.shape_cast %124 : vector<1x8x128xf32> to vector<8x128xf32>
    %126 = arith.addf %125, %121 : vector<8x128xf32>
    %127 = arith.mulf %126, %8 : vector<8x128xf32>
    %128 = arith.negf %127 : vector<8x128xf32>
    %129 = math.exp %128 : vector<8x128xf32>
    %cst_49 = arith.constant 1.000000e+00 : f32
    %130 = vector.broadcast %cst_49 : f32 to vector<8x128xf32>
    %131 = arith.addf %130, %129 : vector<8x128xf32>
    %132 = arith.divf %130, %131 : vector<8x128xf32>
    %133 = arith.mulf %132, %8 : vector<8x128xf32>
    %134 = arith.addf %133, %11 : vector<8x128xf32>
    %135 = vector.extract_strided_slice %134 {offsets = [0, 0], sizes = [8, 32], strides = [1, 1]} : vector<8x128xf32> to vector<8x32xf32>
    %136 = vector.extract_strided_slice %134 {offsets = [0, 32], sizes = [8, 32], strides = [1, 1]} : vector<8x128xf32> to vector<8x32xf32>
    %137 = vector.extract_strided_slice %134 {offsets = [0, 64], sizes = [8, 32], strides = [1, 1]} : vector<8x128xf32> to vector<8x32xf32>
    %138 = vector.extract_strided_slice %134 {offsets = [0, 96], sizes = [8, 32], strides = [1, 1]} : vector<8x128xf32> to vector<8x32xf32>
    %139 = arith.mulf %136, %95 : vector<8x32xf32>
    %140 = arith.mulf %135, %137 : vector<8x32xf32>
    %141 = arith.addf %139, %140 : vector<8x32xf32>
    %142 = math.tanh %141 : vector<8x32xf32>
    %143 = arith.mulf %138, %142 : vector<8x32xf32>
    %144 = arith.truncf %143 : vector<8x32xf32> to vector<8x32xbf16>
    %cst_50 = arith.constant dense<0.000000e+00> : vector<8x128xf32>
    %145 = tpu.matmul %144, %14, %cst_50 {dimension_numbers = #tpu.dot_dimension_numbers<[1], [0], [0], [1], [0, 0, 1, 1], [], []>} : vector<8x32xbf16>, vector<32x128xbf16>, vector<8x128xf32> -> vector<8x128xf32>
    %146 = arith.addf %145, %123 : vector<8x128xf32>
    %147 = vector.broadcast %15 : vector<1x128xf32> to vector<8x128xf32>
    %148 = arith.addf %146, %147 : vector<8x128xf32>
    %149 = arith.mulf %148, %8 : vector<8x128xf32>
    %150 = arith.negf %149 : vector<8x128xf32>
    %151 = math.exp %150 : vector<8x128xf32>
    %cst_51 = arith.constant 1.000000e+00 : f32
    %152 = vector.broadcast %cst_51 : f32 to vector<8x128xf32>
    %153 = arith.addf %152, %151 : vector<8x128xf32>
    %154 = arith.divf %152, %153 : vector<8x128xf32>
    %155 = arith.mulf %154, %8 : vector<8x128xf32>
    %156 = arith.addf %155, %11 : vector<8x128xf32>
    %157 = vector.extract_strided_slice %156 {offsets = [0, 0], sizes = [8, 32], strides = [1, 1]} : vector<8x128xf32> to vector<8x32xf32>
    %158 = vector.extract_strided_slice %156 {offsets = [0, 32], sizes = [8, 32], strides = [1, 1]} : vector<8x128xf32> to vector<8x32xf32>
    %159 = vector.extract_strided_slice %156 {offsets = [0, 64], sizes = [8, 32], strides = [1, 1]} : vector<8x128xf32> to vector<8x32xf32>
    %160 = vector.extract_strided_slice %156 {offsets = [0, 96], sizes = [8, 32], strides = [1, 1]} : vector<8x128xf32> to vector<8x32xf32>
    %161 = arith.mulf %158, %117 : vector<8x32xf32>
    %162 = arith.mulf %157, %159 : vector<8x32xf32>
    %163 = arith.addf %161, %162 : vector<8x32xf32>
    %164 = math.tanh %163 : vector<8x32xf32>
    %165 = arith.mulf %160, %164 : vector<8x32xf32>
    %166 = arith.truncf %143 : vector<8x32xf32> to vector<8x32xbf16>
    %cst_52 = arith.constant dense<0.000000e+00> : vector<8x128xf32>
    %167 = tpu.matmul %166, %12, %cst_52 {dimension_numbers = #tpu.dot_dimension_numbers<[1], [0], [0], [1], [0, 0, 1, 1], [], []>} : vector<8x32xbf16>, vector<32x128xbf16>, vector<8x128xf32> -> vector<8x128xf32>
    %168 = arith.truncf %165 : vector<8x32xf32> to vector<8x32xbf16>
    %cst_53 = arith.constant dense<0.000000e+00> : vector<8x128xf32>
    %169 = tpu.matmul %168, %13, %cst_53 {dimension_numbers = #tpu.dot_dimension_numbers<[1], [0], [0], [1], [0, 0, 1, 1], [], []>} : vector<8x32xbf16>, vector<32x128xbf16>, vector<8x128xf32> -> vector<8x128xf32>
    %c3 = arith.constant 3 : index
    %c0_54 = arith.constant 0 : index
    %c0_55 = arith.constant 0 : index
    %170 = vector.load %arg0[%c3, %c0_54, %c0_55] : memref<12x8x128xf32, #tpu.memory_space<vmem>>, vector<1x8x128xf32>
    %171 = vector.shape_cast %170 : vector<1x8x128xf32> to vector<8x128xf32>
    %172 = arith.addf %171, %167 : vector<8x128xf32>
    %173 = arith.mulf %172, %8 : vector<8x128xf32>
    %174 = arith.negf %173 : vector<8x128xf32>
    %175 = math.exp %174 : vector<8x128xf32>
    %cst_56 = arith.constant 1.000000e+00 : f32
    %176 = vector.broadcast %cst_56 : f32 to vector<8x128xf32>
    %177 = arith.addf %176, %175 : vector<8x128xf32>
    %178 = arith.divf %176, %177 : vector<8x128xf32>
    %179 = arith.mulf %178, %8 : vector<8x128xf32>
    %180 = arith.addf %179, %11 : vector<8x128xf32>
    %181 = vector.extract_strided_slice %180 {offsets = [0, 0], sizes = [8, 32], strides = [1, 1]} : vector<8x128xf32> to vector<8x32xf32>
    %182 = vector.extract_strided_slice %180 {offsets = [0, 32], sizes = [8, 32], strides = [1, 1]} : vector<8x128xf32> to vector<8x32xf32>
    %183 = vector.extract_strided_slice %180 {offsets = [0, 64], sizes = [8, 32], strides = [1, 1]} : vector<8x128xf32> to vector<8x32xf32>
    %184 = vector.extract_strided_slice %180 {offsets = [0, 96], sizes = [8, 32], strides = [1, 1]} : vector<8x128xf32> to vector<8x32xf32>
    %185 = arith.mulf %182, %141 : vector<8x32xf32>
    %186 = arith.mulf %181, %183 : vector<8x32xf32>
    %187 = arith.addf %185, %186 : vector<8x32xf32>
    %188 = math.tanh %187 : vector<8x32xf32>
    %189 = arith.mulf %184, %188 : vector<8x32xf32>
    %190 = arith.truncf %189 : vector<8x32xf32> to vector<8x32xbf16>
    %cst_57 = arith.constant dense<0.000000e+00> : vector<8x128xf32>
    %191 = tpu.matmul %190, %14, %cst_57 {dimension_numbers = #tpu.dot_dimension_numbers<[1], [0], [0], [1], [0, 0, 1, 1], [], []>} : vector<8x32xbf16>, vector<32x128xbf16>, vector<8x128xf32> -> vector<8x128xf32>
    %192 = arith.addf %191, %169 : vector<8x128xf32>
    %193 = vector.broadcast %15 : vector<1x128xf32> to vector<8x128xf32>
    %194 = arith.addf %192, %193 : vector<8x128xf32>
    %195 = arith.mulf %194, %8 : vector<8x128xf32>
    %196 = arith.negf %195 : vector<8x128xf32>
    %197 = math.exp %196 : vector<8x128xf32>
    %cst_58 = arith.constant 1.000000e+00 : f32
    %198 = vector.broadcast %cst_58 : f32 to vector<8x128xf32>
    %199 = arith.addf %198, %197 : vector<8x128xf32>
    %200 = arith.divf %198, %199 : vector<8x128xf32>
    %201 = arith.mulf %200, %8 : vector<8x128xf32>
    %202 = arith.addf %201, %11 : vector<8x128xf32>
    %203 = vector.extract_strided_slice %202 {offsets = [0, 0], sizes = [8, 32], strides = [1, 1]} : vector<8x128xf32> to vector<8x32xf32>
    %204 = vector.extract_strided_slice %202 {offsets = [0, 32], sizes = [8, 32], strides = [1, 1]} : vector<8x128xf32> to vector<8x32xf32>
    %205 = vector.extract_strided_slice %202 {offsets = [0, 64], sizes = [8, 32], strides = [1, 1]} : vector<8x128xf32> to vector<8x32xf32>
    %206 = vector.extract_strided_slice %202 {offsets = [0, 96], sizes = [8, 32], strides = [1, 1]} : vector<8x128xf32> to vector<8x32xf32>
    %207 = arith.mulf %204, %163 : vector<8x32xf32>
    %208 = arith.mulf %203, %205 : vector<8x32xf32>
    %209 = arith.addf %207, %208 : vector<8x32xf32>
    %210 = math.tanh %209 : vector<8x32xf32>
    %211 = arith.mulf %206, %210 : vector<8x32xf32>
    %212 = arith.truncf %189 : vector<8x32xf32> to vector<8x32xbf16>
    %cst_59 = arith.constant dense<0.000000e+00> : vector<8x128xf32>
    %213 = tpu.matmul %212, %12, %cst_59 {dimension_numbers = #tpu.dot_dimension_numbers<[1], [0], [0], [1], [0, 0, 1, 1], [], []>} : vector<8x32xbf16>, vector<32x128xbf16>, vector<8x128xf32> -> vector<8x128xf32>
    %214 = arith.truncf %211 : vector<8x32xf32> to vector<8x32xbf16>
    %cst_60 = arith.constant dense<0.000000e+00> : vector<8x128xf32>
    %215 = tpu.matmul %214, %13, %cst_60 {dimension_numbers = #tpu.dot_dimension_numbers<[1], [0], [0], [1], [0, 0, 1, 1], [], []>} : vector<8x32xbf16>, vector<32x128xbf16>, vector<8x128xf32> -> vector<8x128xf32>
    %c4 = arith.constant 4 : index
    %c0_61 = arith.constant 0 : index
    %c0_62 = arith.constant 0 : index
    %216 = vector.load %arg0[%c4, %c0_61, %c0_62] : memref<12x8x128xf32, #tpu.memory_space<vmem>>, vector<1x8x128xf32>
    %217 = vector.shape_cast %216 : vector<1x8x128xf32> to vector<8x128xf32>
    %218 = arith.addf %217, %213 : vector<8x128xf32>
    %219 = arith.mulf %218, %8 : vector<8x128xf32>
    %220 = arith.negf %219 : vector<8x128xf32>
    %221 = math.exp %220 : vector<8x128xf32>
    %cst_63 = arith.constant 1.000000e+00 : f32
    %222 = vector.broadcast %cst_63 : f32 to vector<8x128xf32>
    %223 = arith.addf %222, %221 : vector<8x128xf32>
    %224 = arith.divf %222, %223 : vector<8x128xf32>
    %225 = arith.mulf %224, %8 : vector<8x128xf32>
    %226 = arith.addf %225, %11 : vector<8x128xf32>
    %227 = vector.extract_strided_slice %226 {offsets = [0, 0], sizes = [8, 32], strides = [1, 1]} : vector<8x128xf32> to vector<8x32xf32>
    %228 = vector.extract_strided_slice %226 {offsets = [0, 32], sizes = [8, 32], strides = [1, 1]} : vector<8x128xf32> to vector<8x32xf32>
    %229 = vector.extract_strided_slice %226 {offsets = [0, 64], sizes = [8, 32], strides = [1, 1]} : vector<8x128xf32> to vector<8x32xf32>
    %230 = vector.extract_strided_slice %226 {offsets = [0, 96], sizes = [8, 32], strides = [1, 1]} : vector<8x128xf32> to vector<8x32xf32>
    %231 = arith.mulf %228, %187 : vector<8x32xf32>
    %232 = arith.mulf %227, %229 : vector<8x32xf32>
    %233 = arith.addf %231, %232 : vector<8x32xf32>
    %234 = math.tanh %233 : vector<8x32xf32>
    %235 = arith.mulf %230, %234 : vector<8x32xf32>
    %236 = arith.truncf %235 : vector<8x32xf32> to vector<8x32xbf16>
    %cst_64 = arith.constant dense<0.000000e+00> : vector<8x128xf32>
    %237 = tpu.matmul %236, %14, %cst_64 {dimension_numbers = #tpu.dot_dimension_numbers<[1], [0], [0], [1], [0, 0, 1, 1], [], []>} : vector<8x32xbf16>, vector<32x128xbf16>, vector<8x128xf32> -> vector<8x128xf32>
    %238 = arith.addf %237, %215 : vector<8x128xf32>
    %239 = vector.broadcast %15 : vector<1x128xf32> to vector<8x128xf32>
    %240 = arith.addf %238, %239 : vector<8x128xf32>
    %241 = arith.mulf %240, %8 : vector<8x128xf32>
    %242 = arith.negf %241 : vector<8x128xf32>
    %243 = math.exp %242 : vector<8x128xf32>
    %cst_65 = arith.constant 1.000000e+00 : f32
    %244 = vector.broadcast %cst_65 : f32 to vector<8x128xf32>
    %245 = arith.addf %244, %243 : vector<8x128xf32>
    %246 = arith.divf %244, %245 : vector<8x128xf32>
    %247 = arith.mulf %246, %8 : vector<8x128xf32>
    %248 = arith.addf %247, %11 : vector<8x128xf32>
    %249 = vector.extract_strided_slice %248 {offsets = [0, 0], sizes = [8, 32], strides = [1, 1]} : vector<8x128xf32> to vector<8x32xf32>
    %250 = vector.extract_strided_slice %248 {offsets = [0, 32], sizes = [8, 32], strides = [1, 1]} : vector<8x128xf32> to vector<8x32xf32>
    %251 = vector.extract_strided_slice %248 {offsets = [0, 64], sizes = [8, 32], strides = [1, 1]} : vector<8x128xf32> to vector<8x32xf32>
    %252 = vector.extract_strided_slice %248 {offsets = [0, 96], sizes = [8, 32], strides = [1, 1]} : vector<8x128xf32> to vector<8x32xf32>
    %253 = arith.mulf %250, %209 : vector<8x32xf32>
    %254 = arith.mulf %249, %251 : vector<8x32xf32>
    %255 = arith.addf %253, %254 : vector<8x32xf32>
    %256 = math.tanh %255 : vector<8x32xf32>
    %257 = arith.mulf %252, %256 : vector<8x32xf32>
    %258 = arith.truncf %235 : vector<8x32xf32> to vector<8x32xbf16>
    %cst_66 = arith.constant dense<0.000000e+00> : vector<8x128xf32>
    %259 = tpu.matmul %258, %12, %cst_66 {dimension_numbers = #tpu.dot_dimension_numbers<[1], [0], [0], [1], [0, 0, 1, 1], [], []>} : vector<8x32xbf16>, vector<32x128xbf16>, vector<8x128xf32> -> vector<8x128xf32>
    %260 = arith.truncf %257 : vector<8x32xf32> to vector<8x32xbf16>
    %cst_67 = arith.constant dense<0.000000e+00> : vector<8x128xf32>
    %261 = tpu.matmul %260, %13, %cst_67 {dimension_numbers = #tpu.dot_dimension_numbers<[1], [0], [0], [1], [0, 0, 1, 1], [], []>} : vector<8x32xbf16>, vector<32x128xbf16>, vector<8x128xf32> -> vector<8x128xf32>
    %c5 = arith.constant 5 : index
    %c0_68 = arith.constant 0 : index
    %c0_69 = arith.constant 0 : index
    %262 = vector.load %arg0[%c5, %c0_68, %c0_69] : memref<12x8x128xf32, #tpu.memory_space<vmem>>, vector<1x8x128xf32>
    %263 = vector.shape_cast %262 : vector<1x8x128xf32> to vector<8x128xf32>
    %264 = arith.addf %263, %259 : vector<8x128xf32>
    %265 = arith.mulf %264, %8 : vector<8x128xf32>
    %266 = arith.negf %265 : vector<8x128xf32>
    %267 = math.exp %266 : vector<8x128xf32>
    %cst_70 = arith.constant 1.000000e+00 : f32
    %268 = vector.broadcast %cst_70 : f32 to vector<8x128xf32>
    %269 = arith.addf %268, %267 : vector<8x128xf32>
    %270 = arith.divf %268, %269 : vector<8x128xf32>
    %271 = arith.mulf %270, %8 : vector<8x128xf32>
    %272 = arith.addf %271, %11 : vector<8x128xf32>
    %273 = vector.extract_strided_slice %272 {offsets = [0, 0], sizes = [8, 32], strides = [1, 1]} : vector<8x128xf32> to vector<8x32xf32>
    %274 = vector.extract_strided_slice %272 {offsets = [0, 32], sizes = [8, 32], strides = [1, 1]} : vector<8x128xf32> to vector<8x32xf32>
    %275 = vector.extract_strided_slice %272 {offsets = [0, 64], sizes = [8, 32], strides = [1, 1]} : vector<8x128xf32> to vector<8x32xf32>
    %276 = vector.extract_strided_slice %272 {offsets = [0, 96], sizes = [8, 32], strides = [1, 1]} : vector<8x128xf32> to vector<8x32xf32>
    %277 = arith.mulf %274, %233 : vector<8x32xf32>
    %278 = arith.mulf %273, %275 : vector<8x32xf32>
    %279 = arith.addf %277, %278 : vector<8x32xf32>
    %280 = math.tanh %279 : vector<8x32xf32>
    %281 = arith.mulf %276, %280 : vector<8x32xf32>
    %282 = arith.truncf %281 : vector<8x32xf32> to vector<8x32xbf16>
    %cst_71 = arith.constant dense<0.000000e+00> : vector<8x128xf32>
    %283 = tpu.matmul %282, %14, %cst_71 {dimension_numbers = #tpu.dot_dimension_numbers<[1], [0], [0], [1], [0, 0, 1, 1], [], []>} : vector<8x32xbf16>, vector<32x128xbf16>, vector<8x128xf32> -> vector<8x128xf32>
    %284 = arith.addf %283, %261 : vector<8x128xf32>
    %285 = vector.broadcast %15 : vector<1x128xf32> to vector<8x128xf32>
    %286 = arith.addf %284, %285 : vector<8x128xf32>
    %287 = arith.mulf %286, %8 : vector<8x128xf32>
    %288 = arith.negf %287 : vector<8x128xf32>
    %289 = math.exp %288 : vector<8x128xf32>
    %cst_72 = arith.constant 1.000000e+00 : f32
    %290 = vector.broadcast %cst_72 : f32 to vector<8x128xf32>
    %291 = arith.addf %290, %289 : vector<8x128xf32>
    %292 = arith.divf %290, %291 : vector<8x128xf32>
    %293 = arith.mulf %292, %8 : vector<8x128xf32>
    %294 = arith.addf %293, %11 : vector<8x128xf32>
    %295 = vector.extract_strided_slice %294 {offsets = [0, 0], sizes = [8, 32], strides = [1, 1]} : vector<8x128xf32> to vector<8x32xf32>
    %296 = vector.extract_strided_slice %294 {offsets = [0, 32], sizes = [8, 32], strides = [1, 1]} : vector<8x128xf32> to vector<8x32xf32>
    %297 = vector.extract_strided_slice %294 {offsets = [0, 64], sizes = [8, 32], strides = [1, 1]} : vector<8x128xf32> to vector<8x32xf32>
    %298 = vector.extract_strided_slice %294 {offsets = [0, 96], sizes = [8, 32], strides = [1, 1]} : vector<8x128xf32> to vector<8x32xf32>
    %299 = arith.mulf %296, %255 : vector<8x32xf32>
    %300 = arith.mulf %295, %297 : vector<8x32xf32>
    %301 = arith.addf %299, %300 : vector<8x32xf32>
    %302 = math.tanh %301 : vector<8x32xf32>
    %303 = arith.mulf %298, %302 : vector<8x32xf32>
    %304 = arith.truncf %281 : vector<8x32xf32> to vector<8x32xbf16>
    %cst_73 = arith.constant dense<0.000000e+00> : vector<8x128xf32>
    %305 = tpu.matmul %304, %12, %cst_73 {dimension_numbers = #tpu.dot_dimension_numbers<[1], [0], [0], [1], [0, 0, 1, 1], [], []>} : vector<8x32xbf16>, vector<32x128xbf16>, vector<8x128xf32> -> vector<8x128xf32>
    %306 = arith.truncf %303 : vector<8x32xf32> to vector<8x32xbf16>
    %cst_74 = arith.constant dense<0.000000e+00> : vector<8x128xf32>
    %307 = tpu.matmul %306, %13, %cst_74 {dimension_numbers = #tpu.dot_dimension_numbers<[1], [0], [0], [1], [0, 0, 1, 1], [], []>} : vector<8x32xbf16>, vector<32x128xbf16>, vector<8x128xf32> -> vector<8x128xf32>
    %c6 = arith.constant 6 : index
    %c0_75 = arith.constant 0 : index
    %c0_76 = arith.constant 0 : index
    %308 = vector.load %arg0[%c6, %c0_75, %c0_76] : memref<12x8x128xf32, #tpu.memory_space<vmem>>, vector<1x8x128xf32>
    %309 = vector.shape_cast %308 : vector<1x8x128xf32> to vector<8x128xf32>
    %310 = arith.addf %309, %305 : vector<8x128xf32>
    %311 = arith.mulf %310, %8 : vector<8x128xf32>
    %312 = arith.negf %311 : vector<8x128xf32>
    %313 = math.exp %312 : vector<8x128xf32>
    %cst_77 = arith.constant 1.000000e+00 : f32
    %314 = vector.broadcast %cst_77 : f32 to vector<8x128xf32>
    %315 = arith.addf %314, %313 : vector<8x128xf32>
    %316 = arith.divf %314, %315 : vector<8x128xf32>
    %317 = arith.mulf %316, %8 : vector<8x128xf32>
    %318 = arith.addf %317, %11 : vector<8x128xf32>
    %319 = vector.extract_strided_slice %318 {offsets = [0, 0], sizes = [8, 32], strides = [1, 1]} : vector<8x128xf32> to vector<8x32xf32>
    %320 = vector.extract_strided_slice %318 {offsets = [0, 32], sizes = [8, 32], strides = [1, 1]} : vector<8x128xf32> to vector<8x32xf32>
    %321 = vector.extract_strided_slice %318 {offsets = [0, 64], sizes = [8, 32], strides = [1, 1]} : vector<8x128xf32> to vector<8x32xf32>
    %322 = vector.extract_strided_slice %318 {offsets = [0, 96], sizes = [8, 32], strides = [1, 1]} : vector<8x128xf32> to vector<8x32xf32>
    %323 = arith.mulf %320, %279 : vector<8x32xf32>
    %324 = arith.mulf %319, %321 : vector<8x32xf32>
    %325 = arith.addf %323, %324 : vector<8x32xf32>
    %326 = math.tanh %325 : vector<8x32xf32>
    %327 = arith.mulf %322, %326 : vector<8x32xf32>
    %328 = arith.truncf %327 : vector<8x32xf32> to vector<8x32xbf16>
    %cst_78 = arith.constant dense<0.000000e+00> : vector<8x128xf32>
    %329 = tpu.matmul %328, %14, %cst_78 {dimension_numbers = #tpu.dot_dimension_numbers<[1], [0], [0], [1], [0, 0, 1, 1], [], []>} : vector<8x32xbf16>, vector<32x128xbf16>, vector<8x128xf32> -> vector<8x128xf32>
    %330 = arith.addf %329, %307 : vector<8x128xf32>
    %331 = vector.broadcast %15 : vector<1x128xf32> to vector<8x128xf32>
    %332 = arith.addf %330, %331 : vector<8x128xf32>
    %333 = arith.mulf %332, %8 : vector<8x128xf32>
    %334 = arith.negf %333 : vector<8x128xf32>
    %335 = math.exp %334 : vector<8x128xf32>
    %cst_79 = arith.constant 1.000000e+00 : f32
    %336 = vector.broadcast %cst_79 : f32 to vector<8x128xf32>
    %337 = arith.addf %336, %335 : vector<8x128xf32>
    %338 = arith.divf %336, %337 : vector<8x128xf32>
    %339 = arith.mulf %338, %8 : vector<8x128xf32>
    %340 = arith.addf %339, %11 : vector<8x128xf32>
    %341 = vector.extract_strided_slice %340 {offsets = [0, 0], sizes = [8, 32], strides = [1, 1]} : vector<8x128xf32> to vector<8x32xf32>
    %342 = vector.extract_strided_slice %340 {offsets = [0, 32], sizes = [8, 32], strides = [1, 1]} : vector<8x128xf32> to vector<8x32xf32>
    %343 = vector.extract_strided_slice %340 {offsets = [0, 64], sizes = [8, 32], strides = [1, 1]} : vector<8x128xf32> to vector<8x32xf32>
    %344 = vector.extract_strided_slice %340 {offsets = [0, 96], sizes = [8, 32], strides = [1, 1]} : vector<8x128xf32> to vector<8x32xf32>
    %345 = arith.mulf %342, %301 : vector<8x32xf32>
    %346 = arith.mulf %341, %343 : vector<8x32xf32>
    %347 = arith.addf %345, %346 : vector<8x32xf32>
    %348 = math.tanh %347 : vector<8x32xf32>
    %349 = arith.mulf %344, %348 : vector<8x32xf32>
    %350 = arith.truncf %327 : vector<8x32xf32> to vector<8x32xbf16>
    %cst_80 = arith.constant dense<0.000000e+00> : vector<8x128xf32>
    %351 = tpu.matmul %350, %12, %cst_80 {dimension_numbers = #tpu.dot_dimension_numbers<[1], [0], [0], [1], [0, 0, 1, 1], [], []>} : vector<8x32xbf16>, vector<32x128xbf16>, vector<8x128xf32> -> vector<8x128xf32>
    %352 = arith.truncf %349 : vector<8x32xf32> to vector<8x32xbf16>
    %cst_81 = arith.constant dense<0.000000e+00> : vector<8x128xf32>
    %353 = tpu.matmul %352, %13, %cst_81 {dimension_numbers = #tpu.dot_dimension_numbers<[1], [0], [0], [1], [0, 0, 1, 1], [], []>} : vector<8x32xbf16>, vector<32x128xbf16>, vector<8x128xf32> -> vector<8x128xf32>
    %c7 = arith.constant 7 : index
    %c0_82 = arith.constant 0 : index
    %c0_83 = arith.constant 0 : index
    %354 = vector.load %arg0[%c7, %c0_82, %c0_83] : memref<12x8x128xf32, #tpu.memory_space<vmem>>, vector<1x8x128xf32>
    %355 = vector.shape_cast %354 : vector<1x8x128xf32> to vector<8x128xf32>
    %356 = arith.addf %355, %351 : vector<8x128xf32>
    %357 = arith.mulf %356, %8 : vector<8x128xf32>
    %358 = arith.negf %357 : vector<8x128xf32>
    %359 = math.exp %358 : vector<8x128xf32>
    %cst_84 = arith.constant 1.000000e+00 : f32
    %360 = vector.broadcast %cst_84 : f32 to vector<8x128xf32>
    %361 = arith.addf %360, %359 : vector<8x128xf32>
    %362 = arith.divf %360, %361 : vector<8x128xf32>
    %363 = arith.mulf %362, %8 : vector<8x128xf32>
    %364 = arith.addf %363, %11 : vector<8x128xf32>
    %365 = vector.extract_strided_slice %364 {offsets = [0, 0], sizes = [8, 32], strides = [1, 1]} : vector<8x128xf32> to vector<8x32xf32>
    %366 = vector.extract_strided_slice %364 {offsets = [0, 32], sizes = [8, 32], strides = [1, 1]} : vector<8x128xf32> to vector<8x32xf32>
    %367 = vector.extract_strided_slice %364 {offsets = [0, 64], sizes = [8, 32], strides = [1, 1]} : vector<8x128xf32> to vector<8x32xf32>
    %368 = vector.extract_strided_slice %364 {offsets = [0, 96], sizes = [8, 32], strides = [1, 1]} : vector<8x128xf32> to vector<8x32xf32>
    %369 = arith.mulf %366, %325 : vector<8x32xf32>
    %370 = arith.mulf %365, %367 : vector<8x32xf32>
    %371 = arith.addf %369, %370 : vector<8x32xf32>
    %372 = math.tanh %371 : vector<8x32xf32>
    %373 = arith.mulf %368, %372 : vector<8x32xf32>
    %374 = arith.truncf %373 : vector<8x32xf32> to vector<8x32xbf16>
    %cst_85 = arith.constant dense<0.000000e+00> : vector<8x128xf32>
    %375 = tpu.matmul %374, %14, %cst_85 {dimension_numbers = #tpu.dot_dimension_numbers<[1], [0], [0], [1], [0, 0, 1, 1], [], []>} : vector<8x32xbf16>, vector<32x128xbf16>, vector<8x128xf32> -> vector<8x128xf32>
    %376 = arith.addf %375, %353 : vector<8x128xf32>
    %377 = vector.broadcast %15 : vector<1x128xf32> to vector<8x128xf32>
    %378 = arith.addf %376, %377 : vector<8x128xf32>
    %379 = arith.mulf %378, %8 : vector<8x128xf32>
    %380 = arith.negf %379 : vector<8x128xf32>
    %381 = math.exp %380 : vector<8x128xf32>
    %cst_86 = arith.constant 1.000000e+00 : f32
    %382 = vector.broadcast %cst_86 : f32 to vector<8x128xf32>
    %383 = arith.addf %382, %381 : vector<8x128xf32>
    %384 = arith.divf %382, %383 : vector<8x128xf32>
    %385 = arith.mulf %384, %8 : vector<8x128xf32>
    %386 = arith.addf %385, %11 : vector<8x128xf32>
    %387 = vector.extract_strided_slice %386 {offsets = [0, 0], sizes = [8, 32], strides = [1, 1]} : vector<8x128xf32> to vector<8x32xf32>
    %388 = vector.extract_strided_slice %386 {offsets = [0, 32], sizes = [8, 32], strides = [1, 1]} : vector<8x128xf32> to vector<8x32xf32>
    %389 = vector.extract_strided_slice %386 {offsets = [0, 64], sizes = [8, 32], strides = [1, 1]} : vector<8x128xf32> to vector<8x32xf32>
    %390 = vector.extract_strided_slice %386 {offsets = [0, 96], sizes = [8, 32], strides = [1, 1]} : vector<8x128xf32> to vector<8x32xf32>
    %391 = arith.mulf %388, %347 : vector<8x32xf32>
    %392 = arith.mulf %387, %389 : vector<8x32xf32>
    %393 = arith.addf %391, %392 : vector<8x32xf32>
    %394 = math.tanh %393 : vector<8x32xf32>
    %395 = arith.mulf %390, %394 : vector<8x32xf32>
    %396 = arith.truncf %373 : vector<8x32xf32> to vector<8x32xbf16>
    %cst_87 = arith.constant dense<0.000000e+00> : vector<8x128xf32>
    %397 = tpu.matmul %396, %12, %cst_87 {dimension_numbers = #tpu.dot_dimension_numbers<[1], [0], [0], [1], [0, 0, 1, 1], [], []>} : vector<8x32xbf16>, vector<32x128xbf16>, vector<8x128xf32> -> vector<8x128xf32>
    %398 = arith.truncf %395 : vector<8x32xf32> to vector<8x32xbf16>
    %cst_88 = arith.constant dense<0.000000e+00> : vector<8x128xf32>
    %399 = tpu.matmul %398, %13, %cst_88 {dimension_numbers = #tpu.dot_dimension_numbers<[1], [0], [0], [1], [0, 0, 1, 1], [], []>} : vector<8x32xbf16>, vector<32x128xbf16>, vector<8x128xf32> -> vector<8x128xf32>
    %c8 = arith.constant 8 : index
    %c0_89 = arith.constant 0 : index
    %c0_90 = arith.constant 0 : index
    %400 = vector.load %arg0[%c8, %c0_89, %c0_90] : memref<12x8x128xf32, #tpu.memory_space<vmem>>, vector<1x8x128xf32>
    %401 = vector.shape_cast %400 : vector<1x8x128xf32> to vector<8x128xf32>
    %402 = arith.addf %401, %397 : vector<8x128xf32>
    %403 = arith.mulf %402, %8 : vector<8x128xf32>
    %404 = arith.negf %403 : vector<8x128xf32>
    %405 = math.exp %404 : vector<8x128xf32>
    %cst_91 = arith.constant 1.000000e+00 : f32
    %406 = vector.broadcast %cst_91 : f32 to vector<8x128xf32>
    %407 = arith.addf %406, %405 : vector<8x128xf32>
    %408 = arith.divf %406, %407 : vector<8x128xf32>
    %409 = arith.mulf %408, %8 : vector<8x128xf32>
    %410 = arith.addf %409, %11 : vector<8x128xf32>
    %411 = vector.extract_strided_slice %410 {offsets = [0, 0], sizes = [8, 32], strides = [1, 1]} : vector<8x128xf32> to vector<8x32xf32>
    %412 = vector.extract_strided_slice %410 {offsets = [0, 32], sizes = [8, 32], strides = [1, 1]} : vector<8x128xf32> to vector<8x32xf32>
    %413 = vector.extract_strided_slice %410 {offsets = [0, 64], sizes = [8, 32], strides = [1, 1]} : vector<8x128xf32> to vector<8x32xf32>
    %414 = vector.extract_strided_slice %410 {offsets = [0, 96], sizes = [8, 32], strides = [1, 1]} : vector<8x128xf32> to vector<8x32xf32>
    %415 = arith.mulf %412, %371 : vector<8x32xf32>
    %416 = arith.mulf %411, %413 : vector<8x32xf32>
    %417 = arith.addf %415, %416 : vector<8x32xf32>
    %418 = math.tanh %417 : vector<8x32xf32>
    %419 = arith.mulf %414, %418 : vector<8x32xf32>
    %420 = arith.truncf %419 : vector<8x32xf32> to vector<8x32xbf16>
    %cst_92 = arith.constant dense<0.000000e+00> : vector<8x128xf32>
    %421 = tpu.matmul %420, %14, %cst_92 {dimension_numbers = #tpu.dot_dimension_numbers<[1], [0], [0], [1], [0, 0, 1, 1], [], []>} : vector<8x32xbf16>, vector<32x128xbf16>, vector<8x128xf32> -> vector<8x128xf32>
    %422 = arith.addf %421, %399 : vector<8x128xf32>
    %423 = vector.broadcast %15 : vector<1x128xf32> to vector<8x128xf32>
    %424 = arith.addf %422, %423 : vector<8x128xf32>
    %425 = arith.mulf %424, %8 : vector<8x128xf32>
    %426 = arith.negf %425 : vector<8x128xf32>
    %427 = math.exp %426 : vector<8x128xf32>
    %cst_93 = arith.constant 1.000000e+00 : f32
    %428 = vector.broadcast %cst_93 : f32 to vector<8x128xf32>
    %429 = arith.addf %428, %427 : vector<8x128xf32>
    %430 = arith.divf %428, %429 : vector<8x128xf32>
    %431 = arith.mulf %430, %8 : vector<8x128xf32>
    %432 = arith.addf %431, %11 : vector<8x128xf32>
    %433 = vector.extract_strided_slice %432 {offsets = [0, 0], sizes = [8, 32], strides = [1, 1]} : vector<8x128xf32> to vector<8x32xf32>
    %434 = vector.extract_strided_slice %432 {offsets = [0, 32], sizes = [8, 32], strides = [1, 1]} : vector<8x128xf32> to vector<8x32xf32>
    %435 = vector.extract_strided_slice %432 {offsets = [0, 64], sizes = [8, 32], strides = [1, 1]} : vector<8x128xf32> to vector<8x32xf32>
    %436 = vector.extract_strided_slice %432 {offsets = [0, 96], sizes = [8, 32], strides = [1, 1]} : vector<8x128xf32> to vector<8x32xf32>
    %437 = arith.mulf %434, %393 : vector<8x32xf32>
    %438 = arith.mulf %433, %435 : vector<8x32xf32>
    %439 = arith.addf %437, %438 : vector<8x32xf32>
    %440 = math.tanh %439 : vector<8x32xf32>
    %441 = arith.mulf %436, %440 : vector<8x32xf32>
    %442 = arith.truncf %419 : vector<8x32xf32> to vector<8x32xbf16>
    %cst_94 = arith.constant dense<0.000000e+00> : vector<8x128xf32>
    %443 = tpu.matmul %442, %12, %cst_94 {dimension_numbers = #tpu.dot_dimension_numbers<[1], [0], [0], [1], [0, 0, 1, 1], [], []>} : vector<8x32xbf16>, vector<32x128xbf16>, vector<8x128xf32> -> vector<8x128xf32>
    %444 = arith.truncf %441 : vector<8x32xf32> to vector<8x32xbf16>
    %cst_95 = arith.constant dense<0.000000e+00> : vector<8x128xf32>
    %445 = tpu.matmul %444, %13, %cst_95 {dimension_numbers = #tpu.dot_dimension_numbers<[1], [0], [0], [1], [0, 0, 1, 1], [], []>} : vector<8x32xbf16>, vector<32x128xbf16>, vector<8x128xf32> -> vector<8x128xf32>
    %c9 = arith.constant 9 : index
    %c0_96 = arith.constant 0 : index
    %c0_97 = arith.constant 0 : index
    %446 = vector.load %arg0[%c9, %c0_96, %c0_97] : memref<12x8x128xf32, #tpu.memory_space<vmem>>, vector<1x8x128xf32>
    %447 = vector.shape_cast %446 : vector<1x8x128xf32> to vector<8x128xf32>
    %448 = arith.addf %447, %443 : vector<8x128xf32>
    %449 = arith.mulf %448, %8 : vector<8x128xf32>
    %450 = arith.negf %449 : vector<8x128xf32>
    %451 = math.exp %450 : vector<8x128xf32>
    %cst_98 = arith.constant 1.000000e+00 : f32
    %452 = vector.broadcast %cst_98 : f32 to vector<8x128xf32>
    %453 = arith.addf %452, %451 : vector<8x128xf32>
    %454 = arith.divf %452, %453 : vector<8x128xf32>
    %455 = arith.mulf %454, %8 : vector<8x128xf32>
    %456 = arith.addf %455, %11 : vector<8x128xf32>
    %457 = vector.extract_strided_slice %456 {offsets = [0, 0], sizes = [8, 32], strides = [1, 1]} : vector<8x128xf32> to vector<8x32xf32>
    %458 = vector.extract_strided_slice %456 {offsets = [0, 32], sizes = [8, 32], strides = [1, 1]} : vector<8x128xf32> to vector<8x32xf32>
    %459 = vector.extract_strided_slice %456 {offsets = [0, 64], sizes = [8, 32], strides = [1, 1]} : vector<8x128xf32> to vector<8x32xf32>
    %460 = vector.extract_strided_slice %456 {offsets = [0, 96], sizes = [8, 32], strides = [1, 1]} : vector<8x128xf32> to vector<8x32xf32>
    %461 = arith.mulf %458, %417 : vector<8x32xf32>
    %462 = arith.mulf %457, %459 : vector<8x32xf32>
    %463 = arith.addf %461, %462 : vector<8x32xf32>
    %464 = math.tanh %463 : vector<8x32xf32>
    %465 = arith.mulf %460, %464 : vector<8x32xf32>
    %466 = arith.truncf %465 : vector<8x32xf32> to vector<8x32xbf16>
    %cst_99 = arith.constant dense<0.000000e+00> : vector<8x128xf32>
    %467 = tpu.matmul %466, %14, %cst_99 {dimension_numbers = #tpu.dot_dimension_numbers<[1], [0], [0], [1], [0, 0, 1, 1], [], []>} : vector<8x32xbf16>, vector<32x128xbf16>, vector<8x128xf32> -> vector<8x128xf32>
    %468 = arith.addf %467, %445 : vector<8x128xf32>
    %469 = vector.broadcast %15 : vector<1x128xf32> to vector<8x128xf32>
    %470 = arith.addf %468, %469 : vector<8x128xf32>
    %471 = arith.mulf %470, %8 : vector<8x128xf32>
    %472 = arith.negf %471 : vector<8x128xf32>
    %473 = math.exp %472 : vector<8x128xf32>
    %cst_100 = arith.constant 1.000000e+00 : f32
    %474 = vector.broadcast %cst_100 : f32 to vector<8x128xf32>
    %475 = arith.addf %474, %473 : vector<8x128xf32>
    %476 = arith.divf %474, %475 : vector<8x128xf32>
    %477 = arith.mulf %476, %8 : vector<8x128xf32>
    %478 = arith.addf %477, %11 : vector<8x128xf32>
    %479 = vector.extract_strided_slice %478 {offsets = [0, 0], sizes = [8, 32], strides = [1, 1]} : vector<8x128xf32> to vector<8x32xf32>
    %480 = vector.extract_strided_slice %478 {offsets = [0, 32], sizes = [8, 32], strides = [1, 1]} : vector<8x128xf32> to vector<8x32xf32>
    %481 = vector.extract_strided_slice %478 {offsets = [0, 64], sizes = [8, 32], strides = [1, 1]} : vector<8x128xf32> to vector<8x32xf32>
    %482 = vector.extract_strided_slice %478 {offsets = [0, 96], sizes = [8, 32], strides = [1, 1]} : vector<8x128xf32> to vector<8x32xf32>
    %483 = arith.mulf %480, %439 : vector<8x32xf32>
    %484 = arith.mulf %479, %481 : vector<8x32xf32>
    %485 = arith.addf %483, %484 : vector<8x32xf32>
    %486 = math.tanh %485 : vector<8x32xf32>
    %487 = arith.mulf %482, %486 : vector<8x32xf32>
    %488 = arith.truncf %465 : vector<8x32xf32> to vector<8x32xbf16>
    %cst_101 = arith.constant dense<0.000000e+00> : vector<8x128xf32>
    %489 = tpu.matmul %488, %12, %cst_101 {dimension_numbers = #tpu.dot_dimension_numbers<[1], [0], [0], [1], [0, 0, 1, 1], [], []>} : vector<8x32xbf16>, vector<32x128xbf16>, vector<8x128xf32> -> vector<8x128xf32>
    %490 = arith.truncf %487 : vector<8x32xf32> to vector<8x32xbf16>
    %cst_102 = arith.constant dense<0.000000e+00> : vector<8x128xf32>
    %491 = tpu.matmul %490, %13, %cst_102 {dimension_numbers = #tpu.dot_dimension_numbers<[1], [0], [0], [1], [0, 0, 1, 1], [], []>} : vector<8x32xbf16>, vector<32x128xbf16>, vector<8x128xf32> -> vector<8x128xf32>
    %c10 = arith.constant 10 : index
    %c0_103 = arith.constant 0 : index
    %c0_104 = arith.constant 0 : index
    %492 = vector.load %arg0[%c10, %c0_103, %c0_104] : memref<12x8x128xf32, #tpu.memory_space<vmem>>, vector<1x8x128xf32>
    %493 = vector.shape_cast %492 : vector<1x8x128xf32> to vector<8x128xf32>
    %494 = arith.addf %493, %489 : vector<8x128xf32>
    %495 = arith.mulf %494, %8 : vector<8x128xf32>
    %496 = arith.negf %495 : vector<8x128xf32>
    %497 = math.exp %496 : vector<8x128xf32>
    %cst_105 = arith.constant 1.000000e+00 : f32
    %498 = vector.broadcast %cst_105 : f32 to vector<8x128xf32>
    %499 = arith.addf %498, %497 : vector<8x128xf32>
    %500 = arith.divf %498, %499 : vector<8x128xf32>
    %501 = arith.mulf %500, %8 : vector<8x128xf32>
    %502 = arith.addf %501, %11 : vector<8x128xf32>
    %503 = vector.extract_strided_slice %502 {offsets = [0, 0], sizes = [8, 32], strides = [1, 1]} : vector<8x128xf32> to vector<8x32xf32>
    %504 = vector.extract_strided_slice %502 {offsets = [0, 32], sizes = [8, 32], strides = [1, 1]} : vector<8x128xf32> to vector<8x32xf32>
    %505 = vector.extract_strided_slice %502 {offsets = [0, 64], sizes = [8, 32], strides = [1, 1]} : vector<8x128xf32> to vector<8x32xf32>
    %506 = vector.extract_strided_slice %502 {offsets = [0, 96], sizes = [8, 32], strides = [1, 1]} : vector<8x128xf32> to vector<8x32xf32>
    %507 = arith.mulf %504, %463 : vector<8x32xf32>
    %508 = arith.mulf %503, %505 : vector<8x32xf32>
    %509 = arith.addf %507, %508 : vector<8x32xf32>
    %510 = math.tanh %509 : vector<8x32xf32>
    %511 = arith.mulf %506, %510 : vector<8x32xf32>
    %512 = arith.truncf %511 : vector<8x32xf32> to vector<8x32xbf16>
    %cst_106 = arith.constant dense<0.000000e+00> : vector<8x128xf32>
    %513 = tpu.matmul %512, %14, %cst_106 {dimension_numbers = #tpu.dot_dimension_numbers<[1], [0], [0], [1], [0, 0, 1, 1], [], []>} : vector<8x32xbf16>, vector<32x128xbf16>, vector<8x128xf32> -> vector<8x128xf32>
    %514 = arith.addf %513, %491 : vector<8x128xf32>
    %515 = vector.broadcast %15 : vector<1x128xf32> to vector<8x128xf32>
    %516 = arith.addf %514, %515 : vector<8x128xf32>
    %517 = arith.mulf %516, %8 : vector<8x128xf32>
    %518 = arith.negf %517 : vector<8x128xf32>
    %519 = math.exp %518 : vector<8x128xf32>
    %cst_107 = arith.constant 1.000000e+00 : f32
    %520 = vector.broadcast %cst_107 : f32 to vector<8x128xf32>
    %521 = arith.addf %520, %519 : vector<8x128xf32>
    %522 = arith.divf %520, %521 : vector<8x128xf32>
    %523 = arith.mulf %522, %8 : vector<8x128xf32>
    %524 = arith.addf %523, %11 : vector<8x128xf32>
    %525 = vector.extract_strided_slice %524 {offsets = [0, 0], sizes = [8, 32], strides = [1, 1]} : vector<8x128xf32> to vector<8x32xf32>
    %526 = vector.extract_strided_slice %524 {offsets = [0, 32], sizes = [8, 32], strides = [1, 1]} : vector<8x128xf32> to vector<8x32xf32>
    %527 = vector.extract_strided_slice %524 {offsets = [0, 64], sizes = [8, 32], strides = [1, 1]} : vector<8x128xf32> to vector<8x32xf32>
    %528 = vector.extract_strided_slice %524 {offsets = [0, 96], sizes = [8, 32], strides = [1, 1]} : vector<8x128xf32> to vector<8x32xf32>
    %529 = arith.mulf %526, %485 : vector<8x32xf32>
    %530 = arith.mulf %525, %527 : vector<8x32xf32>
    %531 = arith.addf %529, %530 : vector<8x32xf32>
    %532 = math.tanh %531 : vector<8x32xf32>
    %533 = arith.mulf %528, %532 : vector<8x32xf32>
    %534 = arith.truncf %511 : vector<8x32xf32> to vector<8x32xbf16>
    %cst_108 = arith.constant dense<0.000000e+00> : vector<8x128xf32>
    %535 = tpu.matmul %534, %12, %cst_108 {dimension_numbers = #tpu.dot_dimension_numbers<[1], [0], [0], [1], [0, 0, 1, 1], [], []>} : vector<8x32xbf16>, vector<32x128xbf16>, vector<8x128xf32> -> vector<8x128xf32>
    %536 = arith.truncf %533 : vector<8x32xf32> to vector<8x32xbf16>
    %cst_109 = arith.constant dense<0.000000e+00> : vector<8x128xf32>
    %537 = tpu.matmul %536, %13, %cst_109 {dimension_numbers = #tpu.dot_dimension_numbers<[1], [0], [0], [1], [0, 0, 1, 1], [], []>} : vector<8x32xbf16>, vector<32x128xbf16>, vector<8x128xf32> -> vector<8x128xf32>
    %c11 = arith.constant 11 : index
    %c0_110 = arith.constant 0 : index
    %c0_111 = arith.constant 0 : index
    %538 = vector.load %arg0[%c11, %c0_110, %c0_111] : memref<12x8x128xf32, #tpu.memory_space<vmem>>, vector<1x8x128xf32>
    %539 = vector.shape_cast %538 : vector<1x8x128xf32> to vector<8x128xf32>
    %540 = arith.addf %539, %535 : vector<8x128xf32>
    %541 = arith.mulf %540, %8 : vector<8x128xf32>
    %542 = arith.negf %541 : vector<8x128xf32>
    %543 = math.exp %542 : vector<8x128xf32>
    %cst_112 = arith.constant 1.000000e+00 : f32
    %544 = vector.broadcast %cst_112 : f32 to vector<8x128xf32>
    %545 = arith.addf %544, %543 : vector<8x128xf32>
    %546 = arith.divf %544, %545 : vector<8x128xf32>
    %547 = arith.mulf %546, %8 : vector<8x128xf32>
    %548 = arith.addf %547, %11 : vector<8x128xf32>
    %549 = vector.extract_strided_slice %548 {offsets = [0, 0], sizes = [8, 32], strides = [1, 1]} : vector<8x128xf32> to vector<8x32xf32>
    %550 = vector.extract_strided_slice %548 {offsets = [0, 32], sizes = [8, 32], strides = [1, 1]} : vector<8x128xf32> to vector<8x32xf32>
    %551 = vector.extract_strided_slice %548 {offsets = [0, 64], sizes = [8, 32], strides = [1, 1]} : vector<8x128xf32> to vector<8x32xf32>
    %552 = vector.extract_strided_slice %548 {offsets = [0, 96], sizes = [8, 32], strides = [1, 1]} : vector<8x128xf32> to vector<8x32xf32>
    %553 = arith.mulf %550, %509 : vector<8x32xf32>
    %554 = arith.mulf %549, %551 : vector<8x32xf32>
    %555 = arith.addf %553, %554 : vector<8x32xf32>
    %556 = math.tanh %555 : vector<8x32xf32>
    %557 = arith.mulf %552, %556 : vector<8x32xf32>
    %558 = arith.truncf %557 : vector<8x32xf32> to vector<8x32xbf16>
    %cst_113 = arith.constant dense<0.000000e+00> : vector<8x128xf32>
    %559 = tpu.matmul %558, %14, %cst_113 {dimension_numbers = #tpu.dot_dimension_numbers<[1], [0], [0], [1], [0, 0, 1, 1], [], []>} : vector<8x32xbf16>, vector<32x128xbf16>, vector<8x128xf32> -> vector<8x128xf32>
    %560 = arith.addf %559, %537 : vector<8x128xf32>
    %561 = vector.broadcast %15 : vector<1x128xf32> to vector<8x128xf32>
    %562 = arith.addf %560, %561 : vector<8x128xf32>
    %563 = arith.mulf %562, %8 : vector<8x128xf32>
    %564 = arith.negf %563 : vector<8x128xf32>
    %565 = math.exp %564 : vector<8x128xf32>
    %cst_114 = arith.constant 1.000000e+00 : f32
    %566 = vector.broadcast %cst_114 : f32 to vector<8x128xf32>
    %567 = arith.addf %566, %565 : vector<8x128xf32>
    %568 = arith.divf %566, %567 : vector<8x128xf32>
    %569 = arith.mulf %568, %8 : vector<8x128xf32>
    %570 = arith.addf %569, %11 : vector<8x128xf32>
    %571 = vector.extract_strided_slice %570 {offsets = [0, 0], sizes = [8, 32], strides = [1, 1]} : vector<8x128xf32> to vector<8x32xf32>
    %572 = vector.extract_strided_slice %570 {offsets = [0, 32], sizes = [8, 32], strides = [1, 1]} : vector<8x128xf32> to vector<8x32xf32>
    %573 = vector.extract_strided_slice %570 {offsets = [0, 64], sizes = [8, 32], strides = [1, 1]} : vector<8x128xf32> to vector<8x32xf32>
    %574 = vector.extract_strided_slice %570 {offsets = [0, 96], sizes = [8, 32], strides = [1, 1]} : vector<8x128xf32> to vector<8x32xf32>
    %575 = arith.mulf %572, %531 : vector<8x32xf32>
    %576 = arith.mulf %571, %573 : vector<8x32xf32>
    %577 = arith.addf %575, %576 : vector<8x32xf32>
    %578 = math.tanh %577 : vector<8x32xf32>
    %579 = arith.mulf %574, %578 : vector<8x32xf32>
    %c0_115 = arith.constant 0 : index
    %c0_116 = arith.constant 0 : index
    %580 = vector.load %arg1[%c0_115, %c0_116] : memref<8x128xf32, #tpu.memory_space<vmem>>, vector<8x128xf32>
    %581 = arith.truncf %557 : vector<8x32xf32> to vector<8x32xbf16>
    %cst_117 = arith.constant dense<0.000000e+00> : vector<8x128xf32>
    %582 = tpu.matmul %581, %16, %cst_117 {dimension_numbers = #tpu.dot_dimension_numbers<[1], [0], [0], [1], [0, 0, 1, 1], [], []>} : vector<8x32xbf16>, vector<32x128xbf16>, vector<8x128xf32> -> vector<8x128xf32>
    %583 = arith.truncf %579 : vector<8x32xf32> to vector<8x32xbf16>
    %cst_118 = arith.constant dense<0.000000e+00> : vector<8x128xf32>
    %584 = tpu.matmul %583, %17, %cst_118 {dimension_numbers = #tpu.dot_dimension_numbers<[1], [0], [0], [1], [0, 0, 1, 1], [], []>} : vector<8x32xbf16>, vector<32x128xbf16>, vector<8x128xf32> -> vector<8x128xf32>
    %585 = arith.addf %580, %582 : vector<8x128xf32>
    %586 = vector.broadcast %21 : vector<1x128xf32> to vector<8x128xf32>
    %587 = arith.addf %585, %586 : vector<8x128xf32>
    %588 = arith.mulf %587, %8 : vector<8x128xf32>
    %589 = arith.negf %588 : vector<8x128xf32>
    %590 = math.exp %589 : vector<8x128xf32>
    %cst_119 = arith.constant 1.000000e+00 : f32
    %591 = vector.broadcast %cst_119 : f32 to vector<8x128xf32>
    %592 = arith.addf %591, %590 : vector<8x128xf32>
    %593 = arith.divf %591, %592 : vector<8x128xf32>
    %594 = arith.mulf %593, %8 : vector<8x128xf32>
    %595 = arith.addf %594, %11 : vector<8x128xf32>
    %596 = vector.extract_strided_slice %595 {offsets = [0, 0], sizes = [8, 32], strides = [1, 1]} : vector<8x128xf32> to vector<8x32xf32>
    %597 = vector.extract_strided_slice %595 {offsets = [0, 32], sizes = [8, 32], strides = [1, 1]} : vector<8x128xf32> to vector<8x32xf32>
    %598 = vector.extract_strided_slice %595 {offsets = [0, 64], sizes = [8, 32], strides = [1, 1]} : vector<8x128xf32> to vector<8x32xf32>
    %599 = vector.extract_strided_slice %595 {offsets = [0, 96], sizes = [8, 32], strides = [1, 1]} : vector<8x128xf32> to vector<8x32xf32>
    %600 = arith.mulf %597, %555 : vector<8x32xf32>
    %601 = arith.mulf %596, %598 : vector<8x32xf32>
    %602 = arith.addf %600, %601 : vector<8x32xf32>
    %603 = math.tanh %602 : vector<8x32xf32>
    %604 = arith.mulf %599, %603 : vector<8x32xf32>
    %605 = arith.truncf %604 : vector<8x32xf32> to vector<8x32xbf16>
    %cst_120 = arith.constant dense<0.000000e+00> : vector<8x128xf32>
    %606 = tpu.matmul %605, %18, %cst_120 {dimension_numbers = #tpu.dot_dimension_numbers<[1], [0], [0], [1], [0, 0, 1, 1], [], []>} : vector<8x32xbf16>, vector<32x128xbf16>, vector<8x128xf32> -> vector<8x128xf32>
    %607 = arith.addf %606, %584 : vector<8x128xf32>
    %608 = vector.broadcast %19 : vector<1x128xf32> to vector<8x128xf32>
    %609 = arith.addf %607, %608 : vector<8x128xf32>
    %610 = arith.mulf %609, %8 : vector<8x128xf32>
    %611 = arith.negf %610 : vector<8x128xf32>
    %612 = math.exp %611 : vector<8x128xf32>
    %cst_121 = arith.constant 1.000000e+00 : f32
    %613 = vector.broadcast %cst_121 : f32 to vector<8x128xf32>
    %614 = arith.addf %613, %612 : vector<8x128xf32>
    %615 = arith.divf %613, %614 : vector<8x128xf32>
    %616 = arith.mulf %615, %8 : vector<8x128xf32>
    %617 = arith.addf %616, %11 : vector<8x128xf32>
    %618 = vector.extract_strided_slice %617 {offsets = [0, 0], sizes = [8, 32], strides = [1, 1]} : vector<8x128xf32> to vector<8x32xf32>
    %619 = vector.extract_strided_slice %617 {offsets = [0, 32], sizes = [8, 32], strides = [1, 1]} : vector<8x128xf32> to vector<8x32xf32>
    %620 = vector.extract_strided_slice %617 {offsets = [0, 64], sizes = [8, 32], strides = [1, 1]} : vector<8x128xf32> to vector<8x32xf32>
    %621 = vector.extract_strided_slice %617 {offsets = [0, 96], sizes = [8, 32], strides = [1, 1]} : vector<8x128xf32> to vector<8x32xf32>
    %622 = arith.mulf %619, %577 : vector<8x32xf32>
    %623 = arith.mulf %618, %620 : vector<8x32xf32>
    %624 = arith.addf %622, %623 : vector<8x32xf32>
    %625 = math.tanh %624 : vector<8x32xf32>
    %626 = arith.mulf %621, %625 : vector<8x32xf32>
    %cst_122 = arith.constant dense<0.000000e+00> : vector<8x1xf32>
    %627 = tpu.matmul %626, %22, %cst_122 {dimension_numbers = #tpu.dot_dimension_numbers<[1], [0], [0], [1], [0, 0, 1, 1], [], []>} : vector<8x32xf32>, vector<32x1xf32>, vector<8x1xf32> -> vector<8x1xf32>
    %628 = vector.broadcast %23 : vector<1x1xf32> to vector<8x1xf32>
    %629 = arith.addf %627, %628 : vector<8x1xf32>
    %c0_123 = arith.constant 0 : index
    %c0_124 = arith.constant 0 : index
    %c0_125 = arith.constant 0 : index
    %630 = vector.load %arg16[%c0_123, %c0_124, %c0_125] : memref<8x8x1xf32, #tpu.memory_space<vmem>>, vector<1x8x1xf32>
    %631 = vector.shape_cast %630 : vector<1x8x1xf32> to vector<8x1xf32>
    %632 = vector.shape_cast %629 : vector<8x1xf32> to vector<1x8x1xf32>
    tpu.vector_store %arg16[%c0_123, %c0_124, %c0_125], %632 {strides = array<i32>} : memref<8x8x1xf32, #tpu.memory_space<vmem>>, vector<1x8x1xf32>,
    %c0_126 = arith.constant 0 : index
    %633 = memref.load %arg3[%c0_126] : memref<8xi32, #tpu.memory_space<smem>>
    %c0_i32 = arith.constant 0 : i32
    %634 = arith.cmpi ne, %633, %c0_i32 : i32
    %635 = arith.extui %634 : i1 to i32
    %636 = arith.sitofp %635 : i32 to f32
    %cst_127 = arith.constant dense<0.000000e+00> : vector<8x128xf32>
    %637 = tpu.matmul %629, %20, %cst_127 {dimension_numbers = #tpu.dot_dimension_numbers<[1], [0], [0], [1], [0, 0, 1, 1], [], []>} : vector<8x1xf32>, vector<1x128xf32>, vector<8x128xf32> -> vector<8x128xf32>
    %c0_128 = arith.constant 0 : index
    %c0_129 = arith.constant 0 : index
    %c0_130 = arith.constant 0 : index
    %638 = vector.load %arg2[%c0_128, %c0_129, %c0_130] : memref<8x8x128xf32, #tpu.memory_space<vmem>>, vector<1x8x128xf32>
    %639 = vector.shape_cast %638 : vector<1x8x128xf32> to vector<8x128xf32>
    %640 = vector.broadcast %636 : f32 to vector<8x128xf32>
    %641 = arith.mulf %640, %639 : vector<8x128xf32>
    %cst_131 = arith.constant 1.000000e+00 : f32
    %642 = arith.subf %cst_131, %636 : f32
    %643 = vector.broadcast %642 : f32 to vector<8x128xf32>
    %644 = arith.mulf %643, %637 : vector<8x128xf32>
    %645 = arith.addf %641, %644 : vector<8x128xf32>
    %646 = arith.truncf %604 : vector<8x32xf32> to vector<8x32xbf16>
    %cst_132 = arith.constant dense<0.000000e+00> : vector<8x128xf32>
    %647 = tpu.matmul %646, %16, %cst_132 {dimension_numbers = #tpu.dot_dimension_numbers<[1], [0], [0], [1], [0, 0, 1, 1], [], []>} : vector<8x32xbf16>, vector<32x128xbf16>, vector<8x128xf32> -> vector<8x128xf32>
    %648 = arith.truncf %626 : vector<8x32xf32> to vector<8x32xbf16>
    %cst_133 = arith.constant dense<0.000000e+00> : vector<8x128xf32>
    %649 = tpu.matmul %648, %17, %cst_133 {dimension_numbers = #tpu.dot_dimension_numbers<[1], [0], [0], [1], [0, 0, 1, 1], [], []>} : vector<8x32xbf16>, vector<32x128xbf16>, vector<8x128xf32> -> vector<8x128xf32>
    %650 = arith.addf %645, %647 : vector<8x128xf32>
    %651 = vector.broadcast %21 : vector<1x128xf32> to vector<8x128xf32>
    %652 = arith.addf %650, %651 : vector<8x128xf32>
    %653 = arith.mulf %652, %8 : vector<8x128xf32>
    %654 = arith.negf %653 : vector<8x128xf32>
    %655 = math.exp %654 : vector<8x128xf32>
    %cst_134 = arith.constant 1.000000e+00 : f32
    %656 = vector.broadcast %cst_134 : f32 to vector<8x128xf32>
    %657 = arith.addf %656, %655 : vector<8x128xf32>
    %658 = arith.divf %656, %657 : vector<8x128xf32>
    %659 = arith.mulf %658, %8 : vector<8x128xf32>
    %660 = arith.addf %659, %11 : vector<8x128xf32>
    %661 = vector.extract_strided_slice %660 {offsets = [0, 0], sizes = [8, 32], strides = [1, 1]} : vector<8x128xf32> to vector<8x32xf32>
    %662 = vector.extract_strided_slice %660 {offsets = [0, 32], sizes = [8, 32], strides = [1, 1]} : vector<8x128xf32> to vector<8x32xf32>
    %663 = vector.extract_strided_slice %660 {offsets = [0, 64], sizes = [8, 32], strides = [1, 1]} : vector<8x128xf32> to vector<8x32xf32>
    %664 = vector.extract_strided_slice %660 {offsets = [0, 96], sizes = [8, 32], strides = [1, 1]} : vector<8x128xf32> to vector<8x32xf32>
    %665 = arith.mulf %662, %602 : vector<8x32xf32>
    %666 = arith.mulf %661, %663 : vector<8x32xf32>
    %667 = arith.addf %665, %666 : vector<8x32xf32>
    %668 = math.tanh %667 : vector<8x32xf32>
    %669 = arith.mulf %664, %668 : vector<8x32xf32>
    %670 = arith.truncf %669 : vector<8x32xf32> to vector<8x32xbf16>
    %cst_135 = arith.constant dense<0.000000e+00> : vector<8x128xf32>
    %671 = tpu.matmul %670, %18, %cst_135 {dimension_numbers = #tpu.dot_dimension_numbers<[1], [0], [0], [1], [0, 0, 1, 1], [], []>} : vector<8x32xbf16>, vector<32x128xbf16>, vector<8x128xf32> -> vector<8x128xf32>
    %672 = arith.addf %671, %649 : vector<8x128xf32>
    %673 = vector.broadcast %19 : vector<1x128xf32> to vector<8x128xf32>
    %674 = arith.addf %672, %673 : vector<8x128xf32>
    %675 = arith.mulf %674, %8 : vector<8x128xf32>
    %676 = arith.negf %675 : vector<8x128xf32>
    %677 = math.exp %676 : vector<8x128xf32>
    %cst_136 = arith.constant 1.000000e+00 : f32
    %678 = vector.broadcast %cst_136 : f32 to vector<8x128xf32>
    %679 = arith.addf %678, %677 : vector<8x128xf32>
    %680 = arith.divf %678, %679 : vector<8x128xf32>
    %681 = arith.mulf %680, %8 : vector<8x128xf32>
    %682 = arith.addf %681, %11 : vector<8x128xf32>
    %683 = vector.extract_strided_slice %682 {offsets = [0, 0], sizes = [8, 32], strides = [1, 1]} : vector<8x128xf32> to vector<8x32xf32>
    %684 = vector.extract_strided_slice %682 {offsets = [0, 32], sizes = [8, 32], strides = [1, 1]} : vector<8x128xf32> to vector<8x32xf32>
    %685 = vector.extract_strided_slice %682 {offsets = [0, 64], sizes = [8, 32], strides = [1, 1]} : vector<8x128xf32> to vector<8x32xf32>
    %686 = vector.extract_strided_slice %682 {offsets = [0, 96], sizes = [8, 32], strides = [1, 1]} : vector<8x128xf32> to vector<8x32xf32>
    %687 = arith.mulf %684, %624 : vector<8x32xf32>
    %688 = arith.mulf %683, %685 : vector<8x32xf32>
    %689 = arith.addf %687, %688 : vector<8x32xf32>
    %690 = math.tanh %689 : vector<8x32xf32>
    %691 = arith.mulf %686, %690 : vector<8x32xf32>
    %cst_137 = arith.constant dense<0.000000e+00> : vector<8x1xf32>
    %692 = tpu.matmul %691, %22, %cst_137 {dimension_numbers = #tpu.dot_dimension_numbers<[1], [0], [0], [1], [0, 0, 1, 1], [], []>} : vector<8x32xf32>, vector<32x1xf32>, vector<8x1xf32> -> vector<8x1xf32>
    %693 = vector.broadcast %23 : vector<1x1xf32> to vector<8x1xf32>
    %694 = arith.addf %692, %693 : vector<8x1xf32>
    %c1_138 = arith.constant 1 : index
    %c0_139 = arith.constant 0 : index
    %c0_140 = arith.constant 0 : index
    %695 = vector.load %arg16[%c1_138, %c0_139, %c0_140] : memref<8x8x1xf32, #tpu.memory_space<vmem>>, vector<1x8x1xf32>
    %696 = vector.shape_cast %695 : vector<1x8x1xf32> to vector<8x1xf32>
    %697 = vector.shape_cast %694 : vector<8x1xf32> to vector<1x8x1xf32>
    tpu.vector_store %arg16[%c1_138, %c0_139, %c0_140], %697 {strides = array<i32>} : memref<8x8x1xf32, #tpu.memory_space<vmem>>, vector<1x8x1xf32>,
    %c1_141 = arith.constant 1 : index
    %698 = memref.load %arg3[%c1_141] : memref<8xi32, #tpu.memory_space<smem>>
    %c0_i32_142 = arith.constant 0 : i32
    %699 = arith.cmpi ne, %698, %c0_i32_142 : i32
    %700 = arith.extui %699 : i1 to i32
    %701 = arith.sitofp %700 : i32 to f32
    %cst_143 = arith.constant dense<0.000000e+00> : vector<8x128xf32>
    %702 = tpu.matmul %694, %20, %cst_143 {dimension_numbers = #tpu.dot_dimension_numbers<[1], [0], [0], [1], [0, 0, 1, 1], [], []>} : vector<8x1xf32>, vector<1x128xf32>, vector<8x128xf32> -> vector<8x128xf32>
    %c1_144 = arith.constant 1 : index
    %c0_145 = arith.constant 0 : index
    %c0_146 = arith.constant 0 : index
    %703 = vector.load %arg2[%c1_144, %c0_145, %c0_146] : memref<8x8x128xf32, #tpu.memory_space<vmem>>, vector<1x8x128xf32>
    %704 = vector.shape_cast %703 : vector<1x8x128xf32> to vector<8x128xf32>
    %705 = vector.broadcast %701 : f32 to vector<8x128xf32>
    %706 = arith.mulf %705, %704 : vector<8x128xf32>
    %cst_147 = arith.constant 1.000000e+00 : f32
    %707 = arith.subf %cst_147, %701 : f32
    %708 = vector.broadcast %707 : f32 to vector<8x128xf32>
    %709 = arith.mulf %708, %702 : vector<8x128xf32>
    %710 = arith.addf %706, %709 : vector<8x128xf32>
    %711 = arith.truncf %669 : vector<8x32xf32> to vector<8x32xbf16>
    %cst_148 = arith.constant dense<0.000000e+00> : vector<8x128xf32>
    %712 = tpu.matmul %711, %16, %cst_148 {dimension_numbers = #tpu.dot_dimension_numbers<[1], [0], [0], [1], [0, 0, 1, 1], [], []>} : vector<8x32xbf16>, vector<32x128xbf16>, vector<8x128xf32> -> vector<8x128xf32>
    %713 = arith.truncf %691 : vector<8x32xf32> to vector<8x32xbf16>
    %cst_149 = arith.constant dense<0.000000e+00> : vector<8x128xf32>
    %714 = tpu.matmul %713, %17, %cst_149 {dimension_numbers = #tpu.dot_dimension_numbers<[1], [0], [0], [1], [0, 0, 1, 1], [], []>} : vector<8x32xbf16>, vector<32x128xbf16>, vector<8x128xf32> -> vector<8x128xf32>
    %715 = arith.addf %710, %712 : vector<8x128xf32>
    %716 = vector.broadcast %21 : vector<1x128xf32> to vector<8x128xf32>
    %717 = arith.addf %715, %716 : vector<8x128xf32>
    %718 = arith.mulf %717, %8 : vector<8x128xf32>
    %719 = arith.negf %718 : vector<8x128xf32>
    %720 = math.exp %719 : vector<8x128xf32>
    %cst_150 = arith.constant 1.000000e+00 : f32
    %721 = vector.broadcast %cst_150 : f32 to vector<8x128xf32>
    %722 = arith.addf %721, %720 : vector<8x128xf32>
    %723 = arith.divf %721, %722 : vector<8x128xf32>
    %724 = arith.mulf %723, %8 : vector<8x128xf32>
    %725 = arith.addf %724, %11 : vector<8x128xf32>
    %726 = vector.extract_strided_slice %725 {offsets = [0, 0], sizes = [8, 32], strides = [1, 1]} : vector<8x128xf32> to vector<8x32xf32>
    %727 = vector.extract_strided_slice %725 {offsets = [0, 32], sizes = [8, 32], strides = [1, 1]} : vector<8x128xf32> to vector<8x32xf32>
    %728 = vector.extract_strided_slice %725 {offsets = [0, 64], sizes = [8, 32], strides = [1, 1]} : vector<8x128xf32> to vector<8x32xf32>
    %729 = vector.extract_strided_slice %725 {offsets = [0, 96], sizes = [8, 32], strides = [1, 1]} : vector<8x128xf32> to vector<8x32xf32>
    %730 = arith.mulf %727, %667 : vector<8x32xf32>
    %731 = arith.mulf %726, %728 : vector<8x32xf32>
    %732 = arith.addf %730, %731 : vector<8x32xf32>
    %733 = math.tanh %732 : vector<8x32xf32>
    %734 = arith.mulf %729, %733 : vector<8x32xf32>
    %735 = arith.truncf %734 : vector<8x32xf32> to vector<8x32xbf16>
    %cst_151 = arith.constant dense<0.000000e+00> : vector<8x128xf32>
    %736 = tpu.matmul %735, %18, %cst_151 {dimension_numbers = #tpu.dot_dimension_numbers<[1], [0], [0], [1], [0, 0, 1, 1], [], []>} : vector<8x32xbf16>, vector<32x128xbf16>, vector<8x128xf32> -> vector<8x128xf32>
    %737 = arith.addf %736, %714 : vector<8x128xf32>
    %738 = vector.broadcast %19 : vector<1x128xf32> to vector<8x128xf32>
    %739 = arith.addf %737, %738 : vector<8x128xf32>
    %740 = arith.mulf %739, %8 : vector<8x128xf32>
    %741 = arith.negf %740 : vector<8x128xf32>
    %742 = math.exp %741 : vector<8x128xf32>
    %cst_152 = arith.constant 1.000000e+00 : f32
    %743 = vector.broadcast %cst_152 : f32 to vector<8x128xf32>
    %744 = arith.addf %743, %742 : vector<8x128xf32>
    %745 = arith.divf %743, %744 : vector<8x128xf32>
    %746 = arith.mulf %745, %8 : vector<8x128xf32>
    %747 = arith.addf %746, %11 : vector<8x128xf32>
    %748 = vector.extract_strided_slice %747 {offsets = [0, 0], sizes = [8, 32], strides = [1, 1]} : vector<8x128xf32> to vector<8x32xf32>
    %749 = vector.extract_strided_slice %747 {offsets = [0, 32], sizes = [8, 32], strides = [1, 1]} : vector<8x128xf32> to vector<8x32xf32>
    %750 = vector.extract_strided_slice %747 {offsets = [0, 64], sizes = [8, 32], strides = [1, 1]} : vector<8x128xf32> to vector<8x32xf32>
    %751 = vector.extract_strided_slice %747 {offsets = [0, 96], sizes = [8, 32], strides = [1, 1]} : vector<8x128xf32> to vector<8x32xf32>
    %752 = arith.mulf %749, %689 : vector<8x32xf32>
    %753 = arith.mulf %748, %750 : vector<8x32xf32>
    %754 = arith.addf %752, %753 : vector<8x32xf32>
    %755 = math.tanh %754 : vector<8x32xf32>
    %756 = arith.mulf %751, %755 : vector<8x32xf32>
    %cst_153 = arith.constant dense<0.000000e+00> : vector<8x1xf32>
    %757 = tpu.matmul %756, %22, %cst_153 {dimension_numbers = #tpu.dot_dimension_numbers<[1], [0], [0], [1], [0, 0, 1, 1], [], []>} : vector<8x32xf32>, vector<32x1xf32>, vector<8x1xf32> -> vector<8x1xf32>
    %758 = vector.broadcast %23 : vector<1x1xf32> to vector<8x1xf32>
    %759 = arith.addf %757, %758 : vector<8x1xf32>
    %c2_154 = arith.constant 2 : index
    %c0_155 = arith.constant 0 : index
    %c0_156 = arith.constant 0 : index
    %760 = vector.load %arg16[%c2_154, %c0_155, %c0_156] : memref<8x8x1xf32, #tpu.memory_space<vmem>>, vector<1x8x1xf32>
    %761 = vector.shape_cast %760 : vector<1x8x1xf32> to vector<8x1xf32>
    %762 = vector.shape_cast %759 : vector<8x1xf32> to vector<1x8x1xf32>
    tpu.vector_store %arg16[%c2_154, %c0_155, %c0_156], %762 {strides = array<i32>} : memref<8x8x1xf32, #tpu.memory_space<vmem>>, vector<1x8x1xf32>,
    %c2_157 = arith.constant 2 : index
    %763 = memref.load %arg3[%c2_157] : memref<8xi32, #tpu.memory_space<smem>>
    %c0_i32_158 = arith.constant 0 : i32
    %764 = arith.cmpi ne, %763, %c0_i32_158 : i32
    %765 = arith.extui %764 : i1 to i32
    %766 = arith.sitofp %765 : i32 to f32
    %cst_159 = arith.constant dense<0.000000e+00> : vector<8x128xf32>
    %767 = tpu.matmul %759, %20, %cst_159 {dimension_numbers = #tpu.dot_dimension_numbers<[1], [0], [0], [1], [0, 0, 1, 1], [], []>} : vector<8x1xf32>, vector<1x128xf32>, vector<8x128xf32> -> vector<8x128xf32>
    %c2_160 = arith.constant 2 : index
    %c0_161 = arith.constant 0 : index
    %c0_162 = arith.constant 0 : index
    %768 = vector.load %arg2[%c2_160, %c0_161, %c0_162] : memref<8x8x128xf32, #tpu.memory_space<vmem>>, vector<1x8x128xf32>
    %769 = vector.shape_cast %768 : vector<1x8x128xf32> to vector<8x128xf32>
    %770 = vector.broadcast %766 : f32 to vector<8x128xf32>
    %771 = arith.mulf %770, %769 : vector<8x128xf32>
    %cst_163 = arith.constant 1.000000e+00 : f32
    %772 = arith.subf %cst_163, %766 : f32
    %773 = vector.broadcast %772 : f32 to vector<8x128xf32>
    %774 = arith.mulf %773, %767 : vector<8x128xf32>
    %775 = arith.addf %771, %774 : vector<8x128xf32>
    %776 = arith.truncf %734 : vector<8x32xf32> to vector<8x32xbf16>
    %cst_164 = arith.constant dense<0.000000e+00> : vector<8x128xf32>
    %777 = tpu.matmul %776, %16, %cst_164 {dimension_numbers = #tpu.dot_dimension_numbers<[1], [0], [0], [1], [0, 0, 1, 1], [], []>} : vector<8x32xbf16>, vector<32x128xbf16>, vector<8x128xf32> -> vector<8x128xf32>
    %778 = arith.truncf %756 : vector<8x32xf32> to vector<8x32xbf16>
    %cst_165 = arith.constant dense<0.000000e+00> : vector<8x128xf32>
    %779 = tpu.matmul %778, %17, %cst_165 {dimension_numbers = #tpu.dot_dimension_numbers<[1], [0], [0], [1], [0, 0, 1, 1], [], []>} : vector<8x32xbf16>, vector<32x128xbf16>, vector<8x128xf32> -> vector<8x128xf32>
    %780 = arith.addf %775, %777 : vector<8x128xf32>
    %781 = vector.broadcast %21 : vector<1x128xf32> to vector<8x128xf32>
    %782 = arith.addf %780, %781 : vector<8x128xf32>
    %783 = arith.mulf %782, %8 : vector<8x128xf32>
    %784 = arith.negf %783 : vector<8x128xf32>
    %785 = math.exp %784 : vector<8x128xf32>
    %cst_166 = arith.constant 1.000000e+00 : f32
    %786 = vector.broadcast %cst_166 : f32 to vector<8x128xf32>
    %787 = arith.addf %786, %785 : vector<8x128xf32>
    %788 = arith.divf %786, %787 : vector<8x128xf32>
    %789 = arith.mulf %788, %8 : vector<8x128xf32>
    %790 = arith.addf %789, %11 : vector<8x128xf32>
    %791 = vector.extract_strided_slice %790 {offsets = [0, 0], sizes = [8, 32], strides = [1, 1]} : vector<8x128xf32> to vector<8x32xf32>
    %792 = vector.extract_strided_slice %790 {offsets = [0, 32], sizes = [8, 32], strides = [1, 1]} : vector<8x128xf32> to vector<8x32xf32>
    %793 = vector.extract_strided_slice %790 {offsets = [0, 64], sizes = [8, 32], strides = [1, 1]} : vector<8x128xf32> to vector<8x32xf32>
    %794 = vector.extract_strided_slice %790 {offsets = [0, 96], sizes = [8, 32], strides = [1, 1]} : vector<8x128xf32> to vector<8x32xf32>
    %795 = arith.mulf %792, %732 : vector<8x32xf32>
    %796 = arith.mulf %791, %793 : vector<8x32xf32>
    %797 = arith.addf %795, %796 : vector<8x32xf32>
    %798 = math.tanh %797 : vector<8x32xf32>
    %799 = arith.mulf %794, %798 : vector<8x32xf32>
    %800 = arith.truncf %799 : vector<8x32xf32> to vector<8x32xbf16>
    %cst_167 = arith.constant dense<0.000000e+00> : vector<8x128xf32>
    %801 = tpu.matmul %800, %18, %cst_167 {dimension_numbers = #tpu.dot_dimension_numbers<[1], [0], [0], [1], [0, 0, 1, 1], [], []>} : vector<8x32xbf16>, vector<32x128xbf16>, vector<8x128xf32> -> vector<8x128xf32>
    %802 = arith.addf %801, %779 : vector<8x128xf32>
    %803 = vector.broadcast %19 : vector<1x128xf32> to vector<8x128xf32>
    %804 = arith.addf %802, %803 : vector<8x128xf32>
    %805 = arith.mulf %804, %8 : vector<8x128xf32>
    %806 = arith.negf %805 : vector<8x128xf32>
    %807 = math.exp %806 : vector<8x128xf32>
    %cst_168 = arith.constant 1.000000e+00 : f32
    %808 = vector.broadcast %cst_168 : f32 to vector<8x128xf32>
    %809 = arith.addf %808, %807 : vector<8x128xf32>
    %810 = arith.divf %808, %809 : vector<8x128xf32>
    %811 = arith.mulf %810, %8 : vector<8x128xf32>
    %812 = arith.addf %811, %11 : vector<8x128xf32>
    %813 = vector.extract_strided_slice %812 {offsets = [0, 0], sizes = [8, 32], strides = [1, 1]} : vector<8x128xf32> to vector<8x32xf32>
    %814 = vector.extract_strided_slice %812 {offsets = [0, 32], sizes = [8, 32], strides = [1, 1]} : vector<8x128xf32> to vector<8x32xf32>
    %815 = vector.extract_strided_slice %812 {offsets = [0, 64], sizes = [8, 32], strides = [1, 1]} : vector<8x128xf32> to vector<8x32xf32>
    %816 = vector.extract_strided_slice %812 {offsets = [0, 96], sizes = [8, 32], strides = [1, 1]} : vector<8x128xf32> to vector<8x32xf32>
    %817 = arith.mulf %814, %754 : vector<8x32xf32>
    %818 = arith.mulf %813, %815 : vector<8x32xf32>
    %819 = arith.addf %817, %818 : vector<8x32xf32>
    %820 = math.tanh %819 : vector<8x32xf32>
    %821 = arith.mulf %816, %820 : vector<8x32xf32>
    %cst_169 = arith.constant dense<0.000000e+00> : vector<8x1xf32>
    %822 = tpu.matmul %821, %22, %cst_169 {dimension_numbers = #tpu.dot_dimension_numbers<[1], [0], [0], [1], [0, 0, 1, 1], [], []>} : vector<8x32xf32>, vector<32x1xf32>, vector<8x1xf32> -> vector<8x1xf32>
    %823 = vector.broadcast %23 : vector<1x1xf32> to vector<8x1xf32>
    %824 = arith.addf %822, %823 : vector<8x1xf32>
    %c3_170 = arith.constant 3 : index
    %c0_171 = arith.constant 0 : index
    %c0_172 = arith.constant 0 : index
    %825 = vector.load %arg16[%c3_170, %c0_171, %c0_172] : memref<8x8x1xf32, #tpu.memory_space<vmem>>, vector<1x8x1xf32>
    %826 = vector.shape_cast %825 : vector<1x8x1xf32> to vector<8x1xf32>
    %827 = vector.shape_cast %824 : vector<8x1xf32> to vector<1x8x1xf32>
    tpu.vector_store %arg16[%c3_170, %c0_171, %c0_172], %827 {strides = array<i32>} : memref<8x8x1xf32, #tpu.memory_space<vmem>>, vector<1x8x1xf32>,
    %c3_173 = arith.constant 3 : index
    %828 = memref.load %arg3[%c3_173] : memref<8xi32, #tpu.memory_space<smem>>
    %c0_i32_174 = arith.constant 0 : i32
    %829 = arith.cmpi ne, %828, %c0_i32_174 : i32
    %830 = arith.extui %829 : i1 to i32
    %831 = arith.sitofp %830 : i32 to f32
    %cst_175 = arith.constant dense<0.000000e+00> : vector<8x128xf32>
    %832 = tpu.matmul %824, %20, %cst_175 {dimension_numbers = #tpu.dot_dimension_numbers<[1], [0], [0], [1], [0, 0, 1, 1], [], []>} : vector<8x1xf32>, vector<1x128xf32>, vector<8x128xf32> -> vector<8x128xf32>
    %c3_176 = arith.constant 3 : index
    %c0_177 = arith.constant 0 : index
    %c0_178 = arith.constant 0 : index
    %833 = vector.load %arg2[%c3_176, %c0_177, %c0_178] : memref<8x8x128xf32, #tpu.memory_space<vmem>>, vector<1x8x128xf32>
    %834 = vector.shape_cast %833 : vector<1x8x128xf32> to vector<8x128xf32>
    %835 = vector.broadcast %831 : f32 to vector<8x128xf32>
    %836 = arith.mulf %835, %834 : vector<8x128xf32>
    %cst_179 = arith.constant 1.000000e+00 : f32
    %837 = arith.subf %cst_179, %831 : f32
    %838 = vector.broadcast %837 : f32 to vector<8x128xf32>
    %839 = arith.mulf %838, %832 : vector<8x128xf32>
    %840 = arith.addf %836, %839 : vector<8x128xf32>
    %841 = arith.truncf %799 : vector<8x32xf32> to vector<8x32xbf16>
    %cst_180 = arith.constant dense<0.000000e+00> : vector<8x128xf32>
    %842 = tpu.matmul %841, %16, %cst_180 {dimension_numbers = #tpu.dot_dimension_numbers<[1], [0], [0], [1], [0, 0, 1, 1], [], []>} : vector<8x32xbf16>, vector<32x128xbf16>, vector<8x128xf32> -> vector<8x128xf32>
    %843 = arith.truncf %821 : vector<8x32xf32> to vector<8x32xbf16>
    %cst_181 = arith.constant dense<0.000000e+00> : vector<8x128xf32>
    %844 = tpu.matmul %843, %17, %cst_181 {dimension_numbers = #tpu.dot_dimension_numbers<[1], [0], [0], [1], [0, 0, 1, 1], [], []>} : vector<8x32xbf16>, vector<32x128xbf16>, vector<8x128xf32> -> vector<8x128xf32>
    %845 = arith.addf %840, %842 : vector<8x128xf32>
    %846 = vector.broadcast %21 : vector<1x128xf32> to vector<8x128xf32>
    %847 = arith.addf %845, %846 : vector<8x128xf32>
    %848 = arith.mulf %847, %8 : vector<8x128xf32>
    %849 = arith.negf %848 : vector<8x128xf32>
    %850 = math.exp %849 : vector<8x128xf32>
    %cst_182 = arith.constant 1.000000e+00 : f32
    %851 = vector.broadcast %cst_182 : f32 to vector<8x128xf32>
    %852 = arith.addf %851, %850 : vector<8x128xf32>
    %853 = arith.divf %851, %852 : vector<8x128xf32>
    %854 = arith.mulf %853, %8 : vector<8x128xf32>
    %855 = arith.addf %854, %11 : vector<8x128xf32>
    %856 = vector.extract_strided_slice %855 {offsets = [0, 0], sizes = [8, 32], strides = [1, 1]} : vector<8x128xf32> to vector<8x32xf32>
    %857 = vector.extract_strided_slice %855 {offsets = [0, 32], sizes = [8, 32], strides = [1, 1]} : vector<8x128xf32> to vector<8x32xf32>
    %858 = vector.extract_strided_slice %855 {offsets = [0, 64], sizes = [8, 32], strides = [1, 1]} : vector<8x128xf32> to vector<8x32xf32>
    %859 = vector.extract_strided_slice %855 {offsets = [0, 96], sizes = [8, 32], strides = [1, 1]} : vector<8x128xf32> to vector<8x32xf32>
    %860 = arith.mulf %857, %797 : vector<8x32xf32>
    %861 = arith.mulf %856, %858 : vector<8x32xf32>
    %862 = arith.addf %860, %861 : vector<8x32xf32>
    %863 = math.tanh %862 : vector<8x32xf32>
    %864 = arith.mulf %859, %863 : vector<8x32xf32>
    %865 = arith.truncf %864 : vector<8x32xf32> to vector<8x32xbf16>
    %cst_183 = arith.constant dense<0.000000e+00> : vector<8x128xf32>
    %866 = tpu.matmul %865, %18, %cst_183 {dimension_numbers = #tpu.dot_dimension_numbers<[1], [0], [0], [1], [0, 0, 1, 1], [], []>} : vector<8x32xbf16>, vector<32x128xbf16>, vector<8x128xf32> -> vector<8x128xf32>
    %867 = arith.addf %866, %844 : vector<8x128xf32>
    %868 = vector.broadcast %19 : vector<1x128xf32> to vector<8x128xf32>
    %869 = arith.addf %867, %868 : vector<8x128xf32>
    %870 = arith.mulf %869, %8 : vector<8x128xf32>
    %871 = arith.negf %870 : vector<8x128xf32>
    %872 = math.exp %871 : vector<8x128xf32>
    %cst_184 = arith.constant 1.000000e+00 : f32
    %873 = vector.broadcast %cst_184 : f32 to vector<8x128xf32>
    %874 = arith.addf %873, %872 : vector<8x128xf32>
    %875 = arith.divf %873, %874 : vector<8x128xf32>
    %876 = arith.mulf %875, %8 : vector<8x128xf32>
    %877 = arith.addf %876, %11 : vector<8x128xf32>
    %878 = vector.extract_strided_slice %877 {offsets = [0, 0], sizes = [8, 32], strides = [1, 1]} : vector<8x128xf32> to vector<8x32xf32>
    %879 = vector.extract_strided_slice %877 {offsets = [0, 32], sizes = [8, 32], strides = [1, 1]} : vector<8x128xf32> to vector<8x32xf32>
    %880 = vector.extract_strided_slice %877 {offsets = [0, 64], sizes = [8, 32], strides = [1, 1]} : vector<8x128xf32> to vector<8x32xf32>
    %881 = vector.extract_strided_slice %877 {offsets = [0, 96], sizes = [8, 32], strides = [1, 1]} : vector<8x128xf32> to vector<8x32xf32>
    %882 = arith.mulf %879, %819 : vector<8x32xf32>
    %883 = arith.mulf %878, %880 : vector<8x32xf32>
    %884 = arith.addf %882, %883 : vector<8x32xf32>
    %885 = math.tanh %884 : vector<8x32xf32>
    %886 = arith.mulf %881, %885 : vector<8x32xf32>
    %cst_185 = arith.constant dense<0.000000e+00> : vector<8x1xf32>
    %887 = tpu.matmul %886, %22, %cst_185 {dimension_numbers = #tpu.dot_dimension_numbers<[1], [0], [0], [1], [0, 0, 1, 1], [], []>} : vector<8x32xf32>, vector<32x1xf32>, vector<8x1xf32> -> vector<8x1xf32>
    %888 = vector.broadcast %23 : vector<1x1xf32> to vector<8x1xf32>
    %889 = arith.addf %887, %888 : vector<8x1xf32>
    %c4_186 = arith.constant 4 : index
    %c0_187 = arith.constant 0 : index
    %c0_188 = arith.constant 0 : index
    %890 = vector.load %arg16[%c4_186, %c0_187, %c0_188] : memref<8x8x1xf32, #tpu.memory_space<vmem>>, vector<1x8x1xf32>
    %891 = vector.shape_cast %890 : vector<1x8x1xf32> to vector<8x1xf32>
    %892 = vector.shape_cast %889 : vector<8x1xf32> to vector<1x8x1xf32>
    tpu.vector_store %arg16[%c4_186, %c0_187, %c0_188], %892 {strides = array<i32>} : memref<8x8x1xf32, #tpu.memory_space<vmem>>, vector<1x8x1xf32>,
    %c4_189 = arith.constant 4 : index
    %893 = memref.load %arg3[%c4_189] : memref<8xi32, #tpu.memory_space<smem>>
    %c0_i32_190 = arith.constant 0 : i32
    %894 = arith.cmpi ne, %893, %c0_i32_190 : i32
    %895 = arith.extui %894 : i1 to i32
    %896 = arith.sitofp %895 : i32 to f32
    %cst_191 = arith.constant dense<0.000000e+00> : vector<8x128xf32>
    %897 = tpu.matmul %889, %20, %cst_191 {dimension_numbers = #tpu.dot_dimension_numbers<[1], [0], [0], [1], [0, 0, 1, 1], [], []>} : vector<8x1xf32>, vector<1x128xf32>, vector<8x128xf32> -> vector<8x128xf32>
    %c4_192 = arith.constant 4 : index
    %c0_193 = arith.constant 0 : index
    %c0_194 = arith.constant 0 : index
    %898 = vector.load %arg2[%c4_192, %c0_193, %c0_194] : memref<8x8x128xf32, #tpu.memory_space<vmem>>, vector<1x8x128xf32>
    %899 = vector.shape_cast %898 : vector<1x8x128xf32> to vector<8x128xf32>
    %900 = vector.broadcast %896 : f32 to vector<8x128xf32>
    %901 = arith.mulf %900, %899 : vector<8x128xf32>
    %cst_195 = arith.constant 1.000000e+00 : f32
    %902 = arith.subf %cst_195, %896 : f32
    %903 = vector.broadcast %902 : f32 to vector<8x128xf32>
    %904 = arith.mulf %903, %897 : vector<8x128xf32>
    %905 = arith.addf %901, %904 : vector<8x128xf32>
    %906 = arith.truncf %864 : vector<8x32xf32> to vector<8x32xbf16>
    %cst_196 = arith.constant dense<0.000000e+00> : vector<8x128xf32>
    %907 = tpu.matmul %906, %16, %cst_196 {dimension_numbers = #tpu.dot_dimension_numbers<[1], [0], [0], [1], [0, 0, 1, 1], [], []>} : vector<8x32xbf16>, vector<32x128xbf16>, vector<8x128xf32> -> vector<8x128xf32>
    %908 = arith.truncf %886 : vector<8x32xf32> to vector<8x32xbf16>
    %cst_197 = arith.constant dense<0.000000e+00> : vector<8x128xf32>
    %909 = tpu.matmul %908, %17, %cst_197 {dimension_numbers = #tpu.dot_dimension_numbers<[1], [0], [0], [1], [0, 0, 1, 1], [], []>} : vector<8x32xbf16>, vector<32x128xbf16>, vector<8x128xf32> -> vector<8x128xf32>
    %910 = arith.addf %905, %907 : vector<8x128xf32>
    %911 = vector.broadcast %21 : vector<1x128xf32> to vector<8x128xf32>
    %912 = arith.addf %910, %911 : vector<8x128xf32>
    %913 = arith.mulf %912, %8 : vector<8x128xf32>
    %914 = arith.negf %913 : vector<8x128xf32>
    %915 = math.exp %914 : vector<8x128xf32>
    %cst_198 = arith.constant 1.000000e+00 : f32
    %916 = vector.broadcast %cst_198 : f32 to vector<8x128xf32>
    %917 = arith.addf %916, %915 : vector<8x128xf32>
    %918 = arith.divf %916, %917 : vector<8x128xf32>
    %919 = arith.mulf %918, %8 : vector<8x128xf32>
    %920 = arith.addf %919, %11 : vector<8x128xf32>
    %921 = vector.extract_strided_slice %920 {offsets = [0, 0], sizes = [8, 32], strides = [1, 1]} : vector<8x128xf32> to vector<8x32xf32>
    %922 = vector.extract_strided_slice %920 {offsets = [0, 32], sizes = [8, 32], strides = [1, 1]} : vector<8x128xf32> to vector<8x32xf32>
    %923 = vector.extract_strided_slice %920 {offsets = [0, 64], sizes = [8, 32], strides = [1, 1]} : vector<8x128xf32> to vector<8x32xf32>
    %924 = vector.extract_strided_slice %920 {offsets = [0, 96], sizes = [8, 32], strides = [1, 1]} : vector<8x128xf32> to vector<8x32xf32>
    %925 = arith.mulf %922, %862 : vector<8x32xf32>
    %926 = arith.mulf %921, %923 : vector<8x32xf32>
    %927 = arith.addf %925, %926 : vector<8x32xf32>
    %928 = math.tanh %927 : vector<8x32xf32>
    %929 = arith.mulf %924, %928 : vector<8x32xf32>
    %930 = arith.truncf %929 : vector<8x32xf32> to vector<8x32xbf16>
    %cst_199 = arith.constant dense<0.000000e+00> : vector<8x128xf32>
    %931 = tpu.matmul %930, %18, %cst_199 {dimension_numbers = #tpu.dot_dimension_numbers<[1], [0], [0], [1], [0, 0, 1, 1], [], []>} : vector<8x32xbf16>, vector<32x128xbf16>, vector<8x128xf32> -> vector<8x128xf32>
    %932 = arith.addf %931, %909 : vector<8x128xf32>
    %933 = vector.broadcast %19 : vector<1x128xf32> to vector<8x128xf32>
    %934 = arith.addf %932, %933 : vector<8x128xf32>
    %935 = arith.mulf %934, %8 : vector<8x128xf32>
    %936 = arith.negf %935 : vector<8x128xf32>
    %937 = math.exp %936 : vector<8x128xf32>
    %cst_200 = arith.constant 1.000000e+00 : f32
    %938 = vector.broadcast %cst_200 : f32 to vector<8x128xf32>
    %939 = arith.addf %938, %937 : vector<8x128xf32>
    %940 = arith.divf %938, %939 : vector<8x128xf32>
    %941 = arith.mulf %940, %8 : vector<8x128xf32>
    %942 = arith.addf %941, %11 : vector<8x128xf32>
    %943 = vector.extract_strided_slice %942 {offsets = [0, 0], sizes = [8, 32], strides = [1, 1]} : vector<8x128xf32> to vector<8x32xf32>
    %944 = vector.extract_strided_slice %942 {offsets = [0, 32], sizes = [8, 32], strides = [1, 1]} : vector<8x128xf32> to vector<8x32xf32>
    %945 = vector.extract_strided_slice %942 {offsets = [0, 64], sizes = [8, 32], strides = [1, 1]} : vector<8x128xf32> to vector<8x32xf32>
    %946 = vector.extract_strided_slice %942 {offsets = [0, 96], sizes = [8, 32], strides = [1, 1]} : vector<8x128xf32> to vector<8x32xf32>
    %947 = arith.mulf %944, %884 : vector<8x32xf32>
    %948 = arith.mulf %943, %945 : vector<8x32xf32>
    %949 = arith.addf %947, %948 : vector<8x32xf32>
    %950 = math.tanh %949 : vector<8x32xf32>
    %951 = arith.mulf %946, %950 : vector<8x32xf32>
    %cst_201 = arith.constant dense<0.000000e+00> : vector<8x1xf32>
    %952 = tpu.matmul %951, %22, %cst_201 {dimension_numbers = #tpu.dot_dimension_numbers<[1], [0], [0], [1], [0, 0, 1, 1], [], []>} : vector<8x32xf32>, vector<32x1xf32>, vector<8x1xf32> -> vector<8x1xf32>
    %953 = vector.broadcast %23 : vector<1x1xf32> to vector<8x1xf32>
    %954 = arith.addf %952, %953 : vector<8x1xf32>
    %c5_202 = arith.constant 5 : index
    %c0_203 = arith.constant 0 : index
    %c0_204 = arith.constant 0 : index
    %955 = vector.load %arg16[%c5_202, %c0_203, %c0_204] : memref<8x8x1xf32, #tpu.memory_space<vmem>>, vector<1x8x1xf32>
    %956 = vector.shape_cast %955 : vector<1x8x1xf32> to vector<8x1xf32>
    %957 = vector.shape_cast %954 : vector<8x1xf32> to vector<1x8x1xf32>
    tpu.vector_store %arg16[%c5_202, %c0_203, %c0_204], %957 {strides = array<i32>} : memref<8x8x1xf32, #tpu.memory_space<vmem>>, vector<1x8x1xf32>,
    %c5_205 = arith.constant 5 : index
    %958 = memref.load %arg3[%c5_205] : memref<8xi32, #tpu.memory_space<smem>>
    %c0_i32_206 = arith.constant 0 : i32
    %959 = arith.cmpi ne, %958, %c0_i32_206 : i32
    %960 = arith.extui %959 : i1 to i32
    %961 = arith.sitofp %960 : i32 to f32
    %cst_207 = arith.constant dense<0.000000e+00> : vector<8x128xf32>
    %962 = tpu.matmul %954, %20, %cst_207 {dimension_numbers = #tpu.dot_dimension_numbers<[1], [0], [0], [1], [0, 0, 1, 1], [], []>} : vector<8x1xf32>, vector<1x128xf32>, vector<8x128xf32> -> vector<8x128xf32>
    %c5_208 = arith.constant 5 : index
    %c0_209 = arith.constant 0 : index
    %c0_210 = arith.constant 0 : index
    %963 = vector.load %arg2[%c5_208, %c0_209, %c0_210] : memref<8x8x128xf32, #tpu.memory_space<vmem>>, vector<1x8x128xf32>
    %964 = vector.shape_cast %963 : vector<1x8x128xf32> to vector<8x128xf32>
    %965 = vector.broadcast %961 : f32 to vector<8x128xf32>
    %966 = arith.mulf %965, %964 : vector<8x128xf32>
    %cst_211 = arith.constant 1.000000e+00 : f32
    %967 = arith.subf %cst_211, %961 : f32
    %968 = vector.broadcast %967 : f32 to vector<8x128xf32>
    %969 = arith.mulf %968, %962 : vector<8x128xf32>
    %970 = arith.addf %966, %969 : vector<8x128xf32>
    %971 = arith.truncf %929 : vector<8x32xf32> to vector<8x32xbf16>
    %cst_212 = arith.constant dense<0.000000e+00> : vector<8x128xf32>
    %972 = tpu.matmul %971, %16, %cst_212 {dimension_numbers = #tpu.dot_dimension_numbers<[1], [0], [0], [1], [0, 0, 1, 1], [], []>} : vector<8x32xbf16>, vector<32x128xbf16>, vector<8x128xf32> -> vector<8x128xf32>
    %973 = arith.truncf %951 : vector<8x32xf32> to vector<8x32xbf16>
    %cst_213 = arith.constant dense<0.000000e+00> : vector<8x128xf32>
    %974 = tpu.matmul %973, %17, %cst_213 {dimension_numbers = #tpu.dot_dimension_numbers<[1], [0], [0], [1], [0, 0, 1, 1], [], []>} : vector<8x32xbf16>, vector<32x128xbf16>, vector<8x128xf32> -> vector<8x128xf32>
    %975 = arith.addf %970, %972 : vector<8x128xf32>
    %976 = vector.broadcast %21 : vector<1x128xf32> to vector<8x128xf32>
    %977 = arith.addf %975, %976 : vector<8x128xf32>
    %978 = arith.mulf %977, %8 : vector<8x128xf32>
    %979 = arith.negf %978 : vector<8x128xf32>
    %980 = math.exp %979 : vector<8x128xf32>
    %cst_214 = arith.constant 1.000000e+00 : f32
    %981 = vector.broadcast %cst_214 : f32 to vector<8x128xf32>
    %982 = arith.addf %981, %980 : vector<8x128xf32>
    %983 = arith.divf %981, %982 : vector<8x128xf32>
    %984 = arith.mulf %983, %8 : vector<8x128xf32>
    %985 = arith.addf %984, %11 : vector<8x128xf32>
    %986 = vector.extract_strided_slice %985 {offsets = [0, 0], sizes = [8, 32], strides = [1, 1]} : vector<8x128xf32> to vector<8x32xf32>
    %987 = vector.extract_strided_slice %985 {offsets = [0, 32], sizes = [8, 32], strides = [1, 1]} : vector<8x128xf32> to vector<8x32xf32>
    %988 = vector.extract_strided_slice %985 {offsets = [0, 64], sizes = [8, 32], strides = [1, 1]} : vector<8x128xf32> to vector<8x32xf32>
    %989 = vector.extract_strided_slice %985 {offsets = [0, 96], sizes = [8, 32], strides = [1, 1]} : vector<8x128xf32> to vector<8x32xf32>
    %990 = arith.mulf %987, %927 : vector<8x32xf32>
    %991 = arith.mulf %986, %988 : vector<8x32xf32>
    %992 = arith.addf %990, %991 : vector<8x32xf32>
    %993 = math.tanh %992 : vector<8x32xf32>
    %994 = arith.mulf %989, %993 : vector<8x32xf32>
    %995 = arith.truncf %994 : vector<8x32xf32> to vector<8x32xbf16>
    %cst_215 = arith.constant dense<0.000000e+00> : vector<8x128xf32>
    %996 = tpu.matmul %995, %18, %cst_215 {dimension_numbers = #tpu.dot_dimension_numbers<[1], [0], [0], [1], [0, 0, 1, 1], [], []>} : vector<8x32xbf16>, vector<32x128xbf16>, vector<8x128xf32> -> vector<8x128xf32>
    %997 = arith.addf %996, %974 : vector<8x128xf32>
    %998 = vector.broadcast %19 : vector<1x128xf32> to vector<8x128xf32>
    %999 = arith.addf %997, %998 : vector<8x128xf32>
    %1000 = arith.mulf %999, %8 : vector<8x128xf32>
    %1001 = arith.negf %1000 : vector<8x128xf32>
    %1002 = math.exp %1001 : vector<8x128xf32>
    %cst_216 = arith.constant 1.000000e+00 : f32
    %1003 = vector.broadcast %cst_216 : f32 to vector<8x128xf32>
    %1004 = arith.addf %1003, %1002 : vector<8x128xf32>
    %1005 = arith.divf %1003, %1004 : vector<8x128xf32>
    %1006 = arith.mulf %1005, %8 : vector<8x128xf32>
    %1007 = arith.addf %1006, %11 : vector<8x128xf32>
    %1008 = vector.extract_strided_slice %1007 {offsets = [0, 0], sizes = [8, 32], strides = [1, 1]} : vector<8x128xf32> to vector<8x32xf32>
    %1009 = vector.extract_strided_slice %1007 {offsets = [0, 32], sizes = [8, 32], strides = [1, 1]} : vector<8x128xf32> to vector<8x32xf32>
    %1010 = vector.extract_strided_slice %1007 {offsets = [0, 64], sizes = [8, 32], strides = [1, 1]} : vector<8x128xf32> to vector<8x32xf32>
    %1011 = vector.extract_strided_slice %1007 {offsets = [0, 96], sizes = [8, 32], strides = [1, 1]} : vector<8x128xf32> to vector<8x32xf32>
    %1012 = arith.mulf %1009, %949 : vector<8x32xf32>
    %1013 = arith.mulf %1008, %1010 : vector<8x32xf32>
    %1014 = arith.addf %1012, %1013 : vector<8x32xf32>
    %1015 = math.tanh %1014 : vector<8x32xf32>
    %1016 = arith.mulf %1011, %1015 : vector<8x32xf32>
    %cst_217 = arith.constant dense<0.000000e+00> : vector<8x1xf32>
    %1017 = tpu.matmul %1016, %22, %cst_217 {dimension_numbers = #tpu.dot_dimension_numbers<[1], [0], [0], [1], [0, 0, 1, 1], [], []>} : vector<8x32xf32>, vector<32x1xf32>, vector<8x1xf32> -> vector<8x1xf32>
    %1018 = vector.broadcast %23 : vector<1x1xf32> to vector<8x1xf32>
    %1019 = arith.addf %1017, %1018 : vector<8x1xf32>
    %c6_218 = arith.constant 6 : index
    %c0_219 = arith.constant 0 : index
    %c0_220 = arith.constant 0 : index
    %1020 = vector.load %arg16[%c6_218, %c0_219, %c0_220] : memref<8x8x1xf32, #tpu.memory_space<vmem>>, vector<1x8x1xf32>
    %1021 = vector.shape_cast %1020 : vector<1x8x1xf32> to vector<8x1xf32>
    %1022 = vector.shape_cast %1019 : vector<8x1xf32> to vector<1x8x1xf32>
    tpu.vector_store %arg16[%c6_218, %c0_219, %c0_220], %1022 {strides = array<i32>} : memref<8x8x1xf32, #tpu.memory_space<vmem>>, vector<1x8x1xf32>,
    %c6_221 = arith.constant 6 : index
    %1023 = memref.load %arg3[%c6_221] : memref<8xi32, #tpu.memory_space<smem>>
    %c0_i32_222 = arith.constant 0 : i32
    %1024 = arith.cmpi ne, %1023, %c0_i32_222 : i32
    %1025 = arith.extui %1024 : i1 to i32
    %1026 = arith.sitofp %1025 : i32 to f32
    %cst_223 = arith.constant dense<0.000000e+00> : vector<8x128xf32>
    %1027 = tpu.matmul %1019, %20, %cst_223 {dimension_numbers = #tpu.dot_dimension_numbers<[1], [0], [0], [1], [0, 0, 1, 1], [], []>} : vector<8x1xf32>, vector<1x128xf32>, vector<8x128xf32> -> vector<8x128xf32>
    %c6_224 = arith.constant 6 : index
    %c0_225 = arith.constant 0 : index
    %c0_226 = arith.constant 0 : index
    %1028 = vector.load %arg2[%c6_224, %c0_225, %c0_226] : memref<8x8x128xf32, #tpu.memory_space<vmem>>, vector<1x8x128xf32>
    %1029 = vector.shape_cast %1028 : vector<1x8x128xf32> to vector<8x128xf32>
    %1030 = vector.broadcast %1026 : f32 to vector<8x128xf32>
    %1031 = arith.mulf %1030, %1029 : vector<8x128xf32>
    %cst_227 = arith.constant 1.000000e+00 : f32
    %1032 = arith.subf %cst_227, %1026 : f32
    %1033 = vector.broadcast %1032 : f32 to vector<8x128xf32>
    %1034 = arith.mulf %1033, %1027 : vector<8x128xf32>
    %1035 = arith.addf %1031, %1034 : vector<8x128xf32>
    %1036 = arith.truncf %994 : vector<8x32xf32> to vector<8x32xbf16>
    %cst_228 = arith.constant dense<0.000000e+00> : vector<8x128xf32>
    %1037 = tpu.matmul %1036, %16, %cst_228 {dimension_numbers = #tpu.dot_dimension_numbers<[1], [0], [0], [1], [0, 0, 1, 1], [], []>} : vector<8x32xbf16>, vector<32x128xbf16>, vector<8x128xf32> -> vector<8x128xf32>
    %1038 = arith.truncf %1016 : vector<8x32xf32> to vector<8x32xbf16>
    %cst_229 = arith.constant dense<0.000000e+00> : vector<8x128xf32>
    %1039 = tpu.matmul %1038, %17, %cst_229 {dimension_numbers = #tpu.dot_dimension_numbers<[1], [0], [0], [1], [0, 0, 1, 1], [], []>} : vector<8x32xbf16>, vector<32x128xbf16>, vector<8x128xf32> -> vector<8x128xf32>
    %1040 = arith.addf %1035, %1037 : vector<8x128xf32>
    %1041 = vector.broadcast %21 : vector<1x128xf32> to vector<8x128xf32>
    %1042 = arith.addf %1040, %1041 : vector<8x128xf32>
    %1043 = arith.mulf %1042, %8 : vector<8x128xf32>
    %1044 = arith.negf %1043 : vector<8x128xf32>
    %1045 = math.exp %1044 : vector<8x128xf32>
    %cst_230 = arith.constant 1.000000e+00 : f32
    %1046 = vector.broadcast %cst_230 : f32 to vector<8x128xf32>
    %1047 = arith.addf %1046, %1045 : vector<8x128xf32>
    %1048 = arith.divf %1046, %1047 : vector<8x128xf32>
    %1049 = arith.mulf %1048, %8 : vector<8x128xf32>
    %1050 = arith.addf %1049, %11 : vector<8x128xf32>
    %1051 = vector.extract_strided_slice %1050 {offsets = [0, 0], sizes = [8, 32], strides = [1, 1]} : vector<8x128xf32> to vector<8x32xf32>
    %1052 = vector.extract_strided_slice %1050 {offsets = [0, 32], sizes = [8, 32], strides = [1, 1]} : vector<8x128xf32> to vector<8x32xf32>
    %1053 = vector.extract_strided_slice %1050 {offsets = [0, 64], sizes = [8, 32], strides = [1, 1]} : vector<8x128xf32> to vector<8x32xf32>
    %1054 = vector.extract_strided_slice %1050 {offsets = [0, 96], sizes = [8, 32], strides = [1, 1]} : vector<8x128xf32> to vector<8x32xf32>
    %1055 = arith.mulf %1052, %992 : vector<8x32xf32>
    %1056 = arith.mulf %1051, %1053 : vector<8x32xf32>
    %1057 = arith.addf %1055, %1056 : vector<8x32xf32>
    %1058 = math.tanh %1057 : vector<8x32xf32>
    %1059 = arith.mulf %1054, %1058 : vector<8x32xf32>
    %1060 = arith.truncf %1059 : vector<8x32xf32> to vector<8x32xbf16>
    %cst_231 = arith.constant dense<0.000000e+00> : vector<8x128xf32>
    %1061 = tpu.matmul %1060, %18, %cst_231 {dimension_numbers = #tpu.dot_dimension_numbers<[1], [0], [0], [1], [0, 0, 1, 1], [], []>} : vector<8x32xbf16>, vector<32x128xbf16>, vector<8x128xf32> -> vector<8x128xf32>
    %1062 = arith.addf %1061, %1039 : vector<8x128xf32>
    %1063 = vector.broadcast %19 : vector<1x128xf32> to vector<8x128xf32>
    %1064 = arith.addf %1062, %1063 : vector<8x128xf32>
    %1065 = arith.mulf %1064, %8 : vector<8x128xf32>
    %1066 = arith.negf %1065 : vector<8x128xf32>
    %1067 = math.exp %1066 : vector<8x128xf32>
    %cst_232 = arith.constant 1.000000e+00 : f32
    %1068 = vector.broadcast %cst_232 : f32 to vector<8x128xf32>
    %1069 = arith.addf %1068, %1067 : vector<8x128xf32>
    %1070 = arith.divf %1068, %1069 : vector<8x128xf32>
    %1071 = arith.mulf %1070, %8 : vector<8x128xf32>
    %1072 = arith.addf %1071, %11 : vector<8x128xf32>
    %1073 = vector.extract_strided_slice %1072 {offsets = [0, 0], sizes = [8, 32], strides = [1, 1]} : vector<8x128xf32> to vector<8x32xf32>
    %1074 = vector.extract_strided_slice %1072 {offsets = [0, 32], sizes = [8, 32], strides = [1, 1]} : vector<8x128xf32> to vector<8x32xf32>
    %1075 = vector.extract_strided_slice %1072 {offsets = [0, 64], sizes = [8, 32], strides = [1, 1]} : vector<8x128xf32> to vector<8x32xf32>
    %1076 = vector.extract_strided_slice %1072 {offsets = [0, 96], sizes = [8, 32], strides = [1, 1]} : vector<8x128xf32> to vector<8x32xf32>
    %1077 = arith.mulf %1074, %1014 : vector<8x32xf32>
    %1078 = arith.mulf %1073, %1075 : vector<8x32xf32>
    %1079 = arith.addf %1077, %1078 : vector<8x32xf32>
    %1080 = math.tanh %1079 : vector<8x32xf32>
    %1081 = arith.mulf %1076, %1080 : vector<8x32xf32>
    %cst_233 = arith.constant dense<0.000000e+00> : vector<8x1xf32>
    %1082 = tpu.matmul %1081, %22, %cst_233 {dimension_numbers = #tpu.dot_dimension_numbers<[1], [0], [0], [1], [0, 0, 1, 1], [], []>} : vector<8x32xf32>, vector<32x1xf32>, vector<8x1xf32> -> vector<8x1xf32>
    %1083 = vector.broadcast %23 : vector<1x1xf32> to vector<8x1xf32>
    %1084 = arith.addf %1082, %1083 : vector<8x1xf32>
    %c7_234 = arith.constant 7 : index
    %c0_235 = arith.constant 0 : index
    %c0_236 = arith.constant 0 : index
    %1085 = vector.load %arg16[%c7_234, %c0_235, %c0_236] : memref<8x8x1xf32, #tpu.memory_space<vmem>>, vector<1x8x1xf32>
    %1086 = vector.shape_cast %1085 : vector<1x8x1xf32> to vector<8x1xf32>
    %1087 = vector.shape_cast %1084 : vector<8x1xf32> to vector<1x8x1xf32>
    tpu.vector_store %arg16[%c7_234, %c0_235, %c0_236], %1087 {strides = array<i32>} : memref<8x8x1xf32, #tpu.memory_space<vmem>>, vector<1x8x1xf32>,
    return
  }
}

</mosaic_0001>

<bundles_post_ra>
// kernel: seq2seq_forward.1
= control target key start
LH: loop header
LB: loop body
LE: loop exit
PB: predicated region body
PF: predicated region fallthrough
CT: control target
= control target key end

     0   :  { %s7933_s0 = inlined_call_operand.vmem [shape: f32[12,8,128], index: 0, kind: input, shape index: {}]   ;;  %s7934_s1 = inlined_call_operand.vmem [shape: f32[8,128], index: 1, kind: input, shape index: {}]   ;;  %s7935_s2 = inlined_call_operand.vmem [shape: f32[8,8,128], index: 2, kind: input, shape index: {}]   ;;  %s7936_s3 = inlined_call_operand.vmem [shape: s32[8], index: 3, kind: input, shape index: {}]   ;;  %s7937_s4 = inlined_call_operand.vmem [shape: bf16[32,128], index: 4, kind: input, shape index: {}]   ;;  %s7938_s5 = inlined_call_operand.vmem [shape: bf16[32,128], index: 5, kind: input, shape index: {}]   ;;  %s7939_s6 = inlined_call_operand.vmem [shape: bf16[32,128], index: 6, kind: input, shape index: {}]   ;;  %s7940_s7 = inlined_call_operand.vmem [shape: f32[1,128], index: 7, kind: input, shape index: {}]   ;;  %s7941_s8 = inlined_call_operand.vmem [shape: f32[1,128], index: 8, kind: input, shape index: {}]   ;;  %s7942_s9 = inlined_call_operand.vmem [shape: bf16[32,128], index: 9, kind: input, shape index: {}]   ;;  %s7943_s10 = inlined_call_operand.vmem [shape: f32[1,128], index: 10, kind: input, shape index: {}]   ;;  %s7944_s11 = inlined_call_operand.vmem [shape: bf16[32,128], index: 11, kind: input, shape index: {}]   ;;  %s7945_s12 = inlined_call_operand.vmem [shape: bf16[32,128], index: 12, kind: input, shape index: {}]   ;;  %s7946_s13 = inlined_call_operand.vmem [shape: f32[1,128], index: 13, kind: input, shape index: {}]   ;;  %s7947_s14 = inlined_call_operand.vmem [shape: f32[32,1], index: 14, kind: input, shape index: {}]   ;;  %s7948_s15 = inlined_call_operand.<no memory space> [shape: f32[1,1], index: 15, kind: input, shape index: {}]   ;;  %s7949_s16 = inlined_call_operand.vmem [shape: f32[8,8,1], index: 16, kind: output, shape index: {}]  }
   0x1   :  { %7951 = sst [smem:[#allocation6_spill]] %s7933_s0  ;;  %v21_v0 = vstv %s7948_s15 }
   0x2   :  { %22 = vst [vmem:[#allocation2] sm:$0x1] %v21_v0 }
   0x3   :  { %23 = vsyncpa [#allocation4], 0  ;;  %s36_s25 = sshll.u32 %s7936_s3, 4  ;;  %s37_s25 = int_to_ptr.vmem [resolvable:$true] %s36_s25 }
   0x4   :  { %s6541_s26 = scalar_lea.vmem %s37_s25, 16  ;;  %p6546_p1 = scmp.lt.s32.totalorder %s37_s25, %s37_s25 }
   0x5   :  { %p6542_p0 = scmp.ne.s32.totalorder %s37_s25, %s6541_s26  ;;  %p6547_p2 = scmp.lt.s32.totalorder %s6541_s26, %s6541_s26 }
   0x7   :  { %p6548_p3 = por %p6547_p2, %p6546_p1 }
   0x9   :  { %p6549_p4 = pnand %p6548_p3, %p6542_p0 }
   0xb   :  { %6552 = shalt.err (!%p6549_p4)
}
   0xc   :  { %s6555_s27 = smov [#allocation3]  }
   0xd   :  { %39 = dma.vmem_to_smem %s37_s25, 16, %s6555_s27, [#allocation4]  }
   0xe   :  { %6553 = dma.done.wait [#allocation4], 16  }
   0xf   :  { %6554 = vsyncadd [#allocation4], 4294967280 }
  0x10   :  { %67 = sfence }
  0x11   :  { %v6657_v1 = vld [vmem:[%s7937_s4] sm:$0xff]   ;;  %v6556_v2 = vmov 0.0   ;;  %v6665_v3 = vld [vmem:[%s7937_s4 + $0x8] sm:$0xff]   ;;  %vm6557_vm0 = vmmov 0   ;;  %v6558_v4 = vmov 0   ;;  %v69_v5 = vlaneseq  ;;  %s7954_s17 = sld [smem:[#allocation6_spill]] }
  0x12   :  { %5613 = vmatprep.subr.bf16.mxu0 %v6556_v2  ;;  %5621 = vmatprep.subr.bf16.mxu1 %v6556_v2  ;;  %v6559_v9 = vmov 1.0   ;;  %s6560_s18 = smov 64   ;;  %s6561_s19 = smov 32   ;;  %v6703_v29 = vld [vmem:[%s7939_s6] sm:$0xff]   ;;  %v6714_v31 = vld [vmem:[%s7939_s6 + $0x8] sm:$0xff]   ;;  %vm121_vm4 = vcmask 261120  }
  0x13   :  { %5614 = vmatpush3.bf16.msra.mxu0 %v6657_v1  ;;  %5617 = vmatprep.mubr.msk.bf16.mxu0 %vm6557_vm0, %v6556_v2  ;;  %v70_v6 = vand.u32 127, %v69_v5  ;;  %v6708_v30 = vld [vmem:[%s7938_s5] sm:$0xff]   ;;  %v6720_v32 = vld [vmem:[%s7938_s5 + $0x8] sm:$0xff]   ;;  %vm2755_vm5 = vcmask 1040384   ;;  %vm2746_vm6 = vcmask 7168   ;;  %s2748_s25 = sld [smem:[#allocation3]] }
  0x14   :  { %5615 = vmatprep.subr.bf16.mxu0 %v6556_v2  ;;  %5625 = vmatprep.mubr.msk.bf16.mxu1 %vm6557_vm0, %v6556_v2  ;;  %v6756_v43 = vld [vmem:[%s7940_s7] ss:$0 sm:$0xff]  ;;  %s5313_s29 = sld [smem:[#allocation3 + $0x1]]  ;;  %s5324_s23 = sld [smem:[#allocation3 + $0x2]] }
  0x15   :  { %vm71_vm1 = vcmp.ge.s32.totalorder %v70_v6, 64  ;;  %vm72_vm2 = vcmp.lt.s32.totalorder %v70_v6, 96  ;;  %5622 = vmatpush3.bf16.msra.mxu1 %v6703_v29 }
  0x16   :  { %vm6676_vm3 = vmand %vm71_vm1, %vm72_vm2  ;;  %5623 = vmatprep.subr.bf16.mxu1 %v6556_v2 }
  0x17   :  { %5616 = vmatpush3.bf16.msra.mxu0 %v6665_v3  ;;  %v217_v8 = vld [vmem:[%s7954_s17] sm:$0xff]  ;;  %v6685_v10 = vsel %vm6676_vm3, 2.0, %v6559_v9  ;;  %v6691_v21 = vsel %vm6676_vm3, -1.0, %v6556_v2  ;;  %v5225_v42 = vld [vmem:[%s7954_s17 + $0x8] sm:$0xff] }
  0x18   :  { %5629 = vmatprep.subr.bf16.mxu0 %v6556_v2 }
  0x19   :  { %5624 = vmatpush3.bf16.msra.mxu1 %v6714_v31  ;;  %p2749_p5 = scmp.ne.s32.totalorder %s2748_s25, 0 }
  0x1a   :  { %5618 = vmatmul.mubr.bf16.vlgmr.msra.gmra.mrb[0].mxu0 %v6558_v4  ;;  %5637 = vmatprep.subr.bf16.mxu1 %v6556_v2  ;;  %p3103_p6 = scmp.ne.s32.totalorder %s5313_s29, 0  ;;  %p3454_p7 = scmp.ne.s32.totalorder %s5324_s23, 0 }
  0x1b   :  { %5633 = vmatprep.mubr.msk.bf16.mxu0 %vm6557_vm0, %v6556_v2  ;;  %5630 = vmatpush3.bf16.msra.mxu0 %v6708_v30 }
  0x1c   :  { %5631 = vmatprep.subr.bf16.mxu0 %v6556_v2  ;;  %5626 = vmatmul.mubr.bf16.vlgmr.msra.gmra.mrb[0].mxu1 %v6558_v4  ;;  %s3104_s30 = scalar_select %p3103_p6, 1, 0 }
  0x1d   :  { %5638 = vmatpush3.bf16.msra.mxu1 %v6657_v1  ;;  %5641 = vmatprep.mubr.msk.bf16.mxu1 %vm6557_vm0, %v6556_v2  ;;  %s3455_s24 = scalar_select %p3454_p7, 1, 0 }
  0x1e   :  { %5639 = vmatprep.subr.bf16.mxu1 %v6556_v2  ;;  %s3105_s0 = scvt.s32.f32 %s3104_s30 }
  0x1f   :  { %5632 = vmatpush3.bf16.msra.mxu0 %v6720_v32 }
  0x20   :  { %5645 = vmatprep.subr.bf16.mxu0 %v6556_v2 }
  0x21   :  { %5640 = vmatpush3.bf16.msra.mxu1 %v6665_v3 }
  0x22   :  { %5653 = vmatprep.subr.bf16.mxu1 %v6556_v2 }
  0xed   :  { %v159_v11 = vpop.f32.mrb[0].mxu0 }
  0xee   :  { %v218_v12 = vadd.f32 %v217_v8, %v159_v11  ;;  %v5619_v13 = vpop.f32.mrb[1].mxu0 }
  0xef   :  { %v162_v14 = vpop.f32.mrb[2].mxu0  ;;  %v211_v37 = vpop.f32.mrb[0].mxu1 }
  0xf0   :  { %v219_v15 = vmul.f32 %v218_v12, %v6685_v10  ;;  %v5620_v16 = vpop.f32.mrb[3].mxu0  ;;  %v5627_v38 = vpop.f32.mrb[1].mxu1 }
  0xf1   :  { %v214_v39 = vpop.f32.mrb[2].mxu1 }
  0xf2   :  { %v5217_v17 = vmul.f32 -1.442695, %v219_v15  ;;  %v5628_v40 = vpop.f32.mrb[3].mxu1 }
  0xf4   :  { %6284 = vpow2.f32 %v5217_v17 }
  0xfe   :  { %v6285_v18 = vpop.eup %6284 }
  0xff   :  { %v223_v19 = vadd.f32 1.0, %v6285_v18 }
 0x101   :  { %6286 = vrcp.f32 %v223_v19 }
 0x10b   :  { %v6287_v20 = vpop.eup %6286 }
 0x10c   :  { %v226_v22 = vmul.f32 %v6287_v20, %v6685_v10 }
 0x10e   :  { %v227_v23 = vadd.f32 %v226_v22, %v6691_v21 }
 0x110   :  { %230 = vrot.lane.b32.xlu0 %v227_v23, %s6560_s18  ;;  %v228_v26 = vmul.f32 0.0, %v227_v23 }
 0x182   :  { %v231_v24 = vpop.permute.xlu0 %230 }
 0x183   :  { %v233_v25 = vmul.f32 %v231_v24, %v227_v23 }
 0x185   :  { %235 = vrot.lane.b32.xlu0 %v233_v25, %s6561_s19 }
 0x1f7   :  { %v236_v27 = vpop.permute.xlu0 %235 }
 0x1f8   :  { %v6697_v28 = vadd.f32 %v236_v27, %v228_v26 }
 0x1fa   :  { %6288 = vtanh.f32 %v6697_v28 }
 0x204   :  { %v6289_v33 = vpop.eup %6288 }
 0x205   :  { %241 = vrot.lane.b32.xlu1 %v6289_v33, %s6560_s18 }
 0x277   :  { %v242_v34 = vpop.permute.xlu1 %241 }
 0x278   :  { %v244_v35 = vmul.f32 %v242_v34, %v227_v23 }
 0x27a   :  { %v245_v36 = vpack.c.bf16 %v244_v35, %v244_v35 }
 0x27c   :  { %247 = vrot.lane.b32.xlu1 %v245_v36, %s6561_s19 }
 0x2ee   :  { %v248_v41 = vpop.permute.xlu1 %247 }
 0x2ef   :  { %5634 = vmatmul.mubr.msk.bf16.vlgmr.msra.gmra.mrb[4].mxu0 %vm121_vm4, %v248_v41  ;;  %5642 = vmatmul.mubr.msk.bf16.vlgmr.msra.gmra.mrb[4].mxu1 %vm121_vm4, %v248_v41 }
 0x2f0   :  { %5654 = vmatpush3.bf16.msra.mxu1 %v6708_v30  ;;  %5646 = vmatpush3.bf16.msra.mxu0 %v6703_v29 }
 0x2f1   :  { %5655 = vmatprep.subr.bf16.mxu1 %v6556_v2  ;;  %5647 = vmatprep.subr.bf16.mxu0 %v6556_v2 }
 0x2f2   :  { %5657 = vmatprep.mubr.msk.bf16.mxu1 %vm6557_vm0, %v6556_v2  ;;  %5649 = vmatprep.mubr.msk.bf16.mxu0 %vm6557_vm0, %v6556_v2 }
 0x2f4   :  { %5656 = vmatpush3.bf16.msra.mxu1 %v6720_v32  ;;  %5648 = vmatpush3.bf16.msra.mxu0 %v6714_v31 }
 0x2f5   :  { %5661 = vmatprep.subr.bf16.mxu0 %v6556_v2  ;;  %5669 = vmatprep.subr.bf16.mxu1 %v6556_v2 }
 0x3c2   :  { %v298_v44 = vpop.f32.mrb[4].mxu0  ;;  %v371_v45 = vpop.f32.mrb[4].mxu1 }
 0x3c3   :  { %v299_v46 = vadd.f32 %v298_v44, %v211_v37  ;;  %v426_v47 = vadd.f32 %v5225_v42, %v371_v45  ;;  %v5635_v48 = vpop.f32.mrb[5].mxu0  ;;  %v5643_v49 = vpop.f32.mrb[5].mxu1 }
 0x3c4   :  { %v301_v50 = vpop.f32.mrb[6].mxu0  ;;  %v374_v51 = vpop.f32.mrb[6].mxu1 }
 0x3c5   :  { %v310_v52 = vadd.f32 %v6756_v43, %v299_v46  ;;  %v427_v53 = vmul.f32 %v426_v47, %v6685_v10  ;;  %v5636_v54 = vpop.f32.mrb[7].mxu0  ;;  %v5644_v55 = vpop.f32.mrb[7].mxu1  ;;  %v5231_v46 = vld [vmem:[%s7954_s17 + $0x10] sm:$0xff] }
 0x3c7   :  { %v311_v56 = vmul.f32 %v310_v52, %v6685_v10  ;;  %v5226_v57 = vmul.f32 -1.442695, %v427_v53 }
 0x3c9   :  { %v5222_v58 = vmul.f32 -1.442695, %v311_v56  ;;  %6290 = vpow2.f32 %v5226_v57 }
 0x3cb   :  { %6292 = vpow2.f32 %v5222_v58 }
 0x3d3   :  { %v6291_v59 = vpop.eup %6290 }
 0x3d4   :  { %v431_v60 = vadd.f32 1.0, %v6291_v59 }
 0x3d5   :  { %v6293_v61 = vpop.eup %6292 }
 0x3d6   :  { %v315_v62 = vadd.f32 1.0, %v6293_v61  ;;  %6294 = vrcp.f32 %v431_v60 }
 0x3d8   :  { %6296 = vrcp.f32 %v315_v62 }
 0x3e0   :  { %v6295_v63 = vpop.eup %6294 }
 0x3e1   :  { %v434_v0 = vmul.f32 %v6295_v63, %v6685_v10 }
 0x3e2   :  { %v6297_v4 = vpop.eup %6296 }
 0x3e3   :  { %v435_v5 = vadd.f32 %v434_v0, %v6691_v21  ;;  %v318_v6 = vmul.f32 %v6297_v4, %v6685_v10 }
 0x3e5   :  { %438 = vrot.lane.b32.xlu1 %v435_v5, %s6560_s18  ;;  %v319_v7 = vadd.f32 %v318_v6, %v6691_v21  ;;  %v436_v13 = vmul.f32 %v435_v5, %v6697_v28 }
 0x3e7   :  { %322 = vrot.lane.b32.xlu0 %v319_v7, %s6560_s18  ;;  %v320_v16 = vmul.f32 0.0, %v319_v7 }
 0x457   :  { %v439_v8 = vpop.permute.xlu1 %438 }
 0x458   :  { %v441_v9 = vmul.f32 %v439_v8, %v435_v5 }
 0x459   :  { %v323_v11 = vpop.permute.xlu0 %322 }
 0x45a   :  { %v325_v12 = vmul.f32 %v323_v11, %v319_v7  ;;  %443 = vrot.lane.b32.xlu1 %v441_v9, %s6561_s19 }
 0x45c   :  { %327 = vrot.lane.b32.xlu0 %v325_v12, %s6561_s19 }
 0x4cc   :  { %v444_v14 = vpop.permute.xlu1 %443 }
 0x4cd   :  { %v6770_v15 = vadd.f32 %v444_v14, %v436_v13 }
 0x4ce   :  { %v328_v17 = vpop.permute.xlu0 %327 }
 0x4cf   :  { %6298 = vtanh.f32 %v6770_v15  ;;  %v6773_v18 = vadd.f32 %v328_v17, %v320_v16 }
 0x4d1   :  { %6300 = vtanh.f32 %v6773_v18 }
 0x4d9   :  { %v6299_v19 = vpop.eup %6298 }
 0x4da   :  { %449 = vrot.lane.b32.xlu1 %v6299_v19, %s6560_s18 }
 0x4db   :  { %v6301_v20 = vpop.eup %6300 }
 0x4dc   :  { %333 = vrot.lane.b32.xlu0 %v6301_v20, %s6560_s18 }
 0x54c   :  { %v450_v22 = vpop.permute.xlu1 %449 }
 0x54d   :  { %v452_v23 = vmul.f32 %v450_v22, %v435_v5 }
 0x54e   :  { %v334_v24 = vpop.permute.xlu0 %333 }
 0x54f   :  { %v453_v25 = vpack.c.bf16 %v452_v23, %v452_v23  ;;  %v336_v26 = vmul.f32 %v334_v24, %v319_v7 }
 0x551   :  { %v377_v27 = vpack.c.bf16 %v336_v26, %v336_v26  ;;  %455 = vrot.lane.b32.xlu1 %v453_v25, %s6561_s19 }
 0x553   :  { %379 = vrot.lane.b32.xlu0 %v377_v27, %s6561_s19 }
 0x5c3   :  { %v456_v28 = vpop.permute.xlu1 %455 }
 0x5c4   :  { %5658 = vmatmul.mubr.msk.bf16.vlgmr.msra.gmra.mrb[8].mxu1 %vm121_vm4, %v456_v28 }
 0x5c5   :  { %v380_v33 = vpop.permute.xlu0 %379  ;;  %5670 = vmatpush3.bf16.msra.mxu1 %v6703_v29  ;;  %5673 = vmatprep.mubr.msk.bf16.mxu1 %vm6557_vm0, %v6556_v2 }
 0x5c6   :  { %5650 = vmatmul.mubr.msk.bf16.vlgmr.msra.gmra.mrb[8].mxu0 %vm121_vm4, %v380_v33  ;;  %5671 = vmatprep.subr.bf16.mxu1 %v6556_v2 }
 0x5c7   :  { %5662 = vmatpush3.bf16.msra.mxu0 %v6657_v1  ;;  %5665 = vmatprep.mubr.msk.bf16.mxu0 %vm6557_vm0, %v6556_v2 }
 0x5c8   :  { %5663 = vmatprep.subr.bf16.mxu0 %v6556_v2 }
 0x5c9   :  { %5672 = vmatpush3.bf16.msra.mxu1 %v6714_v31 }
 0x5ca   :  { %5685 = vmatprep.subr.bf16.mxu1 %v6556_v2 }
 0x5cb   :  { %5664 = vmatpush3.bf16.msra.mxu0 %v6665_v3 }
 0x5cc   :  { %5677 = vmatprep.subr.bf16.mxu0 %v6556_v2 }
 0x5ce   :  { %5666 = vmatmul.mubr.msk.bf16.vlgmr.msra.gmra.mrb[12].mxu0 %vm121_vm4, %v456_v28 }
 0x5cf   :  { %5678 = vmatpush3.bf16.msra.mxu0 %v6708_v30  ;;  %5681 = vmatprep.mubr.msk.bf16.mxu0 %vm6557_vm0, %v6556_v2 }
 0x5d0   :  { %5679 = vmatprep.subr.bf16.mxu0 %v6556_v2 }
 0x5d3   :  { %5680 = vmatpush3.bf16.msra.mxu0 %v6720_v32 }
 0x5d4   :  { %5693 = vmatprep.subr.bf16.mxu0 %v6556_v2 }
 0x697   :  { %v494_v34 = vpop.f32.mrb[8].mxu1 }
 0x698   :  { %v5659_v35 = vpop.f32.mrb[9].mxu1 }
 0x699   :  { %v418_v36 = vpop.f32.mrb[8].mxu0  ;;  %v497_v37 = vpop.f32.mrb[10].mxu1  ;;  %v5237_v35 = vld [vmem:[%s7954_s17 + $0x18] sm:$0xff] }
 0x69a   :  { %v495_v38 = vadd.f32 %v494_v34, %v418_v36  ;;  %v5651_v39 = vpop.f32.mrb[9].mxu0  ;;  %v5660_v40 = vpop.f32.mrb[11].mxu1 }
 0x69b   :  { %v421_v41 = vpop.f32.mrb[10].mxu0 }
 0x69c   :  { %v500_v42 = vadd.f32 %v6756_v43, %v495_v38  ;;  %v5652_v44 = vpop.f32.mrb[11].mxu0 }
 0x69e   :  { %v501_v45 = vmul.f32 %v500_v42, %v6685_v10 }
 0x6a0   :  { %v5228_v47 = vmul.f32 -1.442695, %v501_v45 }
 0x6a1   :  { %v561_v48 = vpop.f32.mrb[12].mxu0 }
 0x6a2   :  { %6302 = vpow2.f32 %v5228_v47  ;;  %v616_v49 = vadd.f32 %v5231_v46, %v561_v48  ;;  %v5667_v50 = vpop.f32.mrb[13].mxu0 }
 0x6a3   :  { %v564_v51 = vpop.f32.mrb[14].mxu0 }
 0x6a4   :  { %v617_v52 = vmul.f32 %v616_v49, %v6685_v10  ;;  %v5668_v53 = vpop.f32.mrb[15].mxu0 }
 0x6a6   :  { %v5232_v54 = vmul.f32 -1.442695, %v617_v52 }
 0x6a8   :  { %6304 = vpow2.f32 %v5232_v54 }
 0x6ac   :  { %v6303_v55 = vpop.eup %6302 }
 0x6ad   :  { %v505_v56 = vadd.f32 1.0, %v6303_v55 }
 0x6af   :  { %6306 = vrcp.f32 %v505_v56 }
 0x6b2   :  { %v6305_v57 = vpop.eup %6304 }
 0x6b3   :  { %v621_v58 = vadd.f32 1.0, %v6305_v57 }
 0x6b5   :  { %6308 = vrcp.f32 %v621_v58 }
 0x6b9   :  { %v6307_v59 = vpop.eup %6306 }
 0x6ba   :  { %v508_v60 = vmul.f32 %v6307_v59, %v6685_v10 }
 0x6bc   :  { %v509_v61 = vadd.f32 %v508_v60, %v6691_v21 }
 0x6be   :  { %512 = vrot.lane.b32.xlu0 %v509_v61, %s6560_s18  ;;  %v510_v8 = vmul.f32 %v509_v61, %v6773_v18 }
 0x6bf   :  { %v6309_v62 = vpop.eup %6308 }
 0x6c0   :  { %v624_v63 = vmul.f32 %v6309_v62, %v6685_v10 }
 0x6c2   :  { %v625_v0 = vadd.f32 %v624_v63, %v6691_v21 }
 0x6c4   :  { %628 = vrot.lane.b32.xlu1 %v625_v0, %s6560_s18  ;;  %v626_v12 = vmul.f32 %v625_v0, %v6770_v15 }
 0x730   :  { %v513_v4 = vpop.permute.xlu0 %512 }
 0x731   :  { %v515_v5 = vmul.f32 %v513_v4, %v509_v61 }
 0x733   :  { %517 = vrot.lane.b32.xlu0 %v515_v5, %s6561_s19 }
 0x736   :  { %v629_v6 = vpop.permute.xlu1 %628 }
 0x737   :  { %v631_v7 = vmul.f32 %v629_v6, %v625_v0 }
 0x739   :  { %633 = vrot.lane.b32.xlu1 %v631_v7, %s6561_s19 }
 0x7a5   :  { %v518_v9 = vpop.permute.xlu0 %517 }
 0x7a6   :  { %v6816_v11 = vadd.f32 %v518_v9, %v510_v8 }
 0x7a8   :  { %6310 = vtanh.f32 %v6816_v11 }
 0x7ab   :  { %v634_v13 = vpop.permute.xlu1 %633 }
 0x7ac   :  { %v6820_v14 = vadd.f32 %v634_v13, %v626_v12 }
 0x7ae   :  { %6312 = vtanh.f32 %v6820_v14 }
 0x7b2   :  { %v6311_v16 = vpop.eup %6310 }
 0x7b3   :  { %523 = vrot.lane.b32.xlu0 %v6311_v16, %s6560_s18 }
 0x7b8   :  { %v6313_v17 = vpop.eup %6312 }
 0x7b9   :  { %639 = vrot.lane.b32.xlu1 %v6313_v17, %s6560_s18 }
 0x825   :  { %v524_v19 = vpop.permute.xlu0 %523 }
 0x826   :  { %v526_v18 = vmul.f32 %v524_v19, %v509_v61 }
 0x828   :  { %v567_v20 = vpack.c.bf16 %v526_v18, %v526_v18 }
 0x82a   :  { %569 = vrot.lane.b32.xlu0 %v567_v20, %s6561_s19 }
 0x82b   :  { %v640_v22 = vpop.permute.xlu1 %639 }
 0x82c   :  { %v642_v23 = vmul.f32 %v640_v22, %v625_v0 }
 0x82e   :  { %v643_v24 = vpack.c.bf16 %v642_v23, %v642_v23 }
 0x830   :  { %645 = vrot.lane.b32.xlu1 %v643_v24, %s6561_s19 }
 0x89c   :  { %v570_v15 = vpop.permute.xlu0 %569 }
 0x89d   :  { %5674 = vmatmul.mubr.msk.bf16.vlgmr.msra.gmra.mrb[12].mxu1 %vm121_vm4, %v570_v15 }
 0x89e   :  { %5686 = vmatpush3.bf16.msra.mxu1 %v6657_v1  ;;  %5689 = vmatprep.mubr.msk.bf16.mxu1 %vm6557_vm0, %v6556_v2 }
 0x89f   :  { %5687 = vmatprep.subr.bf16.mxu1 %v6556_v2 }
 0x8a2   :  { %5688 = vmatpush3.bf16.msra.mxu1 %v6665_v3  ;;  %v646_v25 = vpop.permute.xlu1 %645 }
 0x8a3   :  { %5682 = vmatmul.mubr.msk.bf16.vlgmr.msra.gmra.mrb[16].mxu0 %vm121_vm4, %v646_v25  ;;  %5701 = vmatprep.subr.bf16.mxu1 %v6556_v2 }
 0x8a4   :  { %5694 = vmatpush3.bf16.msra.mxu0 %v6703_v29  ;;  %5697 = vmatprep.mubr.msk.bf16.mxu0 %vm6557_vm0, %v6556_v2 }
 0x8a5   :  { %5690 = vmatmul.mubr.msk.bf16.vlgmr.msra.gmra.mrb[16].mxu1 %vm121_vm4, %v646_v25  ;;  %5695 = vmatprep.subr.bf16.mxu0 %v6556_v2 }
 0x8a6   :  { %5702 = vmatpush3.bf16.msra.mxu1 %v6708_v30  ;;  %5705 = vmatprep.mubr.msk.bf16.mxu1 %vm6557_vm0, %v6556_v2 }
 0x8a7   :  { %5703 = vmatprep.subr.bf16.mxu1 %v6556_v2 }
 0x8a8   :  { %5696 = vmatpush3.bf16.msra.mxu0 %v6714_v31 }
 0x8a9   :  { %5709 = vmatprep.subr.bf16.mxu0 %v6556_v2 }
 0x8aa   :  { %5704 = vmatpush3.bf16.msra.mxu1 %v6720_v32 }
 0x8ab   :  { %5717 = vmatprep.subr.bf16.mxu1 %v6556_v2 }
 0x970   :  { %v608_v26 = vpop.f32.mrb[12].mxu1 }
 0x971   :  { %v5675_v27 = vpop.f32.mrb[13].mxu1 }
 0x972   :  { %v611_v28 = vpop.f32.mrb[14].mxu1 }
 0x973   :  { %v5676_v33 = vpop.f32.mrb[15].mxu1 }
 0x976   :  { %v684_v34 = vpop.f32.mrb[16].mxu0 }
 0x977   :  { %v685_v36 = vadd.f32 %v684_v34, %v608_v26  ;;  %v5683_v37 = vpop.f32.mrb[17].mxu0 }
 0x978   :  { %v687_v38 = vpop.f32.mrb[18].mxu0  ;;  %v751_v39 = vpop.f32.mrb[16].mxu1  ;;  %v5243_v37 = vld [vmem:[%s7954_s17 + $0x20] sm:$0xff] }
 0x979   :  { %v690_v40 = vadd.f32 %v6756_v43, %v685_v36  ;;  %v806_v41 = vadd.f32 %v5237_v35, %v751_v39  ;;  %v5684_v42 = vpop.f32.mrb[19].mxu0  ;;  %v5691_v44 = vpop.f32.mrb[17].mxu1 }
 0x97a   :  { %v754_v45 = vpop.f32.mrb[18].mxu1 }
 0x97b   :  { %v691_v46 = vmul.f32 %v690_v40, %v6685_v10  ;;  %v807_v47 = vmul.f32 %v806_v41, %v6685_v10  ;;  %v5692_v48 = vpop.f32.mrb[19].mxu1 }
 0x97d   :  { %v5234_v49 = vmul.f32 -1.442695, %v691_v46  ;;  %v5238_v50 = vmul.f32 -1.442695, %v807_v47 }
 0x97f   :  { %6314 = vpow2.f32 %v5234_v49 }
 0x980   :  { %6316 = vpow2.f32 %v5238_v50 }
 0x989   :  { %v6315_v51 = vpop.eup %6314 }
 0x98a   :  { %v6317_v52 = vpop.eup %6316  ;;  %v695_v53 = vadd.f32 1.0, %v6315_v51 }
 0x98b   :  { %v811_v54 = vadd.f32 1.0, %v6317_v52 }
 0x98c   :  { %6318 = vrcp.f32 %v695_v53 }
 0x98d   :  { %6320 = vrcp.f32 %v811_v54 }
 0x996   :  { %v6319_v55 = vpop.eup %6318 }
 0x997   :  { %v6321_v56 = vpop.eup %6320  ;;  %v698_v57 = vmul.f32 %v6319_v55, %v6685_v10 }
 0x998   :  { %v814_v58 = vmul.f32 %v6321_v56, %v6685_v10 }
 0x999   :  { %v699_v59 = vadd.f32 %v698_v57, %v6691_v21 }
 0x99a   :  { %v815_v60 = vadd.f32 %v814_v58, %v6691_v21 }
 0x99b   :  { %702 = vrot.lane.b32.xlu0 %v699_v59, %s6560_s18  ;;  %v700_v4 = vmul.f32 %v699_v59, %v6816_v11 }
 0x99c   :  { %818 = vrot.lane.b32.xlu1 %v815_v60, %s6560_s18  ;;  %v816_v5 = vmul.f32 %v815_v60, %v6820_v14 }
 0xa0d   :  { %v703_v61 = vpop.permute.xlu0 %702 }
 0xa0e   :  { %v819_v62 = vpop.permute.xlu1 %818  ;;  %v705_v63 = vmul.f32 %v703_v61, %v699_v59 }
 0xa0f   :  { %v821_v0 = vmul.f32 %v819_v62, %v815_v60 }
 0xa10   :  { %707 = vrot.lane.b32.xlu0 %v705_v63, %s6561_s19 }
 0xa11   :  { %823 = vrot.lane.b32.xlu1 %v821_v0, %s6561_s19 }
 0xa82   :  { %v708_v6 = vpop.permute.xlu0 %707 }
 0xa83   :  { %v824_v7 = vpop.permute.xlu1 %823  ;;  %v6864_v8 = vadd.f32 %v708_v6, %v700_v4 }
 0xa84   :  { %v6866_v9 = vadd.f32 %v824_v7, %v816_v5 }
 0xa85   :  { %6322 = vtanh.f32 %v6864_v8 }
 0xa86   :  { %6324 = vtanh.f32 %v6866_v9 }
 0xa8f   :  { %v6323_v12 = vpop.eup %6322 }
 0xa90   :  { %v6325_v13 = vpop.eup %6324  ;;  %713 = vrot.lane.b32.xlu0 %v6323_v12, %s6560_s18 }
 0xa91   :  { %829 = vrot.lane.b32.xlu1 %v6325_v13, %s6560_s18 }
 0xb02   :  { %v714_v16 = vpop.permute.xlu0 %713 }
 0xb03   :  { %v830_v11 = vpop.permute.xlu1 %829  ;;  %v716_v17 = vmul.f32 %v714_v16, %v699_v59 }
 0xb04   :  { %v832_v14 = vmul.f32 %v830_v11, %v815_v60 }
 0xb05   :  { %v757_v19 = vpack.c.bf16 %v716_v17, %v716_v17 }
 0xb06   :  { %v833_v18 = vpack.c.bf16 %v832_v14, %v832_v14 }
 0xb07   :  { %759 = vrot.lane.b32.xlu0 %v757_v19, %s6561_s19 }
 0xb08   :  { %835 = vrot.lane.b32.xlu1 %v833_v18, %s6561_s19 }
 0xb79   :  { %v760_v20 = vpop.permute.xlu0 %759 }
 0xb7a   :  { %v836_v22 = vpop.permute.xlu1 %835  ;;  %5698 = vmatmul.mubr.msk.bf16.vlgmr.msra.gmra.mrb[20].mxu0 %vm121_vm4, %v760_v20 }
 0xb7b   :  { %5706 = vmatmul.mubr.msk.bf16.vlgmr.msra.gmra.mrb[20].mxu1 %vm121_vm4, %v836_v22  ;;  %5710 = vmatpush3.bf16.msra.mxu0 %v6657_v1 }
 0xb7c   :  { %5711 = vmatprep.subr.bf16.mxu0 %v6556_v2  ;;  %5713 = vmatprep.mubr.msk.bf16.mxu0 %vm6557_vm0, %v6556_v2 }
 0xb7d   :  { %5718 = vmatpush3.bf16.msra.mxu1 %v6703_v29  ;;  %5721 = vmatprep.mubr.msk.bf16.mxu1 %vm6557_vm0, %v6556_v2 }
 0xb7e   :  { %5719 = vmatprep.subr.bf16.mxu1 %v6556_v2 }
 0xb7f   :  { %5712 = vmatpush3.bf16.msra.mxu0 %v6665_v3 }
 0xb80   :  { %5725 = vmatprep.subr.bf16.mxu0 %v6556_v2 }
 0xb81   :  { %5720 = vmatpush3.bf16.msra.mxu1 %v6714_v31 }
 0xb82   :  { %5714 = vmatmul.mubr.msk.bf16.vlgmr.msra.gmra.mrb[24].mxu0 %vm121_vm4, %v836_v22  ;;  %5733 = vmatprep.subr.bf16.mxu1 %v6556_v2 }
 0xb83   :  { %5726 = vmatpush3.bf16.msra.mxu0 %v6708_v30  ;;  %5729 = vmatprep.mubr.msk.bf16.mxu0 %vm6557_vm0, %v6556_v2 }
 0xb84   :  { %5727 = vmatprep.subr.bf16.mxu0 %v6556_v2 }
 0xb87   :  { %5728 = vmatpush3.bf16.msra.mxu0 %v6720_v32 }
 0xb88   :  { %5741 = vmatprep.subr.bf16.mxu0 %v6556_v2 }
 0xc4d   :  { %v798_v23 = vpop.f32.mrb[20].mxu0 }
 0xc4e   :  { %v874_v24 = vpop.f32.mrb[20].mxu1  ;;  %v5699_v15 = vpop.f32.mrb[21].mxu0 }
 0xc4f   :  { %v875_v25 = vadd.f32 %v874_v24, %v798_v23  ;;  %v5707_v26 = vpop.f32.mrb[21].mxu1  ;;  %v801_v27 = vpop.f32.mrb[22].mxu0 }
 0xc50   :  { %v877_v28 = vpop.f32.mrb[22].mxu1  ;;  %v5700_v33 = vpop.f32.mrb[23].mxu0 }
 0xc51   :  { %v880_v34 = vadd.f32 %v6756_v43, %v875_v25  ;;  %v5708_v35 = vpop.f32.mrb[23].mxu1  ;;  %v5249_v25 = vld [vmem:[%s7954_s17 + $0x28] sm:$0xff] }
 0xc53   :  { %v881_v36 = vmul.f32 %v880_v34, %v6685_v10 }
 0xc55   :  { %v5240_v38 = vmul.f32 -1.442695, %v881_v36  ;;  %v941_v39 = vpop.f32.mrb[24].mxu0 }
 0xc56   :  { %v996_v40 = vadd.f32 %v5243_v37, %v941_v39  ;;  %v5715_v41 = vpop.f32.mrb[25].mxu0 }
 0xc57   :  { %6326 = vpow2.f32 %v5240_v38  ;;  %v944_v42 = vpop.f32.mrb[26].mxu0 }
 0xc58   :  { %v997_v44 = vmul.f32 %v996_v40, %v6685_v10  ;;  %v5716_v45 = vpop.f32.mrb[27].mxu0 }
 0xc5a   :  { %v5244_v46 = vmul.f32 -1.442695, %v997_v44 }
 0xc5c   :  { %6328 = vpow2.f32 %v5244_v46 }
 0xc61   :  { %v6327_v47 = vpop.eup %6326 }
 0xc62   :  { %v885_v48 = vadd.f32 1.0, %v6327_v47 }
 0xc64   :  { %6330 = vrcp.f32 %v885_v48 }
 0xc66   :  { %v6329_v49 = vpop.eup %6328 }
 0xc67   :  { %v1001_v50 = vadd.f32 1.0, %v6329_v49 }
 0xc69   :  { %6332 = vrcp.f32 %v1001_v50 }
 0xc6e   :  { %v6331_v51 = vpop.eup %6330 }
 0xc6f   :  { %v888_v52 = vmul.f32 %v6331_v51, %v6685_v10 }
 0xc71   :  { %v889_v53 = vadd.f32 %v888_v52, %v6691_v21 }
 0xc73   :  { %v6333_v54 = vpop.eup %6332  ;;  %892 = vrot.lane.b32.xlu0 %v889_v53, %s6560_s18  ;;  %v890_v61 = vmul.f32 %v889_v53, %v6864_v8 }
 0xc74   :  { %v1004_v55 = vmul.f32 %v6333_v54, %v6685_v10 }
 0xc76   :  { %v1005_v56 = vadd.f32 %v1004_v55, %v6691_v21 }
 0xc78   :  { %1008 = vrot.lane.b32.xlu1 %v1005_v56, %s6560_s18  ;;  %v1006_v0 = vmul.f32 %v1005_v56, %v6866_v9 }
 0xce5   :  { %v893_v57 = vpop.permute.xlu0 %892 }
 0xce6   :  { %v895_v58 = vmul.f32 %v893_v57, %v889_v53 }
 0xce8   :  { %897 = vrot.lane.b32.xlu0 %v895_v58, %s6561_s19 }
 0xcea   :  { %v1009_v59 = vpop.permute.xlu1 %1008 }
 0xceb   :  { %v1011_v60 = vmul.f32 %v1009_v59, %v1005_v56 }
 0xced   :  { %1013 = vrot.lane.b32.xlu1 %v1011_v60, %s6561_s19 }
 0xd5a   :  { %v898_v62 = vpop.permute.xlu0 %897 }
 0xd5b   :  { %v6910_v63 = vadd.f32 %v898_v62, %v890_v61 }
 0xd5d   :  { %6334 = vtanh.f32 %v6910_v63 }
 0xd5f   :  { %v1014_v4 = vpop.permute.xlu1 %1013 }
 0xd60   :  { %v6914_v5 = vadd.f32 %v1014_v4, %v1006_v0 }
 0xd62   :  { %6336 = vtanh.f32 %v6914_v5 }
 0xd67   :  { %v6335_v6 = vpop.eup %6334 }
 0xd68   :  { %903 = vrot.lane.b32.xlu0 %v6335_v6, %s6560_s18 }
 0xd6c   :  { %v6337_v7 = vpop.eup %6336 }
 0xd6d   :  { %1019 = vrot.lane.b32.xlu1 %v6337_v7, %s6560_s18 }
 0xdda   :  { %v904_v12 = vpop.permute.xlu0 %903 }
 0xddb   :  { %v906_v8 = vmul.f32 %v904_v12, %v889_v53 }
 0xddd   :  { %v947_v13 = vpack.c.bf16 %v906_v8, %v906_v8 }
 0xddf   :  { %949 = vrot.lane.b32.xlu0 %v947_v13, %s6561_s19  ;;  %v1020_v16 = vpop.permute.xlu1 %1019 }
 0xde0   :  { %v1022_v11 = vmul.f32 %v1020_v16, %v1005_v56 }
 0xde2   :  { %v1023_v17 = vpack.c.bf16 %v1022_v11, %v1022_v11 }
 0xde4   :  { %1025 = vrot.lane.b32.xlu1 %v1023_v17, %s6561_s19 }
 0xe51   :  { %v950_v9 = vpop.permute.xlu0 %949 }
 0xe52   :  { %5722 = vmatmul.mubr.msk.bf16.vlgmr.msra.gmra.mrb[24].mxu1 %vm121_vm4, %v950_v9 }
 0xe53   :  { %5734 = vmatpush3.bf16.msra.mxu1 %v6657_v1  ;;  %5737 = vmatprep.mubr.msk.bf16.mxu1 %vm6557_vm0, %v6556_v2 }
 0xe54   :  { %5735 = vmatprep.subr.bf16.mxu1 %v6556_v2 }
 0xe56   :  { %v1026_v14 = vpop.permute.xlu1 %1025 }
 0xe57   :  { %5736 = vmatpush3.bf16.msra.mxu1 %v6665_v3  ;;  %5730 = vmatmul.mubr.msk.bf16.vlgmr.msra.gmra.mrb[28].mxu0 %vm121_vm4, %v1026_v14 }
 0xe58   :  { %5742 = vmatpush3.bf16.msra.mxu0 %v6703_v29  ;;  %5749 = vmatprep.subr.bf16.mxu1 %v6556_v2 }
 0xe59   :  { %5743 = vmatprep.subr.bf16.mxu0 %v6556_v2  ;;  %5745 = vmatprep.mubr.msk.bf16.mxu0 %vm6557_vm0, %v6556_v2 }
 0xe5a   :  { %5738 = vmatmul.mubr.msk.bf16.vlgmr.msra.gmra.mrb[28].mxu1 %vm121_vm4, %v1026_v14 }
 0xe5b   :  { %5750 = vmatpush3.bf16.msra.mxu1 %v6708_v30  ;;  %5753 = vmatprep.mubr.msk.bf16.mxu1 %vm6557_vm0, %v6556_v2 }
 0xe5c   :  { %5744 = vmatpush3.bf16.msra.mxu0 %v6714_v31  ;;  %5751 = vmatprep.subr.bf16.mxu1 %v6556_v2 }
 0xe5d   :  { %5757 = vmatprep.subr.bf16.mxu0 %v6556_v2 }
 0xe5f   :  { %5752 = vmatpush3.bf16.msra.mxu1 %v6720_v32 }
 0xe60   :  { %5765 = vmatprep.subr.bf16.mxu1 %v6556_v2 }
 0xf25   :  { %v988_v19 = vpop.f32.mrb[24].mxu1 }
 0xf26   :  { %v5723_v18 = vpop.f32.mrb[25].mxu1 }
 0xf27   :  { %v991_v20 = vpop.f32.mrb[26].mxu1 }
 0xf28   :  { %v5724_v22 = vpop.f32.mrb[27].mxu1  ;;  %v5255_v20 = vld [vmem:[%s7954_s17 + $0x30] sm:$0xff] }
 0xf2a   :  { %v1064_v23 = vpop.f32.mrb[28].mxu0 }
 0xf2b   :  { %v1065_v24 = vadd.f32 %v1064_v23, %v988_v19  ;;  %v5731_v15 = vpop.f32.mrb[29].mxu0 }
 0xf2c   :  { %v1067_v26 = vpop.f32.mrb[30].mxu0 }
 0xf2d   :  { %v1070_v27 = vadd.f32 %v6756_v43, %v1065_v24  ;;  %v1131_v28 = vpop.f32.mrb[28].mxu1  ;;  %v5732_v33 = vpop.f32.mrb[31].mxu0 }
 0xf2e   :  { %v1186_v34 = vadd.f32 %v5249_v25, %v1131_v28  ;;  %v5739_v35 = vpop.f32.mrb[29].mxu1 }
 0xf2f   :  { %v1071_v36 = vmul.f32 %v1070_v27, %v6685_v10  ;;  %v1134_v37 = vpop.f32.mrb[30].mxu1 }
 0xf30   :  { %v1187_v38 = vmul.f32 %v1186_v34, %v6685_v10  ;;  %v5740_v39 = vpop.f32.mrb[31].mxu1 }
 0xf31   :  { %v5246_v40 = vmul.f32 -1.442695, %v1071_v36 }
 0xf32   :  { %v5250_v41 = vmul.f32 -1.442695, %v1187_v38 }
 0xf33   :  { %6338 = vpow2.f32 %v5246_v40 }
 0xf34   :  { %6340 = vpow2.f32 %v5250_v41 }
 0xf3d   :  { %v6339_v42 = vpop.eup %6338 }
 0xf3e   :  { %v6341_v44 = vpop.eup %6340  ;;  %v1075_v45 = vadd.f32 1.0, %v6339_v42 }
 0xf3f   :  { %v1191_v46 = vadd.f32 1.0, %v6341_v44 }
 0xf40   :  { %6342 = vrcp.f32 %v1075_v45 }
 0xf41   :  { %6344 = vrcp.f32 %v1191_v46 }
 0xf4a   :  { %v6343_v47 = vpop.eup %6342 }
 0xf4b   :  { %v6345_v48 = vpop.eup %6344  ;;  %v1078_v49 = vmul.f32 %v6343_v47, %v6685_v10 }
 0xf4c   :  { %v1194_v50 = vmul.f32 %v6345_v48, %v6685_v10 }
 0xf4d   :  { %v1079_v51 = vadd.f32 %v1078_v49, %v6691_v21 }
 0xf4e   :  { %v1195_v52 = vadd.f32 %v1194_v50, %v6691_v21 }
 0xf4f   :  { %1082 = vrot.lane.b32.xlu0 %v1079_v51, %s6560_s18  ;;  %v1080_v57 = vmul.f32 %v1079_v51, %v6910_v63 }
 0xf50   :  { %1198 = vrot.lane.b32.xlu1 %v1195_v52, %s6560_s18  ;;  %v1196_v58 = vmul.f32 %v1195_v52, %v6914_v5 }
 0xfc1   :  { %v1083_v53 = vpop.permute.xlu0 %1082 }
 0xfc2   :  { %v1199_v54 = vpop.permute.xlu1 %1198  ;;  %v1085_v55 = vmul.f32 %v1083_v53, %v1079_v51 }
 0xfc3   :  { %v1201_v56 = vmul.f32 %v1199_v54, %v1195_v52 }
 0xfc4   :  { %1087 = vrot.lane.b32.xlu0 %v1085_v55, %s6561_s19 }
 0xfc5   :  { %1203 = vrot.lane.b32.xlu1 %v1201_v56, %s6561_s19 }
0x1036   :  { %v1088_v59 = vpop.permute.xlu0 %1087 }
0x1037   :  { %v1204_v60 = vpop.permute.xlu1 %1203  ;;  %v6958_v61 = vadd.f32 %v1088_v59, %v1080_v57 }
0x1038   :  { %v6960_v62 = vadd.f32 %v1204_v60, %v1196_v58 }
0x1039   :  { %6346 = vtanh.f32 %v6958_v61 }
0x103a   :  { %6348 = vtanh.f32 %v6960_v62 }
0x1043   :  { %v6347_v0 = vpop.eup %6346 }
0x1044   :  { %v6349_v4 = vpop.eup %6348  ;;  %1093 = vrot.lane.b32.xlu0 %v6347_v0, %s6560_s18 }
0x1045   :  { %1209 = vrot.lane.b32.xlu1 %v6349_v4, %s6560_s18  ;;  %v7028_v4 = vld [vmem:[%s7937_s4 + $0x8] sm:$0xff]  }
0x10b6   :  { %v1094_v6 = vpop.permute.xlu0 %1093 }
0x10b7   :  { %v1210_v63 = vpop.permute.xlu1 %1209  ;;  %v1096_v7 = vmul.f32 %v1094_v6, %v1079_v51  ;;  %v7035_v6 = vld [vmem:[%s7939_s6] sm:$0xff]  }
0x10b8   :  { %v1212_v5 = vmul.f32 %v1210_v63, %v1195_v52  ;;  %v7046_v63 = vld [vmem:[%s7938_s5] sm:$0xff]  }
0x10b9   :  { %v1137_v12 = vpack.c.bf16 %v1096_v7, %v1096_v7  ;;  %v7054_v7 = vld [vmem:[%s7939_s6 + $0x8] sm:$0xff]   ;;  %s3456_s6 = scvt.s32.f32 %s3455_s24  ;;  %s5368_s24 = sld [smem:[#allocation3 + $0x6]] }
0x10ba   :  { %v1213_v8 = vpack.c.bf16 %v1212_v5, %v1212_v5  ;;  %v7062_v5 = vld [vmem:[%s7938_s5 + $0x8] sm:$0xff]   ;;  %s2750_s5 = scalar_select %p2749_p5, 1, 0 }
0x10bb   :  { %1139 = vrot.lane.b32.xlu0 %v1137_v12, %s6561_s19 }
0x10bc   :  { %1215 = vrot.lane.b32.xlu1 %v1213_v8, %s6561_s19  ;;  %s2751_s26 = scvt.s32.f32 %s2750_s5 }
0x10be   :  { %s2832_s27 = ssub.f32 1.0, %s2751_s26 }
0x10bf   :  { %p4858_p11 = scmp.ne.s32.totalorder %s5368_s24, 0 }
0x112d   :  { %v1140_v13 = vpop.permute.xlu0 %1139 }
0x112e   :  { %v1216_v16 = vpop.permute.xlu1 %1215  ;;  %5746 = vmatmul.mubr.msk.bf16.vlgmr.msra.gmra.mrb[32].mxu0 %vm121_vm4, %v1140_v13 }
0x112f   :  { %5754 = vmatmul.mubr.msk.bf16.vlgmr.msra.gmra.mrb[32].mxu1 %vm121_vm4, %v1216_v16  ;;  %5758 = vmatpush3.bf16.msra.mxu0 %v6657_v1 }
0x1130   :  { %5759 = vmatprep.subr.bf16.mxu0 %v6556_v2  ;;  %5761 = vmatprep.mubr.msk.bf16.mxu0 %vm6557_vm0, %v6556_v2 }
0x1131   :  { %5766 = vmatpush3.bf16.msra.mxu1 %v6703_v29  ;;  %5769 = vmatprep.mubr.msk.bf16.mxu1 %vm6557_vm0, %v6556_v2 }
0x1132   :  { %5767 = vmatprep.subr.bf16.mxu1 %v6556_v2 }
0x1133   :  { %5760 = vmatpush3.bf16.msra.mxu0 %v6665_v3 }
0x1134   :  { %5773 = vmatprep.subr.bf16.mxu0 %v6556_v2 }
0x1135   :  { %5768 = vmatpush3.bf16.msra.mxu1 %v6714_v31 }
0x1136   :  { %5762 = vmatmul.mubr.msk.bf16.vlgmr.msra.gmra.mrb[36].mxu0 %vm121_vm4, %v1216_v16  ;;  %5781 = vmatprep.subr.bf16.mxu1 %v6556_v2 }
0x1137   :  { %5774 = vmatpush3.bf16.msra.mxu0 %v6708_v30  ;;  %5777 = vmatprep.mubr.msk.bf16.mxu0 %vm6557_vm0, %v6556_v2 }
0x1138   :  { %5775 = vmatprep.subr.bf16.mxu0 %v6556_v2 }
0x113b   :  { %5776 = vmatpush3.bf16.msra.mxu0 %v6720_v32 }
0x113c   :  { %5789 = vmatprep.subr.bf16.mxu0 %v6556_v2 }
0x1201   :  { %v1178_v1 = vpop.f32.mrb[32].mxu0 }
0x1202   :  { %v1254_v3 = vpop.f32.mrb[32].mxu1  ;;  %v5747_v29 = vpop.f32.mrb[33].mxu0 }
0x1203   :  { %v1255_v11 = vadd.f32 %v1254_v3, %v1178_v1  ;;  %v5755_v31 = vpop.f32.mrb[33].mxu1  ;;  %v1181_v17 = vpop.f32.mrb[34].mxu0 }
0x1204   :  { %v1257_v9 = vpop.f32.mrb[34].mxu1  ;;  %v5748_v14 = vpop.f32.mrb[35].mxu0 }
0x1205   :  { %v1260_v19 = vadd.f32 %v6756_v43, %v1255_v11  ;;  %v5756_v30 = vpop.f32.mrb[35].mxu1  ;;  %v5261_v11 = vld [vmem:[%s7954_s17 + $0x38] sm:$0xff] }
0x1207   :  { %v1261_v18 = vmul.f32 %v1260_v19, %v6685_v10 }
0x1209   :  { %v5252_v32 = vmul.f32 -1.442695, %v1261_v18  ;;  %v1321_v22 = vpop.f32.mrb[36].mxu0 }
0x120a   :  { %v1376_v23 = vadd.f32 %v5255_v20, %v1321_v22  ;;  %v5763_v24 = vpop.f32.mrb[37].mxu0 }
0x120b   :  { %6350 = vpow2.f32 %v5252_v32  ;;  %v1324_v15 = vpop.f32.mrb[38].mxu0 }
0x120c   :  { %v1377_v25 = vmul.f32 %v1376_v23, %v6685_v10  ;;  %v5764_v26 = vpop.f32.mrb[39].mxu0 }
0x120e   :  { %v5256_v27 = vmul.f32 -1.442695, %v1377_v25 }
0x1210   :  { %6352 = vpow2.f32 %v5256_v27 }
0x1215   :  { %v6351_v28 = vpop.eup %6350 }
0x1216   :  { %v1265_v33 = vadd.f32 1.0, %v6351_v28 }
0x1218   :  { %6354 = vrcp.f32 %v1265_v33 }
0x121a   :  { %v6353_v34 = vpop.eup %6352 }
0x121b   :  { %v1381_v35 = vadd.f32 1.0, %v6353_v34 }
0x121d   :  { %6356 = vrcp.f32 %v1381_v35 }
0x1222   :  { %v6355_v36 = vpop.eup %6354 }
0x1223   :  { %v1268_v37 = vmul.f32 %v6355_v36, %v6685_v10 }
0x1225   :  { %v1269_v38 = vadd.f32 %v1268_v37, %v6691_v21 }
0x1227   :  { %v6357_v39 = vpop.eup %6356  ;;  %1272 = vrot.lane.b32.xlu0 %v1269_v38, %s6560_s18  ;;  %v1270_v47 = vmul.f32 %v1269_v38, %v6958_v61 }
0x1228   :  { %v1384_v40 = vmul.f32 %v6357_v39, %v6685_v10 }
0x122a   :  { %v1385_v41 = vadd.f32 %v1384_v40, %v6691_v21 }
0x122c   :  { %1388 = vrot.lane.b32.xlu1 %v1385_v41, %s6560_s18  ;;  %v1386_v50 = vmul.f32 %v1385_v41, %v6960_v62  ;;  %v7019_v62 = vld [vmem:[%s7937_s4] sm:$0xff]  }
0x1299   :  { %v1273_v42 = vpop.permute.xlu0 %1272 }
0x129a   :  { %v1275_v44 = vmul.f32 %v1273_v42, %v1269_v38 }
0x129c   :  { %1277 = vrot.lane.b32.xlu0 %v1275_v44, %s6561_s19 }
0x129e   :  { %v1389_v45 = vpop.permute.xlu1 %1388 }
0x129f   :  { %v1391_v46 = vmul.f32 %v1389_v45, %v1385_v41 }
0x12a1   :  { %1393 = vrot.lane.b32.xlu1 %v1391_v46, %s6561_s19 }
0x130e   :  { %v1278_v48 = vpop.permute.xlu0 %1277 }
0x130f   :  { %v7004_v49 = vadd.f32 %v1278_v48, %v1270_v47 }
0x1311   :  { %6358 = vtanh.f32 %v7004_v49 }
0x1313   :  { %v1394_v51 = vpop.permute.xlu1 %1393 }
0x1314   :  { %v7008_v52 = vadd.f32 %v1394_v51, %v1386_v50 }
0x1316   :  { %6360 = vtanh.f32 %v7008_v52 }
0x131b   :  { %v6359_v53 = vpop.eup %6358 }
0x131c   :  { %1283 = vrot.lane.b32.xlu0 %v6359_v53, %s6560_s18 }
0x1320   :  { %v6361_v54 = vpop.eup %6360 }
0x1321   :  { %1399 = vrot.lane.b32.xlu1 %v6361_v54, %s6560_s18 }
0x138e   :  { %v1284_v55 = vpop.permute.xlu0 %1283 }
0x138f   :  { %v1286_v56 = vmul.f32 %v1284_v55, %v1269_v38 }
0x1391   :  { %v1327_v57 = vpack.c.bf16 %v1286_v56, %v1286_v56 }
0x1393   :  { %1329 = vrot.lane.b32.xlu0 %v1327_v57, %s6561_s19  ;;  %v1400_v58 = vpop.permute.xlu1 %1399 }
0x1394   :  { %v1402_v59 = vmul.f32 %v1400_v58, %v1385_v41 }
0x1396   :  { %v1403_v60 = vpack.c.bf16 %v1402_v59, %v1402_v59 }
0x1398   :  { %1405 = vrot.lane.b32.xlu1 %v1403_v60, %s6561_s19 }
0x1405   :  { %v1330_v61 = vpop.permute.xlu0 %1329 }
0x1406   :  { %5770 = vmatmul.mubr.msk.bf16.vlgmr.msra.gmra.mrb[36].mxu1 %vm121_vm4, %v1330_v61 }
0x1407   :  { %5782 = vmatpush3.bf16.msra.mxu1 %v7019_v62  ;;  %5785 = vmatprep.mubr.msk.bf16.mxu1 %vm6557_vm0, %v6556_v2 }
0x1408   :  { %5783 = vmatprep.subr.bf16.mxu1 %v6556_v2 }
0x140a   :  { %v1406_v0 = vpop.permute.xlu1 %1405 }
0x140b   :  { %5784 = vmatpush3.bf16.msra.mxu1 %v7028_v4  ;;  %5778 = vmatmul.mubr.msk.bf16.vlgmr.msra.gmra.mrb[40].mxu0 %vm121_vm4, %v1406_v0 }
0x140c   :  { %5790 = vmatpush3.bf16.msra.mxu0 %v7035_v6  ;;  %5797 = vmatprep.subr.bf16.mxu1 %v6556_v2 }
0x140d   :  { %5791 = vmatprep.subr.bf16.mxu0 %v6556_v2  ;;  %5793 = vmatprep.mubr.msk.bf16.mxu0 %vm6557_vm0, %v6556_v2 }
0x140e   :  { %5786 = vmatmul.mubr.msk.bf16.vlgmr.msra.gmra.mrb[40].mxu1 %vm121_vm4, %v1406_v0 }
0x140f   :  { %5798 = vmatpush3.bf16.msra.mxu1 %v7046_v63  ;;  %5801 = vmatprep.mubr.msk.bf16.mxu1 %vm6557_vm0, %v6556_v2 }
0x1410   :  { %5792 = vmatpush3.bf16.msra.mxu0 %v7054_v7  ;;  %5799 = vmatprep.subr.bf16.mxu1 %v6556_v2 }
0x1411   :  { %5805 = vmatprep.subr.bf16.mxu0 %v6556_v2 }
0x1413   :  { %5800 = vmatpush3.bf16.msra.mxu1 %v7062_v5 }
0x1414   :  { %5813 = vmatprep.subr.bf16.mxu1 %v6556_v2 }
0x14d9   :  { %v1368_v12 = vpop.f32.mrb[36].mxu1 }
0x14da   :  { %v5771_v8 = vpop.f32.mrb[37].mxu1 }
0x14db   :  { %v1371_v13 = vpop.f32.mrb[38].mxu1 }
0x14dc   :  { %v5772_v16 = vpop.f32.mrb[39].mxu1 }
0x14dd   :  { %v7116_v16 = vld [vmem:[%s7940_s7] ss:$0 sm:$0xff] }
0x14de   :  { %v1444_v1 = vpop.f32.mrb[40].mxu0 }
0x14df   :  { %v1445_v3 = vadd.f32 %v1444_v1, %v1368_v12  ;;  %v5779_v29 = vpop.f32.mrb[41].mxu0 }
0x14e0   :  { %v1447_v31 = vpop.f32.mrb[42].mxu0 }
0x14e1   :  { %v1450_v17 = vadd.f32 %v6756_v43, %v1445_v3  ;;  %v1511_v9 = vpop.f32.mrb[40].mxu1  ;;  %v5780_v14 = vpop.f32.mrb[43].mxu0 }
0x14e2   :  { %v1566_v19 = vadd.f32 %v5261_v11, %v1511_v9  ;;  %v5787_v30 = vpop.f32.mrb[41].mxu1  ;;  %v5267_v11 = vld [vmem:[%s7954_s17 + $0x40] sm:$0xff] }
0x14e3   :  { %v1451_v18 = vmul.f32 %v1450_v17, %v6685_v10  ;;  %v1514_v20 = vpop.f32.mrb[42].mxu1 }
0x14e4   :  { %v1567_v32 = vmul.f32 %v1566_v19, %v6685_v10  ;;  %v5788_v22 = vpop.f32.mrb[43].mxu1 }
0x14e5   :  { %v5258_v23 = vmul.f32 -1.442695, %v1451_v18 }
0x14e6   :  { %v5262_v24 = vmul.f32 -1.442695, %v1567_v32 }
0x14e7   :  { %6362 = vpow2.f32 %v5258_v23 }
0x14e8   :  { %6364 = vpow2.f32 %v5262_v24 }
0x14f1   :  { %v6363_v15 = vpop.eup %6362 }
0x14f2   :  { %v6365_v25 = vpop.eup %6364  ;;  %v1455_v26 = vadd.f32 1.0, %v6363_v15 }
0x14f3   :  { %v1571_v27 = vadd.f32 1.0, %v6365_v25 }
0x14f4   :  { %6366 = vrcp.f32 %v1455_v26 }
0x14f5   :  { %6368 = vrcp.f32 %v1571_v27 }
0x14fe   :  { %v6367_v43 = vpop.eup %6366 }
0x14ff   :  { %v6369_v28 = vpop.eup %6368  ;;  %v1458_v33 = vmul.f32 %v6367_v43, %v6685_v10 }
0x1500   :  { %v1574_v34 = vmul.f32 %v6369_v28, %v6685_v10 }
0x1501   :  { %v1459_v35 = vadd.f32 %v1458_v33, %v6691_v21 }
0x1502   :  { %v1575_v36 = vadd.f32 %v1574_v34, %v6691_v21 }
0x1503   :  { %1462 = vrot.lane.b32.xlu0 %v1459_v35, %s6560_s18  ;;  %v1460_v41 = vmul.f32 %v1459_v35, %v7004_v49 }
0x1504   :  { %1578 = vrot.lane.b32.xlu1 %v1575_v36, %s6560_s18  ;;  %v1576_v42 = vmul.f32 %v1575_v36, %v7008_v52 }
0x1575   :  { %v1463_v37 = vpop.permute.xlu0 %1462 }
0x1576   :  { %v1579_v38 = vpop.permute.xlu1 %1578  ;;  %v1465_v39 = vmul.f32 %v1463_v37, %v1459_v35 }
0x1577   :  { %v1581_v40 = vmul.f32 %v1579_v38, %v1575_v36 }
0x1578   :  { %1467 = vrot.lane.b32.xlu0 %v1465_v39, %s6561_s19 }
0x1579   :  { %1583 = vrot.lane.b32.xlu1 %v1581_v40, %s6561_s19 }
0x15ea   :  { %v1468_v44 = vpop.permute.xlu0 %1467 }
0x15eb   :  { %v1584_v45 = vpop.permute.xlu1 %1583  ;;  %v7082_v46 = vadd.f32 %v1468_v44, %v1460_v41 }
0x15ec   :  { %v7084_v47 = vadd.f32 %v1584_v45, %v1576_v42 }
0x15ed   :  { %6370 = vtanh.f32 %v7082_v46 }
0x15ee   :  { %6372 = vtanh.f32 %v7084_v47 }
0x15f7   :  { %v6371_v48 = vpop.eup %6370 }
0x15f8   :  { %v6373_v50 = vpop.eup %6372  ;;  %1473 = vrot.lane.b32.xlu0 %v6371_v48, %s6560_s18 }
0x15f9   :  { %1589 = vrot.lane.b32.xlu1 %v6373_v50, %s6560_s18 }
0x166a   :  { %v1474_v51 = vpop.permute.xlu0 %1473 }
0x166b   :  { %v1590_v49 = vpop.permute.xlu1 %1589  ;;  %v1476_v53 = vmul.f32 %v1474_v51, %v1459_v35 }
0x166c   :  { %v1592_v52 = vmul.f32 %v1590_v49, %v1575_v36 }
0x166d   :  { %v1517_v54 = vpack.c.bf16 %v1476_v53, %v1476_v53 }
0x166e   :  { %v1593_v55 = vpack.c.bf16 %v1592_v52, %v1592_v52 }
0x166f   :  { %1519 = vrot.lane.b32.xlu0 %v1517_v54, %s6561_s19 }
0x1670   :  { %1595 = vrot.lane.b32.xlu1 %v1593_v55, %s6561_s19 }
0x16e1   :  { %v1520_v56 = vpop.permute.xlu0 %1519 }
0x16e2   :  { %v1596_v57 = vpop.permute.xlu1 %1595  ;;  %5794 = vmatmul.mubr.msk.bf16.vlgmr.msra.gmra.mrb[44].mxu0 %vm121_vm4, %v1520_v56 }
0x16e3   :  { %5802 = vmatmul.mubr.msk.bf16.vlgmr.msra.gmra.mrb[44].mxu1 %vm121_vm4, %v1596_v57  ;;  %5806 = vmatpush3.bf16.msra.mxu0 %v7019_v62 }
0x16e4   :  { %5807 = vmatprep.subr.bf16.mxu0 %v6556_v2  ;;  %5809 = vmatprep.mubr.msk.bf16.mxu0 %vm6557_vm0, %v6556_v2 }
0x16e5   :  { %5814 = vmatpush3.bf16.msra.mxu1 %v7035_v6  ;;  %5817 = vmatprep.mubr.msk.bf16.mxu1 %vm6557_vm0, %v6556_v2 }
0x16e6   :  { %5815 = vmatprep.subr.bf16.mxu1 %v6556_v2 }
0x16e7   :  { %5808 = vmatpush3.bf16.msra.mxu0 %v7028_v4 }
0x16e8   :  { %5821 = vmatprep.subr.bf16.mxu0 %v6556_v2 }
0x16e9   :  { %5816 = vmatpush3.bf16.msra.mxu1 %v7054_v7 }
0x16ea   :  { %5810 = vmatmul.mubr.msk.bf16.vlgmr.msra.gmra.mrb[48].mxu0 %vm121_vm4, %v1596_v57  ;;  %5829 = vmatprep.subr.bf16.mxu1 %v6556_v2 }
0x16eb   :  { %5822 = vmatpush3.bf16.msra.mxu0 %v7046_v63  ;;  %5825 = vmatprep.mubr.msk.bf16.mxu0 %vm6557_vm0, %v6556_v2 }
0x16ec   :  { %5823 = vmatprep.subr.bf16.mxu0 %v6556_v2 }
0x16ef   :  { %5824 = vmatpush3.bf16.msra.mxu0 %v7062_v5 }
0x16f0   :  { %5837 = vmatprep.subr.bf16.mxu0 %v6556_v2 }
0x17b5   :  { %v1558_v58 = vpop.f32.mrb[44].mxu0 }
0x17b6   :  { %v1634_v59 = vpop.f32.mrb[44].mxu1  ;;  %v5795_v60 = vpop.f32.mrb[45].mxu0 }
0x17b7   :  { %v1635_v61 = vadd.f32 %v1634_v59, %v1558_v58  ;;  %v5803_v0 = vpop.f32.mrb[45].mxu1  ;;  %v1561_v12 = vpop.f32.mrb[46].mxu0 }
0x17b8   :  { %v1637_v8 = vpop.f32.mrb[46].mxu1  ;;  %v5796_v13 = vpop.f32.mrb[47].mxu0 }
0x17b9   :  { %v1640_v1 = vadd.f32 %v7116_v16, %v1635_v61  ;;  %v5804_v3 = vpop.f32.mrb[47].mxu1  ;;  %v5273_v61 = vld [vmem:[%s7954_s17 + $0x48] sm:$0xff] }
0x17bb   :  { %v1641_v29 = vmul.f32 %v1640_v1, %v6685_v10 }
0x17bd   :  { %v5264_v31 = vmul.f32 -1.442695, %v1641_v29  ;;  %v1701_v17 = vpop.f32.mrb[48].mxu0 }
0x17be   :  { %v1756_v9 = vadd.f32 %v5267_v11, %v1701_v17  ;;  %v5811_v14 = vpop.f32.mrb[49].mxu0 }
0x17bf   :  { %6374 = vpow2.f32 %v5264_v31  ;;  %v1704_v19 = vpop.f32.mrb[50].mxu0 }
0x17c0   :  { %v1757_v30 = vmul.f32 %v1756_v9, %v6685_v10  ;;  %v5812_v18 = vpop.f32.mrb[51].mxu0 }
0x17c2   :  { %v5268_v20 = vmul.f32 -1.442695, %v1757_v30 }
0x17c4   :  { %6376 = vpow2.f32 %v5268_v20 }
0x17c9   :  { %v6375_v32 = vpop.eup %6374 }
0x17ca   :  { %v1645_v22 = vadd.f32 1.0, %v6375_v32 }
0x17cc   :  { %6378 = vrcp.f32 %v1645_v22 }
0x17ce   :  { %v6377_v23 = vpop.eup %6376 }
0x17cf   :  { %v1761_v24 = vadd.f32 1.0, %v6377_v23 }
0x17d1   :  { %6380 = vrcp.f32 %v1761_v24 }
0x17d6   :  { %v6379_v15 = vpop.eup %6378 }
0x17d7   :  { %v1648_v25 = vmul.f32 %v6379_v15, %v6685_v10 }
0x17d9   :  { %v1649_v26 = vadd.f32 %v1648_v25, %v6691_v21 }
0x17db   :  { %v6381_v27 = vpop.eup %6380  ;;  %1652 = vrot.lane.b32.xlu0 %v1649_v26, %s6560_s18  ;;  %v1650_v37 = vmul.f32 %v1649_v26, %v7082_v46 }
0x17dc   :  { %v1764_v43 = vmul.f32 %v6381_v27, %v6685_v10 }
0x17de   :  { %v1765_v28 = vadd.f32 %v1764_v43, %v6691_v21 }
0x17e0   :  { %1768 = vrot.lane.b32.xlu1 %v1765_v28, %s6560_s18  ;;  %v1766_v40 = vmul.f32 %v1765_v28, %v7084_v47 }
0x184d   :  { %v1653_v33 = vpop.permute.xlu0 %1652 }
0x184e   :  { %v1655_v34 = vmul.f32 %v1653_v33, %v1649_v26 }
0x1850   :  { %1657 = vrot.lane.b32.xlu0 %v1655_v34, %s6561_s19 }
0x1852   :  { %v1769_v35 = vpop.permute.xlu1 %1768 }
0x1853   :  { %v1771_v36 = vmul.f32 %v1769_v35, %v1765_v28 }
0x1855   :  { %1773 = vrot.lane.b32.xlu1 %v1771_v36, %s6561_s19 }
0x18c2   :  { %v1658_v38 = vpop.permute.xlu0 %1657 }
0x18c3   :  { %v7133_v39 = vadd.f32 %v1658_v38, %v1650_v37 }
0x18c5   :  { %6382 = vtanh.f32 %v7133_v39 }
0x18c7   :  { %v1774_v41 = vpop.permute.xlu1 %1773 }
0x18c8   :  { %v7137_v42 = vadd.f32 %v1774_v41, %v1766_v40 }
0x18ca   :  { %6384 = vtanh.f32 %v7137_v42 }
0x18cf   :  { %v6383_v44 = vpop.eup %6382 }
0x18d0   :  { %1663 = vrot.lane.b32.xlu0 %v6383_v44, %s6560_s18 }
0x18d4   :  { %v6385_v45 = vpop.eup %6384 }
0x18d5   :  { %1779 = vrot.lane.b32.xlu1 %v6385_v45, %s6560_s18 }
0x1942   :  { %v1664_v48 = vpop.permute.xlu0 %1663 }
0x1943   :  { %v1666_v46 = vmul.f32 %v1664_v48, %v1649_v26 }
0x1945   :  { %v1707_v50 = vpack.c.bf16 %v1666_v46, %v1666_v46 }
0x1947   :  { %1709 = vrot.lane.b32.xlu0 %v1707_v50, %s6561_s19  ;;  %v1780_v51 = vpop.permute.xlu1 %1779 }
0x1948   :  { %v1782_v49 = vmul.f32 %v1780_v51, %v1765_v28 }
0x194a   :  { %v1783_v53 = vpack.c.bf16 %v1782_v49, %v1782_v49 }
0x194c   :  { %1785 = vrot.lane.b32.xlu1 %v1783_v53, %s6561_s19 }
0x19b9   :  { %v1710_v47 = vpop.permute.xlu0 %1709 }
0x19ba   :  { %5818 = vmatmul.mubr.msk.bf16.vlgmr.msra.gmra.mrb[48].mxu1 %vm121_vm4, %v1710_v47 }
0x19bb   :  { %5830 = vmatpush3.bf16.msra.mxu1 %v7019_v62  ;;  %5833 = vmatprep.mubr.msk.bf16.mxu1 %vm6557_vm0, %v6556_v2 }
0x19bc   :  { %5831 = vmatprep.subr.bf16.mxu1 %v6556_v2 }
0x19be   :  { %v1786_v52 = vpop.permute.xlu1 %1785 }
0x19bf   :  { %5832 = vmatpush3.bf16.msra.mxu1 %v7028_v4  ;;  %5826 = vmatmul.mubr.msk.bf16.vlgmr.msra.gmra.mrb[52].mxu0 %vm121_vm4, %v1786_v52 }
0x19c0   :  { %5838 = vmatpush3.bf16.msra.mxu0 %v7035_v6  ;;  %5845 = vmatprep.subr.bf16.mxu1 %v6556_v2 }
0x19c1   :  { %5839 = vmatprep.subr.bf16.mxu0 %v6556_v2  ;;  %5841 = vmatprep.mubr.msk.bf16.mxu0 %vm6557_vm0, %v6556_v2 }
0x19c2   :  { %5834 = vmatmul.mubr.msk.bf16.vlgmr.msra.gmra.mrb[52].mxu1 %vm121_vm4, %v1786_v52 }
0x19c3   :  { %5846 = vmatpush3.bf16.msra.mxu1 %v7046_v63  ;;  %5849 = vmatprep.mubr.msk.bf16.mxu1 %vm6557_vm0, %v6556_v2 }
0x19c4   :  { %5840 = vmatpush3.bf16.msra.mxu0 %v7054_v7  ;;  %5847 = vmatprep.subr.bf16.mxu1 %v6556_v2 }
0x19c5   :  { %5853 = vmatprep.subr.bf16.mxu0 %v6556_v2 }
0x19c7   :  { %5848 = vmatpush3.bf16.msra.mxu1 %v7062_v5 }
0x19c8   :  { %5861 = vmatprep.subr.bf16.mxu1 %v6556_v2 }
0x1a8d   :  { %v1748_v54 = vpop.f32.mrb[48].mxu1 }
0x1a8e   :  { %v5819_v55 = vpop.f32.mrb[49].mxu1 }
0x1a8f   :  { %v1751_v56 = vpop.f32.mrb[50].mxu1 }
0x1a90   :  { %v5820_v57 = vpop.f32.mrb[51].mxu1 }
0x1a92   :  { %v1824_v58 = vpop.f32.mrb[52].mxu0 }
0x1a93   :  { %v1825_v59 = vadd.f32 %v1824_v58, %v1748_v54  ;;  %v5827_v60 = vpop.f32.mrb[53].mxu0 }
0x1a94   :  { %v1827_v0 = vpop.f32.mrb[54].mxu0 }
0x1a95   :  { %v1830_v12 = vadd.f32 %v7116_v16, %v1825_v59  ;;  %v1891_v8 = vpop.f32.mrb[52].mxu1  ;;  %v5828_v13 = vpop.f32.mrb[55].mxu0 }
0x1a96   :  { %v1946_v1 = vadd.f32 %v5273_v61, %v1891_v8  ;;  %v5835_v3 = vpop.f32.mrb[53].mxu1  ;;  %v5279_v61 = vld [vmem:[%s7954_s17 + $0x50] sm:$0xff] }
0x1a97   :  { %v1831_v29 = vmul.f32 %v1830_v12, %v6685_v10  ;;  %v1894_v11 = vpop.f32.mrb[54].mxu1 }
0x1a98   :  { %v1947_v31 = vmul.f32 %v1946_v1, %v6685_v10  ;;  %v5836_v17 = vpop.f32.mrb[55].mxu1 }
0x1a99   :  { %v5270_v9 = vmul.f32 -1.442695, %v1831_v29 }
0x1a9a   :  { %v5274_v14 = vmul.f32 -1.442695, %v1947_v31 }
0x1a9b   :  { %6386 = vpow2.f32 %v5270_v9 }
0x1a9c   :  { %6388 = vpow2.f32 %v5274_v14 }
0x1aa5   :  { %v6387_v19 = vpop.eup %6386 }
0x1aa6   :  { %v6389_v30 = vpop.eup %6388  ;;  %v1835_v18 = vadd.f32 1.0, %v6387_v19 }
0x1aa7   :  { %v1951_v20 = vadd.f32 1.0, %v6389_v30 }
0x1aa8   :  { %6390 = vrcp.f32 %v1835_v18 }
0x1aa9   :  { %6392 = vrcp.f32 %v1951_v20 }
0x1ab2   :  { %v6391_v32 = vpop.eup %6390 }
0x1ab3   :  { %v6393_v22 = vpop.eup %6392  ;;  %v1838_v23 = vmul.f32 %v6391_v32, %v6685_v10 }
0x1ab4   :  { %v1954_v24 = vmul.f32 %v6393_v22, %v6685_v10 }
0x1ab5   :  { %v1839_v15 = vadd.f32 %v1838_v23, %v6691_v21 }
0x1ab6   :  { %v1955_v25 = vadd.f32 %v1954_v24, %v6691_v21 }
0x1ab7   :  { %1842 = vrot.lane.b32.xlu0 %v1839_v15, %s6560_s18  ;;  %v1840_v33 = vmul.f32 %v1839_v15, %v7133_v39 }
0x1ab8   :  { %1958 = vrot.lane.b32.xlu1 %v1955_v25, %s6560_s18  ;;  %v1956_v34 = vmul.f32 %v1955_v25, %v7137_v42 }
0x1b29   :  { %v1843_v26 = vpop.permute.xlu0 %1842 }
0x1b2a   :  { %v1959_v27 = vpop.permute.xlu1 %1958  ;;  %v1845_v43 = vmul.f32 %v1843_v26, %v1839_v15 }
0x1b2b   :  { %v1961_v28 = vmul.f32 %v1959_v27, %v1955_v25 }
0x1b2c   :  { %1847 = vrot.lane.b32.xlu0 %v1845_v43, %s6561_s19 }
0x1b2d   :  { %1963 = vrot.lane.b32.xlu1 %v1961_v28, %s6561_s19 }
0x1b9e   :  { %v1848_v35 = vpop.permute.xlu0 %1847 }
0x1b9f   :  { %v1964_v36 = vpop.permute.xlu1 %1963  ;;  %v7181_v37 = vadd.f32 %v1848_v35, %v1840_v33 }
0x1ba0   :  { %v7183_v38 = vadd.f32 %v1964_v36, %v1956_v34 }
0x1ba1   :  { %6394 = vtanh.f32 %v7181_v37 }
0x1ba2   :  { %6396 = vtanh.f32 %v7183_v38 }
0x1bab   :  { %v6395_v40 = vpop.eup %6394 }
0x1bac   :  { %v6397_v41 = vpop.eup %6396  ;;  %1853 = vrot.lane.b32.xlu0 %v6395_v40, %s6560_s18 }
0x1bad   :  { %1969 = vrot.lane.b32.xlu1 %v6397_v41, %s6560_s18 }
0x1c1e   :  { %v1854_v44 = vpop.permute.xlu0 %1853 }
0x1c1f   :  { %v1970_v39 = vpop.permute.xlu1 %1969  ;;  %v1856_v45 = vmul.f32 %v1854_v44, %v1839_v15 }
0x1c20   :  { %v1972_v42 = vmul.f32 %v1970_v39, %v1955_v25 }
0x1c21   :  { %v1897_v48 = vpack.c.bf16 %v1856_v45, %v1856_v45 }
0x1c22   :  { %v1973_v46 = vpack.c.bf16 %v1972_v42, %v1972_v42 }
0x1c23   :  { %1899 = vrot.lane.b32.xlu0 %v1897_v48, %s6561_s19 }
0x1c24   :  { %1975 = vrot.lane.b32.xlu1 %v1973_v46, %s6561_s19 }
0x1c95   :  { %v1900_v50 = vpop.permute.xlu0 %1899 }
0x1c96   :  { %v1976_v51 = vpop.permute.xlu1 %1975  ;;  %5842 = vmatmul.mubr.msk.bf16.vlgmr.msra.gmra.mrb[56].mxu0 %vm121_vm4, %v1900_v50 }
0x1c97   :  { %5850 = vmatmul.mubr.msk.bf16.vlgmr.msra.gmra.mrb[56].mxu1 %vm121_vm4, %v1976_v51  ;;  %5854 = vmatpush3.bf16.msra.mxu0 %v7019_v62 }
0x1c98   :  { %5855 = vmatprep.subr.bf16.mxu0 %v6556_v2  ;;  %5857 = vmatprep.mubr.msk.bf16.mxu0 %vm6557_vm0, %v6556_v2 }
0x1c99   :  { %5862 = vmatpush3.bf16.msra.mxu1 %v7035_v6  ;;  %5865 = vmatprep.mubr.msk.bf16.mxu1 %vm6557_vm0, %v6556_v2 }
0x1c9a   :  { %5863 = vmatprep.subr.bf16.mxu1 %v6556_v2 }
0x1c9b   :  { %5856 = vmatpush3.bf16.msra.mxu0 %v7028_v4 }
0x1c9c   :  { %5869 = vmatprep.subr.bf16.mxu0 %v6556_v2 }
0x1c9d   :  { %5864 = vmatpush3.bf16.msra.mxu1 %v7054_v7 }
0x1c9e   :  { %5858 = vmatmul.mubr.msk.bf16.vlgmr.msra.gmra.mrb[60].mxu0 %vm121_vm4, %v1976_v51  ;;  %5877 = vmatprep.subr.bf16.mxu1 %v6556_v2  ;;  %v5285_v51 = vld [vmem:[%s7954_s17 + $0x58] sm:$0xff]  ;;  %s3183_s17 = ssub.f32 1.0, %s3105_s0 }
0x1c9f   :  { %5870 = vmatpush3.bf16.msra.mxu0 %v7046_v63  ;;  %5873 = vmatprep.mubr.msk.bf16.mxu0 %vm6557_vm0, %v6556_v2 }
0x1ca0   :  { %5871 = vmatprep.subr.bf16.mxu0 %v6556_v2 }
0x1ca3   :  { %5872 = vmatpush3.bf16.msra.mxu0 %v7062_v5 }
0x1ca4   :  { %5885 = vmatprep.subr.bf16.mxu0 %v6556_v2 }
0x1d69   :  { %v1938_v49 = vpop.f32.mrb[56].mxu0 }
0x1d6a   :  { %v2014_v53 = vpop.f32.mrb[56].mxu1  ;;  %v5843_v47 = vpop.f32.mrb[57].mxu0 }
0x1d6b   :  { %v2015_v52 = vadd.f32 %v2014_v53, %v1938_v49  ;;  %v5851_v54 = vpop.f32.mrb[57].mxu1  ;;  %v1941_v55 = vpop.f32.mrb[58].mxu0 }
0x1d6c   :  { %v2017_v56 = vpop.f32.mrb[58].mxu1  ;;  %v5844_v57 = vpop.f32.mrb[59].mxu0 }
0x1d6d   :  { %v2020_v58 = vadd.f32 %v7116_v16, %v2015_v52  ;;  %v5852_v59 = vpop.f32.mrb[59].mxu1 }
0x1d6f   :  { %v2021_v60 = vmul.f32 %v2020_v58, %v6685_v10 }
0x1d71   :  { %v5276_v0 = vmul.f32 -1.442695, %v2021_v60  ;;  %v2081_v12 = vpop.f32.mrb[60].mxu0 }
0x1d72   :  { %v2136_v8 = vadd.f32 %v5279_v61, %v2081_v12  ;;  %v5859_v13 = vpop.f32.mrb[61].mxu0 }
0x1d73   :  { %6398 = vpow2.f32 %v5276_v0  ;;  %v2084_v1 = vpop.f32.mrb[62].mxu0 }
0x1d74   :  { %v2137_v3 = vmul.f32 %v2136_v8, %v6685_v10  ;;  %v5860_v29 = vpop.f32.mrb[63].mxu0 }
0x1d76   :  { %v5280_v11 = vmul.f32 -1.442695, %v2137_v3 }
0x1d78   :  { %6400 = vpow2.f32 %v5280_v11 }
0x1d7d   :  { %v6399_v31 = vpop.eup %6398 }
0x1d7e   :  { %v2025_v17 = vadd.f32 1.0, %v6399_v31 }
0x1d80   :  { %6402 = vrcp.f32 %v2025_v17 }
0x1d82   :  { %v6401_v9 = vpop.eup %6400 }
0x1d83   :  { %v2141_v14 = vadd.f32 1.0, %v6401_v9 }
0x1d85   :  { %6404 = vrcp.f32 %v2141_v14 }
0x1d8a   :  { %v6403_v19 = vpop.eup %6402 }
0x1d8b   :  { %v2028_v30 = vmul.f32 %v6403_v19, %v6685_v10 }
0x1d8d   :  { %v2029_v18 = vadd.f32 %v2028_v30, %v6691_v21 }
0x1d8f   :  { %v6405_v20 = vpop.eup %6404  ;;  %2032 = vrot.lane.b32.xlu0 %v2029_v18, %s6560_s18  ;;  %v2030_v26 = vmul.f32 %v2029_v18, %v7181_v37 }
0x1d90   :  { %v2144_v32 = vmul.f32 %v6405_v20, %v6685_v10 }
0x1d92   :  { %v2145_v22 = vadd.f32 %v2144_v32, %v6691_v21 }
0x1d94   :  { %2148 = vrot.lane.b32.xlu1 %v2145_v22, %s6560_s18  ;;  %v2146_v28 = vmul.f32 %v2145_v22, %v7183_v38 }
0x1e01   :  { %v2033_v23 = vpop.permute.xlu0 %2032 }
0x1e02   :  { %v2035_v24 = vmul.f32 %v2033_v23, %v2029_v18 }
0x1e04   :  { %2037 = vrot.lane.b32.xlu0 %v2035_v24, %s6561_s19 }
0x1e06   :  { %v2149_v15 = vpop.permute.xlu1 %2148 }
0x1e07   :  { %v2151_v25 = vmul.f32 %v2149_v15, %v2145_v22 }
0x1e09   :  { %2153 = vrot.lane.b32.xlu1 %v2151_v25, %s6561_s19 }
0x1e76   :  { %v2038_v27 = vpop.permute.xlu0 %2037 }
0x1e77   :  { %v7227_v43 = vadd.f32 %v2038_v27, %v2030_v26 }
0x1e79   :  { %6406 = vtanh.f32 %v7227_v43 }
0x1e7b   :  { %v2154_v33 = vpop.permute.xlu1 %2153 }
0x1e7c   :  { %v7231_v34 = vadd.f32 %v2154_v33, %v2146_v28  ;;  %v7288_v33 = vld [vmem:[%s7942_s9] sm:$0xff]  }
0x1e7e   :  { %6408 = vtanh.f32 %v7231_v34 }
0x1e83   :  { %v6407_v35 = vpop.eup %6406 }
0x1e84   :  { %2043 = vrot.lane.b32.xlu0 %v6407_v35, %s6560_s18 }
0x1e88   :  { %v6409_v36 = vpop.eup %6408 }
0x1e89   :  { %2159 = vrot.lane.b32.xlu1 %v6409_v36, %s6560_s18  ;;  %v7296_v36 = vld [vmem:[%s7942_s9 + $0x8] sm:$0xff]  }
0x1ef6   :  { %v2044_v40 = vpop.permute.xlu0 %2043 }
0x1ef7   :  { %v2046_v37 = vmul.f32 %v2044_v40, %v2029_v18 }
0x1ef9   :  { %v2087_v41 = vpack.c.bf16 %v2046_v37, %v2046_v37 }
0x1efb   :  { %2089 = vrot.lane.b32.xlu0 %v2087_v41, %s6561_s19  ;;  %v2160_v44 = vpop.permute.xlu1 %2159 }
0x1efc   :  { %v2162_v39 = vmul.f32 %v2160_v44, %v2145_v22 }
0x1efe   :  { %v2163_v45 = vpack.c.bf16 %v2162_v39, %v2162_v39 }
0x1f00   :  { %2165 = vrot.lane.b32.xlu1 %v2163_v45, %s6561_s19 }
0x1f6d   :  { %v2090_v38 = vpop.permute.xlu0 %2089 }
0x1f6e   :  { %5866 = vmatmul.mubr.msk.bf16.vlgmr.msra.gmra.mrb[60].mxu1 %vm121_vm4, %v2090_v38 }
0x1f6f   :  { %5878 = vmatpush3.bf16.msra.mxu1 %v7019_v62  ;;  %5881 = vmatprep.mubr.msk.bf16.mxu1 %vm6557_vm0, %v6556_v2 }
0x1f70   :  { %5879 = vmatprep.subr.bf16.mxu1 %v6556_v2 }
0x1f72   :  { %v2166_v42 = vpop.permute.xlu1 %2165 }
0x1f73   :  { %5880 = vmatpush3.bf16.msra.mxu1 %v7028_v4  ;;  %5874 = vmatmul.mubr.msk.bf16.vlgmr.msra.gmra.mrb[64].mxu0 %vm121_vm4, %v2166_v42 }
0x1f74   :  { %5886 = vmatpush3.bf16.msra.mxu0 %v7035_v6  ;;  %5893 = vmatprep.subr.bf16.mxu1 %v6556_v2 }
0x1f75   :  { %5887 = vmatprep.subr.bf16.mxu0 %v6556_v2  ;;  %5889 = vmatprep.mubr.msk.bf16.mxu0 %vm6557_vm0, %v6556_v2 }
0x1f76   :  { %5882 = vmatmul.mubr.msk.bf16.vlgmr.msra.gmra.mrb[64].mxu1 %vm121_vm4, %v2166_v42 }
0x1f77   :  { %5894 = vmatpush3.bf16.msra.mxu1 %v7046_v63  ;;  %5897 = vmatprep.mubr.msk.bf16.mxu1 %vm6557_vm0, %v6556_v2 }
0x1f78   :  { %5888 = vmatpush3.bf16.msra.mxu0 %v7054_v7  ;;  %5895 = vmatprep.subr.bf16.mxu1 %v6556_v2 }
0x1f79   :  { %5901 = vmatprep.subr.bf16.mxu0 %v6556_v2 }
0x1f7b   :  { %5896 = vmatpush3.bf16.msra.mxu1 %v7062_v5 }
0x1f7c   :  { %5909 = vmatprep.subr.bf16.mxu1 %v6556_v2 }
0x2041   :  { %v2128_v62 = vpop.f32.mrb[60].mxu1 }
0x2042   :  { %v5867_v4 = vpop.f32.mrb[61].mxu1 }
0x2043   :  { %v2131_v6 = vpop.f32.mrb[62].mxu1 }
0x2044   :  { %v5868_v48 = vpop.f32.mrb[63].mxu1 }
0x2045   :  { %v2427_v48 = vld [vmem:[%s7934_s1] sm:$0xff] }
0x2046   :  { %v2204_v46 = vpop.f32.mrb[64].mxu0 }
0x2047   :  { %v2205_v50 = vadd.f32 %v2204_v46, %v2128_v62  ;;  %v5875_v63 = vpop.f32.mrb[65].mxu0 }
0x2048   :  { %v2207_v7 = vpop.f32.mrb[66].mxu0 }
0x2049   :  { %v2210_v49 = vadd.f32 %v7116_v16, %v2205_v50  ;;  %v2271_v53 = vpop.f32.mrb[64].mxu1  ;;  %v5876_v47 = vpop.f32.mrb[67].mxu0  ;;  %v7316_v50 = vld [vmem:[%s7943_s10] ss:$0 sm:$0xff] }
0x204a   :  { %v2326_v52 = vadd.f32 %v5285_v51, %v2271_v53  ;;  %v5883_v5 = vpop.f32.mrb[65].mxu1 }
0x204b   :  { %v2211_v54 = vmul.f32 %v2210_v49, %v6685_v10  ;;  %v2274_v55 = vpop.f32.mrb[66].mxu1 }
0x204c   :  { %v2327_v56 = vmul.f32 %v2326_v52, %v6685_v10  ;;  %v5884_v57 = vpop.f32.mrb[67].mxu1 }
0x204d   :  { %v5282_v58 = vmul.f32 -1.442695, %v2211_v54 }
0x204e   :  { %v5286_v59 = vmul.f32 -1.442695, %v2327_v56 }
0x204f   :  { %6410 = vpow2.f32 %v5282_v58 }
0x2050   :  { %6412 = vpow2.f32 %v5286_v59 }
0x2059   :  { %v6411_v60 = vpop.eup %6410 }
0x205a   :  { %v6413_v61 = vpop.eup %6412  ;;  %v2215_v0 = vadd.f32 1.0, %v6411_v60 }
0x205b   :  { %v2331_v12 = vadd.f32 1.0, %v6413_v61 }
0x205c   :  { %6414 = vrcp.f32 %v2215_v0 }
0x205d   :  { %6416 = vrcp.f32 %v2331_v12 }
0x2066   :  { %v6415_v8 = vpop.eup %6414 }
0x2067   :  { %v6417_v13 = vpop.eup %6416  ;;  %v2218_v1 = vmul.f32 %v6415_v8, %v6685_v10 }
0x2068   :  { %v2334_v3 = vmul.f32 %v6417_v13, %v6685_v10 }
0x2069   :  { %v2219_v29 = vadd.f32 %v2218_v1, %v6691_v21 }
0x206a   :  { %v2335_v11 = vadd.f32 %v2334_v3, %v6691_v21 }
0x206b   :  { %2222 = vrot.lane.b32.xlu0 %v2219_v29, %s6560_s18  ;;  %v2220_v19 = vmul.f32 %v2219_v29, %v7227_v43 }
0x206c   :  { %2338 = vrot.lane.b32.xlu1 %v2335_v11, %s6560_s18  ;;  %v2336_v30 = vmul.f32 %v2335_v11, %v7231_v34 }
0x20dd   :  { %v2223_v31 = vpop.permute.xlu0 %2222 }
0x20de   :  { %v2339_v17 = vpop.permute.xlu1 %2338  ;;  %v2225_v9 = vmul.f32 %v2223_v31, %v2219_v29 }
0x20df   :  { %v2341_v14 = vmul.f32 %v2339_v17, %v2335_v11 }
0x20e0   :  { %2227 = vrot.lane.b32.xlu0 %v2225_v9, %s6561_s19 }
0x20e1   :  { %2343 = vrot.lane.b32.xlu1 %v2341_v14, %s6561_s19  ;;  %v7339_v14 = vld [vmem:[%s7945_s12] sm:$0xff]  }
0x2152   :  { %v2228_v18 = vpop.permute.xlu0 %2227 }
0x2153   :  { %v2344_v20 = vpop.permute.xlu1 %2343  ;;  %v7275_v32 = vadd.f32 %v2228_v18, %v2220_v19 }
0x2154   :  { %v7277_v22 = vadd.f32 %v2344_v20, %v2336_v30  ;;  %v7346_v30 = vld [vmem:[%s7945_s12 + $0x8] sm:$0xff]   ;;  %v7354_v20 = vld [vmem:[%s7944_s11] sm:$0xff]  }
0x2155   :  { %6418 = vtanh.f32 %v7275_v32 }
0x2156   :  { %6420 = vtanh.f32 %v7277_v22 }
0x215f   :  { %v6419_v23 = vpop.eup %6418 }
0x2160   :  { %v6421_v24 = vpop.eup %6420  ;;  %2233 = vrot.lane.b32.xlu0 %v6419_v23, %s6560_s18 }
0x2161   :  { %2349 = vrot.lane.b32.xlu1 %v6421_v24, %s6560_s18 }
0x21d2   :  { %v2234_v15 = vpop.permute.xlu0 %2233 }
0x21d3   :  { %v2350_v25 = vpop.permute.xlu1 %2349  ;;  %v2236_v26 = vmul.f32 %v2234_v15, %v2219_v29 }
0x21d4   :  { %v2352_v27 = vmul.f32 %v2350_v25, %v2335_v11 }
0x21d5   :  { %v2277_v43 = vpack.c.bf16 %v2236_v26, %v2236_v26 }
0x21d6   :  { %v2353_v28 = vpack.c.bf16 %v2352_v27, %v2352_v27 }
0x21d7   :  { %2279 = vrot.lane.b32.xlu0 %v2277_v43, %s6561_s19 }
0x21d8   :  { %2355 = vrot.lane.b32.xlu1 %v2353_v28, %s6561_s19 }
0x2249   :  { %v2280_v34 = vpop.permute.xlu0 %2279 }
0x224a   :  { %v2356_v35 = vpop.permute.xlu1 %2355  ;;  %5890 = vmatmul.mubr.msk.bf16.vlgmr.msra.gmra.mrb[68].mxu0 %vm121_vm4, %v2280_v34 }
0x224b   :  { %5898 = vmatmul.mubr.msk.bf16.vlgmr.msra.gmra.mrb[68].mxu1 %vm121_vm4, %v2356_v35  ;;  %5902 = vmatpush3.bf16.msra.mxu0 %v7288_v33 }
0x224c   :  { %5903 = vmatprep.subr.bf16.mxu0 %v6556_v2  ;;  %5905 = vmatprep.mubr.msk.bf16.mxu0 %vm6557_vm0, %v6556_v2 }
0x224d   :  { %5913 = vmatprep.mubr.msk.bf16.mxu1 %vm6557_vm0, %v6556_v2  ;;  %5910 = vmatpush3.bf16.msra.mxu1 %v7339_v14 }
0x224e   :  { %5911 = vmatprep.subr.bf16.mxu1 %v6556_v2 }
0x224f   :  { %5904 = vmatpush3.bf16.msra.mxu0 %v7296_v36 }
0x2250   :  { %5917 = vmatprep.subr.bf16.mxu0 %v6556_v2 }
0x2251   :  { %5912 = vmatpush3.bf16.msra.mxu1 %v7346_v30 }
0x2252   :  { %5906 = vmatmul.mubr.msk.bf16.vlgmr.msra.gmra.mrb[72].mxu0 %vm121_vm4, %v2356_v35 }
0x2253   :  { %5921 = vmatprep.mubr.msk.bf16.mxu0 %vm6557_vm0, %v6556_v2  ;;  %5918 = vmatpush3.bf16.msra.mxu0 %v7354_v20 }
0x2254   :  { %5919 = vmatprep.subr.bf16.mxu0 %v6556_v2 }
0x231d   :  { %v2318_v40 = vpop.f32.mrb[68].mxu0 }
0x231e   :  { %v2394_v37 = vpop.f32.mrb[68].mxu1  ;;  %v5891_v41 = vpop.f32.mrb[69].mxu0 }
0x231f   :  { %v2395_v44 = vadd.f32 %v2394_v37, %v2318_v40  ;;  %v5899_v39 = vpop.f32.mrb[69].mxu1  ;;  %v2321_v45 = vpop.f32.mrb[70].mxu0  ;;  %v7387_v37 = vld [vmem:[%s7946_s13] ss:$0 sm:$0xff] }
0x2320   :  { %v2397_v38 = vpop.f32.mrb[70].mxu1  ;;  %v5892_v42 = vpop.f32.mrb[71].mxu0 }
0x2321   :  { %v2400_v62 = vadd.f32 %v7116_v16, %v2395_v44  ;;  %v5900_v4 = vpop.f32.mrb[71].mxu1 }
0x2323   :  { %v2401_v6 = vmul.f32 %v2400_v62, %v6685_v10 }
0x2325   :  { %v5288_v46 = vmul.f32 -1.442695, %v2401_v6  ;;  %v2474_v63 = vpop.f32.mrb[72].mxu0 }
0x2326   :  { %v2539_v51 = vadd.f32 %v2474_v63, %v2427_v48  ;;  %v5907_v7 = vpop.f32.mrb[73].mxu0 }
0x2327   :  { %6422 = vpow2.f32 %v5288_v46  ;;  %v2477_v49 = vpop.f32.mrb[74].mxu0 }
0x2328   :  { %v2546_v16 = vadd.f32 %v7316_v50, %v2539_v51  ;;  %v5908_v53 = vpop.f32.mrb[75].mxu0 }
0x232a   :  { %v2547_v47 = vmul.f32 %v2546_v16, %v6685_v10 }
0x232c   :  { %v5296_v52 = vmul.f32 -1.442695, %v2547_v47 }
0x232e   :  { %6424 = vpow2.f32 %v5296_v52 }
0x2331   :  { %v6423_v5 = vpop.eup %6422 }
0x2332   :  { %v2405_v54 = vadd.f32 1.0, %v6423_v5 }
0x2334   :  { %6426 = vrcp.f32 %v2405_v54 }
0x2338   :  { %v6425_v55 = vpop.eup %6424 }
0x2339   :  { %v2551_v56 = vadd.f32 1.0, %v6425_v55 }
0x233b   :  { %6428 = vrcp.f32 %v2551_v56  ;;  %v104_v56 = vld [vmem:[%s7947_s14] sm:$0xff] }
0x233e   :  { %v6427_v57 = vpop.eup %6426 }
0x233f   :  { %v2408_v58 = vmul.f32 %v6427_v57, %v6685_v10  ;;  %v105_v57 = vld [vmem:[%s7947_s14 + $0x8] sm:$0xff] }
0x2341   :  { %v2409_v59 = vadd.f32 %v2408_v58, %v6691_v21  ;;  %v106_v58 = vld [vmem:[%s7947_s14 + $0x10] sm:$0xff] }
0x2343   :  { %2412 = vrot.lane.b32.xlu0 %v2409_v59, %s6560_s18  ;;  %v2410_v3 = vmul.f32 %v2409_v59, %v7275_v32  ;;  %v7360_v32 = vld [vmem:[%s7944_s11 + $0x8] sm:$0xff]  }
0x2344   :  { %5920 = vmatpush3.bf16.msra.mxu0 %v7360_v32 }
0x2345   :  { %v6429_v60 = vpop.eup %6428  ;;  %5941 = vmatprep.subr.bf16.mxu0 %v6556_v2 }
0x2346   :  { %v2554_v61 = vmul.f32 %v6429_v60, %v6685_v10  ;;  %v7411_v60 = vpack.c.bf16 %v105_v57, %v104_v56 }
0x2348   :  { %v2555_v0 = vadd.f32 %v2554_v61, %v6691_v21  ;;  %v107_v61 = vld [vmem:[%s7947_s14 + $0x18] sm:$0xff]  ;;  %s3534_s14 = ssub.f32 1.0, %s3456_s6 }
0x234a   :  { %2558 = vrot.lane.b32.xlu1 %v2555_v0, %s6560_s18  ;;  %v2556_v31 = vmul.f32 %v2555_v0, %v7277_v22 }
0x23b5   :  { %v2413_v12 = vpop.permute.xlu0 %2412 }
0x23b6   :  { %v2415_v8 = vmul.f32 %v2413_v12, %v2409_v59 }
0x23b8   :  { %2417 = vrot.lane.b32.xlu0 %v2415_v8, %s6561_s19 }
0x23bc   :  { %v2559_v13 = vpop.permute.xlu1 %2558 }
0x23bd   :  { %v2561_v1 = vmul.f32 %v2559_v13, %v2555_v0 }
0x23bf   :  { %2563 = vrot.lane.b32.xlu1 %v2561_v1, %s6561_s19  ;;  %v7427_v1 = vld [vmem:[%s7941_s8] sm:$0x1] }
0x242a   :  { %v2418_v29 = vpop.permute.xlu0 %2417 }
0x242b   :  { %v7329_v11 = vadd.f32 %v2418_v29, %v2410_v3  ;;  %v7435_v29 = vld [vmem:[#allocation2] ss:$0 sm:$0xff] }
0x242d   :  { %6430 = vtanh.f32 %v7329_v11 }
0x2431   :  { %v2564_v17 = vpop.permute.xlu1 %2563 }
0x2432   :  { %v7333_v9 = vadd.f32 %v2564_v17, %v2556_v31 }
0x2434   :  { %6432 = vtanh.f32 %v7333_v9 }
0x2437   :  { %v6431_v19 = vpop.eup %6430 }
0x2438   :  { %2423 = vrot.lane.b32.xlu0 %v6431_v19, %s6560_s18  ;;  %v2829_v19 = vld [vmem:[%s7935_s2] sm:$0xff] }
0x243e   :  { %v6433_v18 = vpop.eup %6432 }
0x243f   :  { %2569 = vrot.lane.b32.xlu1 %v6433_v18, %s6560_s18  ;;  %v2830_v18 = vstv %s2751_s26 }
0x24aa   :  { %v2424_v22 = vpop.permute.xlu0 %2423 }
0x24ab   :  { %v2426_v23 = vmul.f32 %v2424_v22, %v2409_v59  ;;  %v6562_v59 = vmov 0.0|0.0   ;;  %v2833_v22 = vstv %s2832_s27  ;;  %s5335_s27 = sld [smem:[#allocation3 + $0x3]] }
0x24ac   :  { %6216 = vmatprep.subr.bf16.mxu1 %v6562_v59 }
0x24ad   :  { %v2480_v24 = vpack.c.bf16 %v2426_v23, %v2426_v23  ;;  %v2831_v23 = vmul.f32 %v2830_v18, %v2829_v19 }
0x24af   :  { %2482 = vrot.lane.b32.xlu0 %v2480_v24, %s6561_s19 }
0x24b1   :  { %v2570_v15 = vpop.permute.xlu1 %2569  ;;  %p3805_p8 = scmp.ne.s32.totalorder %s5335_s27, 0 }
0x24b2   :  { %v2572_v25 = vmul.f32 %v2570_v15, %v2555_v0  ;;  %v7417_v0 = vpack.c.bf16 %v107_v61, %v106_v58 }
0x24b3   :  { %s3806_s15 = scalar_select %p3805_p8, 1, 0 }
0x24b4   :  { %v2573_v26 = vpack.c.bf16 %v2572_v25, %v2572_v25 }
0x24b5   :  { %s3807_s7 = scvt.s32.f32 %s3806_s15 }
0x24b6   :  { %2575 = vrot.lane.b32.xlu1 %v2573_v26, %s6561_s19 }
0x24b7   :  { %s3885_s28 = ssub.f32 1.0, %s3807_s7 }
0x2521   :  { %v2483_v27 = vpop.permute.xlu0 %2482 }
0x2522   :  { %5914 = vmatmul.mubr.msk.bf16.vlgmr.msra.gmra.mrb[72].mxu1 %vm121_vm4, %v2483_v27 }
0x2523   :  { %5933 = vmatprep.mubr.msk.f32.mxu1 %vm6557_vm0, %v6556_v2  ;;  %6218 = vmatpush3.bf16.msra.mxu1 %v7411_v60 }
0x2524   :  { %6219 = vmatprep.subr.bf16.mxu1 %v6562_v59 }
0x2527   :  { %6221 = vmatpush3.bf16.msra.mxu1 %v7417_v0 }
0x2528   :  { %v2576_v43 = vpop.permute.xlu1 %2575  ;;  %5936 = vmatprep.subr.mxu1 %v6556_v2 }
0x2529   :  { %5922 = vmatmul.mubr.msk.bf16.vlgmr.msra.gmra.mrb[76].mxu0 %vm121_vm4, %v2576_v43 }
0x252a   :  { %5942 = vmatpush3.bf16.msra.mxu0 %v7288_v33  ;;  %5945 = vmatprep.mubr.msk.bf16.mxu0 %vm6557_vm0, %v6556_v2 }
0x252b   :  { %5943 = vmatprep.subr.bf16.mxu0 %v6556_v2 }
0x252e   :  { %5944 = vmatpush3.bf16.msra.mxu0 %v7296_v36 }
0x252f   :  { %5957 = vmatprep.subr.bf16.mxu0 %v6556_v2 }
0x2531   :  { %5946 = vmatmul.mubr.msk.bf16.vlgmr.msra.gmra.mrb[80].mxu0 %vm121_vm4, %v2576_v43 }
0x2532   :  { %5958 = vmatpush3.bf16.msra.mxu0 %v7354_v20  ;;  %5961 = vmatprep.mubr.msk.bf16.mxu0 %vm6557_vm0, %v6556_v2 }
0x2533   :  { %5959 = vmatprep.subr.bf16.mxu0 %v6556_v2 }
0x2536   :  { %5960 = vmatpush3.bf16.msra.mxu0 %v7360_v32 }
0x2537   :  { %5976 = vmatprep.subr.mxu0 %v6556_v2 }
0x25f5   :  { %v2533_v28 = vpop.f32.mrb[72].mxu1 }
0x25f6   :  { %v5915_v34 = vpop.f32.mrb[73].mxu1 }
0x25f7   :  { %v2536_v35 = vpop.f32.mrb[74].mxu1 }
0x25f8   :  { %v5916_v40 = vpop.f32.mrb[75].mxu1 }
0x25fc   :  { %v2626_v41 = vpop.f32.mrb[76].mxu0 }
0x25fd   :  { %v2627_v44 = vadd.f32 %v2626_v41, %v2533_v28  ;;  %v5923_v39 = vpop.f32.mrb[77].mxu0 }
0x25fe   :  { %v2629_v45 = vpop.f32.mrb[78].mxu0 }
0x25ff   :  { %v2638_v38 = vadd.f32 %v7387_v37, %v2627_v44  ;;  %v5924_v42 = vpop.f32.mrb[79].mxu0 }
0x2601   :  { %v2639_v62 = vmul.f32 %v2638_v38, %v6685_v10 }
0x2603   :  { %v5301_v4 = vmul.f32 -1.442695, %v2639_v62 }
0x2604   :  { %v7391_v6 = vpop.f32.mrb[80].mxu0 }
0x2605   :  { %6434 = vpow2.f32 %v5301_v4  ;;  %v5947_v48 = vpop.f32.mrb[81].mxu0 }
0x2606   :  { %v2873_v46 = vpop.f32.mrb[82].mxu0 }
0x2607   :  { %v5948_v63 = vpop.f32.mrb[83].mxu0 }
0x260f   :  { %v6435_v51 = vpop.eup %6434 }
0x2610   :  { %v2643_v7 = vadd.f32 1.0, %v6435_v51 }
0x2612   :  { %6436 = vrcp.f32 %v2643_v7 }
0x261c   :  { %v6437_v49 = vpop.eup %6436 }
0x261d   :  { %v2646_v16 = vmul.f32 %v6437_v49, %v6685_v10 }
0x261f   :  { %v2647_v53 = vadd.f32 %v2646_v16, %v6691_v21 }
0x2621   :  { %2650 = vrot.lane.b32.xlu0 %v2647_v53, %s6560_s18  ;;  %v2648_v5 = vmul.f32 %v2647_v53, %v7329_v11 }
0x2693   :  { %v2651_v47 = vpop.permute.xlu0 %2650 }
0x2694   :  { %v2653_v52 = vmul.f32 %v2651_v47, %v2647_v53 }
0x2696   :  { %2655 = vrot.lane.b32.xlu1 %v2653_v52, %s6561_s19 }
0x2708   :  { %v2656_v54 = vpop.permute.xlu1 %2655 }
0x2709   :  { %v7398_v55 = vadd.f32 %v2656_v54, %v2648_v5 }
0x270b   :  { %6438 = vtanh.f32 %v7398_v55 }
0x2715   :  { %v6439_v12 = vpop.eup %6438 }
0x2716   :  { %2661 = vrot.lane.b32.xlu0 %v6439_v12, %s6560_s18 }
0x2788   :  { %v2662_v8 = vpop.permute.xlu0 %2661 }
0x2789   :  { %v2664_v13 = vmul.f32 %v2662_v8, %v2647_v53 }
0x278b   :  { %2672 = vrot.lane.b32.xlu1 %v2664_v13, %s6561_s19  ;;  %v2876_v42 = vpack.c.bf16 %v2664_v13, %v2664_v13 }
0x27fd   :  { %v2673_v3 = vpop.permute.xlu1 %2672 }
0x27fe   :  { %5934 = vmatmul.mubr.msk.f32.vlgmr.msra.gmra.mrb[76].mxu1 %vm121_vm4, %v2673_v3 }
0x27ff   :  { %5937 = vmatpush3.msk.msra.mxu1 %vm2755_vm5, %v7427_v1  ;;  %5938 = vmatprep.mubr.msk.f32.mxu1 %vm6557_vm0, %v6556_v2 }
0x2800   :  { %5949 = vmatprep.subr.bf16.mxu1 %v6556_v2 }
0x28d1   :  { %v2742_v11 = vpop.f32.mrb[76].mxu1 }
0x28d2   :  { %v2743_v31 = vadd.f32 %v7435_v29, %v2742_v11  ;;  %v5935_v17 = vpop.f32.mrb[77].mxu1 }
0x28d4   :  { %2747 = vst.msk [vmem:[%s7949_s16] sm:$0xff] %vm2746_vm6, %v2743_v31  ;;  %5939 = vmatmul.mubr.msk.f32.vlgmr.msra.gmra.mrb[78].mxu1 %vm2746_vm6, %v2743_v31 }
0x28d5   :  { %5950 = vmatpush3.bf16.msra.mxu1 %v7339_v14  ;;  %5953 = vmatprep.mubr.msk.bf16.mxu1 %vm6557_vm0, %v6556_v2 }
0x28d6   :  { %5951 = vmatprep.subr.bf16.mxu1 %v6556_v2 }
0x28d9   :  { %5952 = vmatpush3.bf16.msra.mxu1 %v7346_v30 }
0x28da   :  { %6222 = vmatprep.subr.bf16.mxu1 %v6562_v59 }
0x29a7   :  { %v2825_v24 = vpop.f32.mrb[78].mxu1 }
0x29a8   :  { %v2834_v15 = vmul.f32 %v2833_v22, %v2825_v24  ;;  %v5940_v25 = vpop.f32.mrb[79].mxu1 }
0x29aa   :  { %v2835_v26 = vadd.f32 %v2834_v15, %v2831_v23 }
0x29ac   :  { %v2923_v27 = vadd.f32 %v7391_v6, %v2835_v26 }
0x29ae   :  { %v2924_v43 = vadd.f32 %v7316_v50, %v2923_v27 }
0x29b0   :  { %v2925_v28 = vmul.f32 %v2924_v43, %v6685_v10 }
0x29b2   :  { %v5308_v34 = vmul.f32 -1.442695, %v2925_v28 }
0x29b4   :  { %6440 = vpow2.f32 %v5308_v34 }
0x29be   :  { %v6441_v35 = vpop.eup %6440 }
0x29bf   :  { %v2929_v40 = vadd.f32 1.0, %v6441_v35 }
0x29c1   :  { %6442 = vrcp.f32 %v2929_v40 }
0x29cb   :  { %v6443_v41 = vpop.eup %6442 }
0x29cc   :  { %v2932_v44 = vmul.f32 %v6443_v41, %v6685_v10  ;;  %v5316_v41 = vld [vmem:[%s7935_s2 + $0x8] sm:$0xff] }
0x29ce   :  { %v2933_v39 = vadd.f32 %v2932_v44, %v6691_v21  ;;  %v3181_v44 = vstv %s3105_s0 }
0x29d0   :  { %2936 = vrot.lane.b32.xlu0 %v2933_v39, %s6560_s18  ;;  %v2934_v62 = vmul.f32 %v2933_v39, %v7333_v9 }
0x2a42   :  { %v2937_v45 = vpop.permute.xlu0 %2936 }
0x2a43   :  { %v2939_v38 = vmul.f32 %v2937_v45, %v2933_v39  ;;  %v3182_v45 = vmul.f32 %v5316_v41, %v3181_v44 }
0x2a45   :  { %2941 = vrot.lane.b32.xlu1 %v2939_v38, %s6561_s19 }
0x2a49   :  { %2878 = vrot.lane.b32.xlu1 %v2876_v42, %s6561_s19 }
0x2ab7   :  { %v2942_v4 = vpop.permute.xlu1 %2941 }
0x2ab8   :  { %v7461_v6 = vadd.f32 %v2942_v4, %v2934_v62 }
0x2aba   :  { %6444 = vtanh.f32 %v7461_v6 }
0x2abb   :  { %v2879_v48 = vpop.permute.xlu1 %2878 }
0x2abc   :  { %5954 = vmatmul.mubr.msk.bf16.vlgmr.msra.gmra.mrb[80].mxu1 %vm121_vm4, %v2879_v48 }
0x2abd   :  { %6224 = vmatpush3.bf16.msra.mxu1 %v7411_v60  ;;  %5973 = vmatprep.mubr.msk.f32.mxu1 %vm6557_vm0, %v6556_v2 }
0x2abe   :  { %6225 = vmatprep.subr.bf16.mxu1 %v6562_v59 }
0x2ac1   :  { %6227 = vmatpush3.bf16.msra.mxu1 %v7417_v0 }
0x2ac2   :  { %5981 = vmatprep.subr.bf16.mxu1 %v6556_v2 }
0x2ac4   :  { %v6445_v9 = vpop.eup %6444 }
0x2ac5   :  { %2947 = vrot.lane.b32.xlu0 %v6445_v9, %s6560_s18 }
0x2b37   :  { %v2948_v46 = vpop.permute.xlu0 %2947 }
0x2b38   :  { %v2950_v63 = vmul.f32 %v2948_v46, %v2933_v39  ;;  %v3184_v39 = vstv %s3183_s17 }
0x2b3a   :  { %v2951_v51 = vpack.c.bf16 %v2950_v63, %v2950_v63 }
0x2b3c   :  { %2953 = vrot.lane.b32.xlu0 %v2951_v51, %s6561_s19 }
0x2b8f   :  { %v2917_v7 = vpop.f32.mrb[80].mxu1 }
0x2b90   :  { %v5955_v49 = vpop.f32.mrb[81].mxu1 }
0x2b91   :  { %v2920_v16 = vpop.f32.mrb[82].mxu1 }
0x2b92   :  { %v5956_v53 = vpop.f32.mrb[83].mxu1 }
0x2bae   :  { %v2954_v47 = vpop.permute.xlu0 %2953 }
0x2baf   :  { %5962 = vmatmul.mubr.msk.bf16.vlgmr.msra.gmra.mrb[84].mxu0 %vm121_vm4, %v2954_v47 }
0x2bb0   :  { %5977 = vmatpush3.msk.msra.mxu0 %vm2755_vm5, %v7427_v1  ;;  %5978 = vmatprep.mubr.msk.f32.mxu0 %vm6557_vm0, %v6556_v2 }
0x2bb1   :  { %5989 = vmatprep.subr.bf16.mxu0 %v6556_v2 }
0x2c82   :  { %v2992_v52 = vpop.f32.mrb[84].mxu0 }
0x2c83   :  { %v2993_v5 = vadd.f32 %v2992_v52, %v2917_v7  ;;  %v5963_v54 = vpop.f32.mrb[85].mxu0 }
0x2c84   :  { %v2995_v56 = vpop.f32.mrb[86].mxu0 }
0x2c85   :  { %v2998_v57 = vadd.f32 %v7387_v37, %v2993_v5  ;;  %v5964_v58 = vpop.f32.mrb[87].mxu0 }
0x2c87   :  { %v2999_v61 = vmul.f32 %v2998_v57, %v6685_v10 }
0x2c89   :  { %v5310_v12 = vmul.f32 -1.442695, %v2999_v61 }
0x2c8b   :  { %6446 = vpow2.f32 %v5310_v12 }
0x2c95   :  { %v6447_v8 = vpop.eup %6446 }
0x2c96   :  { %v3003_v13 = vadd.f32 1.0, %v6447_v8 }
0x2c98   :  { %6448 = vrcp.f32 %v3003_v13 }
0x2ca2   :  { %v6449_v3 = vpop.eup %6448 }
0x2ca3   :  { %v3006_v11 = vmul.f32 %v6449_v3, %v6685_v10 }
0x2ca5   :  { %v3007_v31 = vadd.f32 %v3006_v11, %v6691_v21 }
0x2ca7   :  { %3010 = vrot.lane.b32.xlu1 %v3007_v31, %s6560_s18  ;;  %v3008_v18 = vmul.f32 %v3007_v31, %v7398_v55 }
0x2d19   :  { %v3011_v17 = vpop.permute.xlu1 %3010 }
0x2d1a   :  { %v3013_v19 = vmul.f32 %v3011_v17, %v3007_v31 }
0x2d1c   :  { %3015 = vrot.lane.b32.xlu0 %v3013_v19, %s6561_s19 }
0x2d8e   :  { %v3016_v22 = vpop.permute.xlu0 %3015 }
0x2d8f   :  { %v7486_v23 = vadd.f32 %v3016_v22, %v3008_v18 }
0x2d91   :  { %6450 = vtanh.f32 %v7486_v23 }
0x2d9b   :  { %v6451_v24 = vpop.eup %6450 }
0x2d9c   :  { %3021 = vrot.lane.b32.xlu1 %v6451_v24, %s6560_s18 }
0x2e0e   :  { %v3022_v15 = vpop.permute.xlu1 %3021 }
0x2e0f   :  { %v3024_v25 = vmul.f32 %v3022_v15, %v3007_v31 }
0x2e11   :  { %3026 = vrot.lane.b32.xlu0 %v3024_v25, %s6561_s19  ;;  %v3227_v5 = vpack.c.bf16 %v3024_v25, %v3024_v25 }
0x2e83   :  { %v3027_v26 = vpop.permute.xlu0 %3026 }
0x2e84   :  { %5974 = vmatmul.mubr.msk.f32.vlgmr.msra.gmra.mrb[84].mxu1 %vm121_vm4, %v3027_v26 }
0x2e85   :  { %5982 = vmatpush3.bf16.msra.mxu1 %v7288_v33  ;;  %5985 = vmatprep.mubr.msk.bf16.mxu1 %vm6557_vm0, %v6556_v2 }
0x2e86   :  { %5983 = vmatprep.subr.bf16.mxu1 %v6556_v2 }
0x2e89   :  { %5984 = vmatpush3.bf16.msra.mxu1 %v7296_v36 }
0x2e8a   :  { %5997 = vmatprep.subr.bf16.mxu1 %v6556_v2 }
0x2e8c   :  { %5986 = vmatmul.mubr.msk.bf16.vlgmr.msra.gmra.mrb[88].mxu1 %vm121_vm4, %v2954_v47 }
0x2e8d   :  { %5998 = vmatpush3.bf16.msra.mxu1 %v7354_v20  ;;  %6001 = vmatprep.mubr.msk.bf16.mxu1 %vm6557_vm0, %v6556_v2 }
0x2e8e   :  { %5999 = vmatprep.subr.bf16.mxu1 %v6556_v2 }
0x2e91   :  { %6000 = vmatpush3.bf16.msra.mxu1 %v7360_v32 }
0x2e92   :  { %6021 = vmatprep.subr.bf16.mxu1 %v6556_v2 }
0x2f57   :  { %v3096_v55 = vpop.f32.mrb[84].mxu1 }
0x2f58   :  { %v3097_v27 = vadd.f32 %v7435_v29, %v3096_v55  ;;  %v5975_v43 = vpop.f32.mrb[85].mxu1 }
0x2f5a   :  { %5312 = vst.msk [vmem:[%s7949_s16 + $0x8] sm:$0xff] %vm2746_vm6, %v3097_v27  ;;  %5979 = vmatmul.mubr.msk.f32.vlgmr.msra.gmra.mrb[88].mxu0 %vm2746_vm6, %v3097_v27 }
0x2f5b   :  { %5990 = vmatpush3.bf16.msra.mxu0 %v7339_v14  ;;  %5993 = vmatprep.mubr.msk.bf16.mxu0 %vm6557_vm0, %v6556_v2 }
0x2f5c   :  { %5991 = vmatprep.subr.bf16.mxu0 %v6556_v2 }
0x2f5f   :  { %v3221_v28 = vpop.f32.mrb[88].mxu1  ;;  %5992 = vmatpush3.bf16.msra.mxu0 %v7346_v30 }
0x2f60   :  { %v5987_v34 = vpop.f32.mrb[89].mxu1  ;;  %6228 = vmatprep.subr.bf16.mxu0 %v6562_v59 }
0x2f61   :  { %v3224_v35 = vpop.f32.mrb[90].mxu1 }
0x2f62   :  { %v5988_v40 = vpop.f32.mrb[91].mxu1 }
0x302d   :  { %v3175_v38 = vpop.f32.mrb[88].mxu0 }
0x302e   :  { %v3185_v42 = vmul.f32 %v3184_v39, %v3175_v38  ;;  %v5980_v62 = vpop.f32.mrb[89].mxu0 }
0x3030   :  { %v3186_v4 = vadd.f32 %v3185_v42, %v3182_v45 }
0x3032   :  { %v3274_v48 = vadd.f32 %v3221_v28, %v3186_v4 }
0x3034   :  { %v3275_v9 = vadd.f32 %v7316_v50, %v3274_v48 }
0x3036   :  { %v3276_v46 = vmul.f32 %v3275_v9, %v6685_v10 }
0x3038   :  { %v5319_v63 = vmul.f32 -1.442695, %v3276_v46 }
0x303a   :  { %6452 = vpow2.f32 %v5319_v63 }
0x3044   :  { %v6453_v51 = vpop.eup %6452 }
0x3045   :  { %v3280_v7 = vadd.f32 1.0, %v6453_v51 }
0x3047   :  { %6454 = vrcp.f32 %v3280_v7 }
0x3051   :  { %v6455_v49 = vpop.eup %6454 }
0x3052   :  { %v3283_v16 = vmul.f32 %v6455_v49, %v6685_v10  ;;  %v5327_v49 = vld [vmem:[%s7935_s2 + $0x10] sm:$0xff] }
0x3054   :  { %v3284_v53 = vadd.f32 %v3283_v16, %v6691_v21  ;;  %v3532_v16 = vstv %s3456_s6  ;;  %s5346_s6 = sld [smem:[#allocation3 + $0x4]] }
0x3056   :  { %3287 = vrot.lane.b32.xlu1 %v3284_v53, %s6560_s18  ;;  %v3285_v54 = vmul.f32 %v3284_v53, %v7461_v6 }
0x305a   :  { %p4156_p9 = scmp.ne.s32.totalorder %s5346_s6, 0 }
0x305b   :  { %s4859_s6 = scalar_select %p4858_p11, 1, 0 }
0x30c8   :  { %v3288_v47 = vpop.permute.xlu1 %3287 }
0x30c9   :  { %v3290_v52 = vmul.f32 %v3288_v47, %v3284_v53  ;;  %v3533_v47 = vmul.f32 %v5327_v49, %v3532_v16 }
0x30cb   :  { %3292 = vrot.lane.b32.xlu0 %v3290_v52, %s6561_s19 }
0x30cf   :  { %3229 = vrot.lane.b32.xlu0 %v3227_v5, %s6561_s19 }
0x313d   :  { %v3293_v56 = vpop.permute.xlu0 %3292 }
0x313e   :  { %v7528_v57 = vadd.f32 %v3293_v56, %v3285_v54 }
0x3140   :  { %6456 = vtanh.f32 %v7528_v57 }
0x3141   :  { %v3230_v58 = vpop.permute.xlu0 %3229 }
0x3142   :  { %5994 = vmatmul.mubr.msk.bf16.vlgmr.msra.gmra.mrb[92].mxu0 %vm121_vm4, %v3230_v58 }
0x3143   :  { %6230 = vmatpush3.bf16.msra.mxu0 %v7411_v60  ;;  %6013 = vmatprep.mubr.msk.f32.mxu0 %vm6557_vm0, %v6556_v2 }
0x3144   :  { %6231 = vmatprep.subr.bf16.mxu0 %v6562_v59 }
0x3147   :  { %6233 = vmatpush3.bf16.msra.mxu0 %v7417_v0 }
0x3148   :  { %6016 = vmatprep.subr.mxu0 %v6556_v2 }
0x314a   :  { %v6457_v6 = vpop.eup %6456 }
0x314b   :  { %3298 = vrot.lane.b32.xlu1 %v6457_v6, %s6560_s18 }
0x31bd   :  { %v3299_v61 = vpop.permute.xlu1 %3298 }
0x31be   :  { %v3301_v12 = vmul.f32 %v3299_v61, %v3284_v53  ;;  %v3535_v53 = vstv %s3534_s14  ;;  %s4157_s14 = scalar_select %p4156_p9, 1, 0 }
0x31c0   :  { %v3302_v8 = vpack.c.bf16 %v3301_v12, %v3301_v12  ;;  %s4158_s1 = scvt.s32.f32 %s4157_s14  ;;  %s4860_s14 = scvt.s32.f32 %s4859_s6 }
0x31c2   :  { %3304 = vrot.lane.b32.xlu1 %v3302_v8, %s6561_s19  ;;  %s4236_s25 = ssub.f32 1.0, %s4158_s1 }
0x3215   :  { %v3268_v13 = vpop.f32.mrb[92].mxu0 }
0x3216   :  { %v5995_v3 = vpop.f32.mrb[93].mxu0 }
0x3217   :  { %v3271_v11 = vpop.f32.mrb[94].mxu0 }
0x3218   :  { %v5996_v31 = vpop.f32.mrb[95].mxu0 }
0x3234   :  { %v3305_v17 = vpop.permute.xlu1 %3304 }
0x3235   :  { %6002 = vmatmul.mubr.msk.bf16.vlgmr.msra.gmra.mrb[92].mxu1 %vm121_vm4, %v3305_v17 }
0x3236   :  { %6022 = vmatpush3.bf16.msra.mxu1 %v7288_v33  ;;  %6025 = vmatprep.mubr.msk.bf16.mxu1 %vm6557_vm0, %v6556_v2 }
0x3237   :  { %6023 = vmatprep.subr.bf16.mxu1 %v6556_v2 }
0x323a   :  { %6024 = vmatpush3.bf16.msra.mxu1 %v7296_v36 }
0x323b   :  { %6037 = vmatprep.subr.bf16.mxu1 %v6556_v2 }
0x323d   :  { %6026 = vmatmul.mubr.msk.bf16.vlgmr.msra.gmra.mrb[96].mxu1 %vm121_vm4, %v3305_v17 }
0x323e   :  { %6038 = vmatpush3.bf16.msra.mxu1 %v7354_v20  ;;  %6041 = vmatprep.mubr.msk.bf16.mxu1 %vm6557_vm0, %v6556_v2 }
0x323f   :  { %6039 = vmatprep.subr.bf16.mxu1 %v6556_v2 }
0x3242   :  { %6040 = vmatpush3.bf16.msra.mxu1 %v7360_v32 }
0x3243   :  { %6056 = vmatprep.subr.mxu1 %v6556_v2 }
0x3308   :  { %v3343_v19 = vpop.f32.mrb[92].mxu1 }
0x3309   :  { %v3344_v18 = vadd.f32 %v3343_v19, %v3268_v13  ;;  %v6003_v22 = vpop.f32.mrb[93].mxu1 }
0x330a   :  { %v3346_v24 = vpop.f32.mrb[94].mxu1 }
0x330b   :  { %v3349_v15 = vadd.f32 %v7387_v37, %v3344_v18  ;;  %v6004_v25 = vpop.f32.mrb[95].mxu1 }
0x330d   :  { %v3350_v26 = vmul.f32 %v3349_v15, %v6685_v10 }
0x330f   :  { %v5321_v55 = vmul.f32 -1.442695, %v3350_v26 }
0x3310   :  { %v3572_v27 = vpop.f32.mrb[96].mxu1 }
0x3311   :  { %6458 = vpow2.f32 %v5321_v55  ;;  %v6027_v43 = vpop.f32.mrb[97].mxu1 }
0x3312   :  { %v3575_v28 = vpop.f32.mrb[98].mxu1 }
0x3313   :  { %v6028_v34 = vpop.f32.mrb[99].mxu1 }
0x331b   :  { %v6459_v35 = vpop.eup %6458 }
0x331c   :  { %v3354_v40 = vadd.f32 1.0, %v6459_v35 }
0x331e   :  { %6460 = vrcp.f32 %v3354_v40 }
0x3328   :  { %v6461_v41 = vpop.eup %6460 }
0x3329   :  { %v3357_v44 = vmul.f32 %v6461_v41, %v6685_v10 }
0x332b   :  { %v3358_v39 = vadd.f32 %v3357_v44, %v6691_v21 }
0x332d   :  { %3361 = vrot.lane.b32.xlu0 %v3358_v39, %s6560_s18  ;;  %v3359_v42 = vmul.f32 %v3358_v39, %v7486_v23 }
0x339f   :  { %v3362_v45 = vpop.permute.xlu0 %3361 }
0x33a0   :  { %v3364_v38 = vmul.f32 %v3362_v45, %v3358_v39 }
0x33a2   :  { %3366 = vrot.lane.b32.xlu1 %v3364_v38, %s6561_s19 }
0x3414   :  { %v3367_v62 = vpop.permute.xlu1 %3366 }
0x3415   :  { %v7561_v4 = vadd.f32 %v3367_v62, %v3359_v42 }
0x3417   :  { %6462 = vtanh.f32 %v7561_v4 }
0x3421   :  { %v6463_v48 = vpop.eup %6462 }
0x3422   :  { %3372 = vrot.lane.b32.xlu0 %v6463_v48, %s6560_s18 }
0x3494   :  { %v3373_v9 = vpop.permute.xlu0 %3372 }
0x3495   :  { %v3375_v46 = vmul.f32 %v3373_v9, %v3358_v39 }
0x3497   :  { %3377 = vrot.lane.b32.xlu1 %v3375_v46, %s6561_s19  ;;  %v3578_v18 = vpack.c.bf16 %v3375_v46, %v3375_v46 }
0x3509   :  { %v3378_v63 = vpop.permute.xlu1 %3377 }
0x350a   :  { %6014 = vmatmul.mubr.msk.f32.vlgmr.msra.gmra.mrb[90].mxu0 %vm121_vm4, %v3378_v63 }
0x350b   :  { %6017 = vmatpush3.msk.msra.mxu0 %vm2755_vm5, %v7427_v1  ;;  %6018 = vmatprep.mubr.msk.f32.mxu0 %vm6557_vm0, %v6556_v2 }
0x350c   :  { %6029 = vmatprep.subr.bf16.mxu0 %v6556_v2 }
0x35dd   :  { %v3447_v23 = vpop.f32.mrb[90].mxu0 }
0x35de   :  { %v3448_v51 = vadd.f32 %v7435_v29, %v3447_v23  ;;  %v6015_v7 = vpop.f32.mrb[91].mxu0 }
0x35e0   :  { %5323 = vst.msk [vmem:[%s7949_s16 + $0x10] sm:$0xff] %vm2746_vm6, %v3448_v51  ;;  %6019 = vmatmul.mubr.msk.f32.vlgmr.msra.gmra.mrb[96].mxu0 %vm2746_vm6, %v3448_v51 }
0x35e1   :  { %6030 = vmatpush3.bf16.msra.mxu0 %v7339_v14  ;;  %6033 = vmatprep.mubr.msk.bf16.mxu0 %vm6557_vm0, %v6556_v2 }
0x35e2   :  { %6031 = vmatprep.subr.bf16.mxu0 %v6556_v2 }
0x35e5   :  { %6032 = vmatpush3.bf16.msra.mxu0 %v7346_v30 }
0x35e6   :  { %6234 = vmatprep.subr.bf16.mxu0 %v6562_v59 }
0x36b3   :  { %v3526_v52 = vpop.f32.mrb[96].mxu0 }
0x36b4   :  { %v3536_v5 = vmul.f32 %v3535_v53, %v3526_v52  ;;  %v6020_v54 = vpop.f32.mrb[97].mxu0 }
0x36b6   :  { %v3537_v56 = vadd.f32 %v3536_v5, %v3533_v47 }
0x36b8   :  { %v3625_v58 = vadd.f32 %v3572_v27, %v3537_v56 }
0x36ba   :  { %v3626_v6 = vadd.f32 %v7316_v50, %v3625_v58 }
0x36bc   :  { %v3627_v61 = vmul.f32 %v3626_v6, %v6685_v10 }
0x36be   :  { %v5330_v12 = vmul.f32 -1.442695, %v3627_v61 }
0x36c0   :  { %6464 = vpow2.f32 %v5330_v12 }
0x36ca   :  { %v6465_v8 = vpop.eup %6464 }
0x36cb   :  { %v3631_v13 = vadd.f32 1.0, %v6465_v8  ;;  %v3883_v8 = vstv %s3807_s7 }
0x36cd   :  { %6466 = vrcp.f32 %v3631_v13  ;;  %v3886_v13 = vstv %s3885_s28 }
0x36d7   :  { %v6467_v3 = vpop.eup %6466 }
0x36d8   :  { %v3634_v11 = vmul.f32 %v6467_v3, %v6685_v10 }
0x36da   :  { %v3635_v31 = vadd.f32 %v3634_v11, %v6691_v21 }
0x36dc   :  { %3638 = vrot.lane.b32.xlu0 %v3635_v31, %s6560_s18  ;;  %v3636_v22 = vmul.f32 %v3635_v31, %v7528_v57 }
0x374e   :  { %v3639_v17 = vpop.permute.xlu0 %3638 }
0x374f   :  { %v3641_v19 = vmul.f32 %v3639_v17, %v3635_v31 }
0x3751   :  { %3643 = vrot.lane.b32.xlu1 %v3641_v19, %s6561_s19 }
0x3755   :  { %3580 = vrot.lane.b32.xlu1 %v3578_v18, %s6561_s19 }
0x37c3   :  { %v3644_v24 = vpop.permute.xlu1 %3643 }
0x37c4   :  { %v7595_v15 = vadd.f32 %v3644_v24, %v3636_v22 }
0x37c6   :  { %6468 = vtanh.f32 %v7595_v15 }
0x37c7   :  { %v3581_v25 = vpop.permute.xlu1 %3580 }
0x37c8   :  { %6034 = vmatmul.mubr.msk.bf16.vlgmr.msra.gmra.mrb[100].mxu0 %vm121_vm4, %v3581_v25 }
0x37c9   :  { %6236 = vmatpush3.bf16.msra.mxu0 %v7411_v60  ;;  %6053 = vmatprep.mubr.msk.f32.mxu0 %vm6557_vm0, %v6556_v2 }
0x37ca   :  { %6237 = vmatprep.subr.bf16.mxu0 %v6562_v59 }
0x37cd   :  { %6239 = vmatpush3.bf16.msra.mxu0 %v7417_v0 }
0x37ce   :  { %6061 = vmatprep.subr.bf16.mxu0 %v6556_v2 }
0x37d0   :  { %v6469_v57 = vpop.eup %6468 }
0x37d1   :  { %3649 = vrot.lane.b32.xlu0 %v6469_v57, %s6560_s18 }
0x3843   :  { %v3650_v26 = vpop.permute.xlu0 %3649 }
0x3844   :  { %v3652_v55 = vmul.f32 %v3650_v26, %v3635_v31 }
0x3846   :  { %v3653_v27 = vpack.c.bf16 %v3652_v55, %v3652_v55 }
0x3848   :  { %3655 = vrot.lane.b32.xlu0 %v3653_v27, %s6561_s19 }
0x389b   :  { %v3619_v43 = vpop.f32.mrb[100].mxu0 }
0x389c   :  { %v6035_v28 = vpop.f32.mrb[101].mxu0 }
0x389d   :  { %v3622_v34 = vpop.f32.mrb[102].mxu0 }
0x389e   :  { %v6036_v35 = vpop.f32.mrb[103].mxu0 }
0x38ba   :  { %v3656_v40 = vpop.permute.xlu0 %3655 }
0x38bb   :  { %6042 = vmatmul.mubr.msk.bf16.vlgmr.msra.gmra.mrb[100].mxu1 %vm121_vm4, %v3656_v40 }
0x38bc   :  { %6057 = vmatpush3.msk.msra.mxu1 %vm2755_vm5, %v7427_v1  ;;  %6058 = vmatprep.mubr.msk.f32.mxu1 %vm6557_vm0, %v6556_v2 }
0x38bd   :  { %6069 = vmatprep.subr.bf16.mxu1 %v6556_v2 }
0x398e   :  { %v3694_v41 = vpop.f32.mrb[100].mxu1 }
0x398f   :  { %v3695_v44 = vadd.f32 %v3694_v41, %v3619_v43  ;;  %v6043_v39 = vpop.f32.mrb[101].mxu1 }
0x3990   :  { %v3697_v45 = vpop.f32.mrb[102].mxu1 }
0x3991   :  { %v3700_v38 = vadd.f32 %v7387_v37, %v3695_v44  ;;  %v6044_v42 = vpop.f32.mrb[103].mxu1 }
0x3993   :  { %v3701_v62 = vmul.f32 %v3700_v38, %v6685_v10 }
0x3995   :  { %v5332_v48 = vmul.f32 -1.442695, %v3701_v62 }
0x3997   :  { %6470 = vpow2.f32 %v5332_v48 }
0x39a1   :  { %v6471_v9 = vpop.eup %6470 }
0x39a2   :  { %v3705_v46 = vadd.f32 1.0, %v6471_v9 }
0x39a4   :  { %6472 = vrcp.f32 %v3705_v46  ;;  %v7678_v46 = vld [vmem:[%s7942_s9] sm:$0xff]  }
0x39ae   :  { %v6473_v63 = vpop.eup %6472 }
0x39af   :  { %v3708_v23 = vmul.f32 %v6473_v63, %v6685_v10  ;;  %v7687_v63 = vld [vmem:[%s7942_s9 + $0x8] sm:$0xff]  }
0x39b1   :  { %v3709_v51 = vadd.f32 %v3708_v23, %v6691_v21 }
0x39b3   :  { %3712 = vrot.lane.b32.xlu1 %v3709_v51, %s6560_s18  ;;  %v3710_v16 = vmul.f32 %v3709_v51, %v7561_v4 }
0x3a25   :  { %v3713_v7 = vpop.permute.xlu1 %3712 }
0x3a26   :  { %v3715_v49 = vmul.f32 %v3713_v7, %v3709_v51 }
0x3a28   :  { %3717 = vrot.lane.b32.xlu0 %v3715_v49, %s6561_s19 }
0x3a9a   :  { %v3718_v53 = vpop.permute.xlu0 %3717 }
0x3a9b   :  { %v7620_v47 = vadd.f32 %v3718_v53, %v3710_v16 }
0x3a9d   :  { %6474 = vtanh.f32 %v7620_v47 }
0x3aa7   :  { %v6475_v52 = vpop.eup %6474 }
0x3aa8   :  { %3723 = vrot.lane.b32.xlu1 %v6475_v52, %s6560_s18 }
0x3b1a   :  { %v3724_v5 = vpop.permute.xlu1 %3723 }
0x3b1b   :  { %v3726_v54 = vmul.f32 %v3724_v5, %v3709_v51 }
0x3b1d   :  { %3728 = vrot.lane.b32.xlu0 %v3726_v54, %s6561_s19  ;;  %v3929_v34 = vpack.c.bf16 %v3726_v54, %v3726_v54 }
0x3b8f   :  { %v3729_v56 = vpop.permute.xlu0 %3728 }
0x3b90   :  { %6054 = vmatmul.mubr.msk.f32.vlgmr.msra.gmra.mrb[98].mxu0 %vm121_vm4, %v3729_v56 }
0x3b91   :  { %6062 = vmatpush3.bf16.msra.mxu0 %v7288_v33  ;;  %6065 = vmatprep.mubr.msk.bf16.mxu0 %vm6557_vm0, %v6556_v2 }
0x3b92   :  { %6063 = vmatprep.subr.bf16.mxu0 %v6556_v2 }
0x3b95   :  { %6064 = vmatpush3.bf16.msra.mxu0 %v7296_v36 }
0x3b96   :  { %6077 = vmatprep.subr.bf16.mxu0 %v6556_v2 }
0x3b98   :  { %6066 = vmatmul.mubr.msk.bf16.vlgmr.msra.gmra.mrb[104].mxu0 %vm121_vm4, %v3656_v40 }
0x3b99   :  { %6078 = vmatpush3.bf16.msra.mxu0 %v7354_v20  ;;  %6081 = vmatprep.mubr.msk.bf16.mxu0 %vm6557_vm0, %v6556_v2 }
0x3b9a   :  { %6079 = vmatprep.subr.bf16.mxu0 %v6556_v2 }
0x3b9d   :  { %6080 = vmatpush3.bf16.msra.mxu0 %v7360_v32 }
0x3b9e   :  { %6101 = vmatprep.subr.bf16.mxu0 %v6556_v2 }
0x3c63   :  { %v3798_v33 = vpop.f32.mrb[98].mxu0 }
0x3c64   :  { %v3799_v4 = vadd.f32 %v7435_v29, %v3798_v33  ;;  %v6055_v58 = vpop.f32.mrb[99].mxu0 }
0x3c66   :  { %5334 = vst.msk [vmem:[%s7949_s16 + $0x18] sm:$0xff] %vm2746_vm6, %v3799_v4  ;;  %6059 = vmatmul.mubr.msk.f32.vlgmr.msra.gmra.mrb[86].mxu1 %vm2746_vm6, %v3799_v4 }
0x3c67   :  { %6070 = vmatpush3.bf16.msra.mxu1 %v7339_v14  ;;  %6073 = vmatprep.mubr.msk.bf16.mxu1 %vm6557_vm0, %v6556_v2  ;;  %v5338_v14 = vld [vmem:[%s7935_s2 + $0x18] sm:$0xff] }
0x3c68   :  { %6071 = vmatprep.subr.bf16.mxu1 %v6556_v2  ;;  %v3884_v3 = vmul.f32 %v5338_v14, %v3883_v8 }
0x3c6b   :  { %v3923_v36 = vpop.f32.mrb[104].mxu0  ;;  %6072 = vmatpush3.bf16.msra.mxu1 %v7346_v30 }
0x3c6c   :  { %v6067_v6 = vpop.f32.mrb[105].mxu0  ;;  %6240 = vmatprep.subr.bf16.mxu1 %v6562_v59 }
0x3c6d   :  { %v3926_v61 = vpop.f32.mrb[106].mxu0 }
0x3c6e   :  { %v6068_v12 = vpop.f32.mrb[107].mxu0 }
0x3d39   :  { %v3877_v11 = vpop.f32.mrb[86].mxu1 }
0x3d3a   :  { %v3887_v31 = vmul.f32 %v3886_v13, %v3877_v11  ;;  %v6060_v30 = vpop.f32.mrb[87].mxu1 }
0x3d3c   :  { %v3888_v17 = vadd.f32 %v3887_v31, %v3884_v3 }
0x3d3e   :  { %v3976_v19 = vadd.f32 %v3923_v36, %v3888_v17 }
0x3d40   :  { %v3977_v18 = vadd.f32 %v7316_v50, %v3976_v19  ;;  %v5349_v19 = vld [vmem:[%s7935_s2 + $0x20] sm:$0xff] }
0x3d42   :  { %v3978_v22 = vmul.f32 %v3977_v18, %v6685_v10  ;;  %v4234_v18 = vstv %s4158_s1  ;;  %s4938_s1 = ssub.f32 1.0, %s4860_s14 }
0x3d44   :  { %v5341_v24 = vmul.f32 -1.442695, %v3978_v22  ;;  %v4237_v22 = vstv %s4236_s25 }
0x3d46   :  { %6476 = vpow2.f32 %v5341_v24  ;;  %v4235_v24 = vmul.f32 %v5349_v19, %v4234_v18 }
0x3d50   :  { %v6477_v25 = vpop.eup %6476 }
0x3d51   :  { %v3982_v57 = vadd.f32 1.0, %v6477_v25 }
0x3d53   :  { %6478 = vrcp.f32 %v3982_v57 }
0x3d5d   :  { %v6479_v26 = vpop.eup %6478 }
0x3d5e   :  { %v3985_v55 = vmul.f32 %v6479_v26, %v6685_v10 }
0x3d60   :  { %v3986_v27 = vadd.f32 %v3985_v55, %v6691_v21 }
0x3d62   :  { %3989 = vrot.lane.b32.xlu1 %v3986_v27, %s6560_s18  ;;  %v3987_v50 = vmul.f32 %v3986_v27, %v7595_v15 }
0x3dd4   :  { %v3990_v43 = vpop.permute.xlu1 %3989 }
0x3dd5   :  { %v3992_v28 = vmul.f32 %v3990_v43, %v3986_v27  ;;  %v7744_v43 = vld [vmem:[%s7943_s10] ss:$0 sm:$0xff] }
0x3dd7   :  { %3994 = vrot.lane.b32.xlu0 %v3992_v28, %s6561_s19 }
0x3ddb   :  { %3931 = vrot.lane.b32.xlu0 %v3929_v34, %s6561_s19 }
0x3e49   :  { %v3995_v35 = vpop.permute.xlu0 %3994 }
0x3e4a   :  { %v7662_v40 = vadd.f32 %v3995_v35, %v3987_v50 }
0x3e4c   :  { %6480 = vtanh.f32 %v7662_v40 }
0x3e4d   :  { %v3932_v41 = vpop.permute.xlu0 %3931 }
0x3e4e   :  { %6074 = vmatmul.mubr.msk.bf16.vlgmr.msra.gmra.mrb[104].mxu1 %vm121_vm4, %v3932_v41 }
0x3e4f   :  { %6242 = vmatpush3.bf16.msra.mxu1 %v7411_v60  ;;  %6093 = vmatprep.mubr.msk.f32.mxu1 %vm6557_vm0, %v6556_v2 }
0x3e50   :  { %6243 = vmatprep.subr.bf16.mxu1 %v6562_v59 }
0x3e53   :  { %6245 = vmatpush3.bf16.msra.mxu1 %v7417_v0 }
0x3e54   :  { %6096 = vmatprep.subr.mxu1 %v6556_v2 }
0x3e56   :  { %v6481_v15 = vpop.eup %6480 }
0x3e57   :  { %4000 = vrot.lane.b32.xlu1 %v6481_v15, %s6560_s18 }
0x3ec9   :  { %v4001_v44 = vpop.permute.xlu1 %4000 }
0x3eca   :  { %v4003_v39 = vmul.f32 %v4001_v44, %v3986_v27 }
0x3ecc   :  { %v4004_v45 = vpack.c.bf16 %v4003_v39, %v4003_v39 }
0x3ece   :  { %4006 = vrot.lane.b32.xlu1 %v4004_v45, %s6561_s19 }
0x3f21   :  { %v3970_v38 = vpop.f32.mrb[104].mxu1 }
0x3f22   :  { %v6075_v42 = vpop.f32.mrb[105].mxu1 }
0x3f23   :  { %v3973_v62 = vpop.f32.mrb[106].mxu1 }
0x3f24   :  { %v6076_v48 = vpop.f32.mrb[107].mxu1 }
0x3f40   :  { %v4007_v9 = vpop.permute.xlu1 %4006 }
0x3f41   :  { %6082 = vmatmul.mubr.msk.bf16.vlgmr.msra.gmra.mrb[108].mxu0 %vm121_vm4, %v4007_v9 }
0x3f42   :  { %6102 = vmatpush3.bf16.msra.mxu0 %v7678_v46  ;;  %6105 = vmatprep.mubr.msk.bf16.mxu0 %vm6557_vm0, %v6556_v2 }
0x3f43   :  { %6103 = vmatprep.subr.bf16.mxu0 %v6556_v2 }
0x3f46   :  { %6104 = vmatpush3.bf16.msra.mxu0 %v7687_v63 }
0x3f47   :  { %6117 = vmatprep.subr.bf16.mxu0 %v6556_v2 }
0x3f49   :  { %6106 = vmatmul.mubr.msk.bf16.vlgmr.msra.gmra.mrb[112].mxu0 %vm121_vm4, %v4007_v9 }
0x3f4a   :  { %6118 = vmatpush3.bf16.msra.mxu0 %v7354_v20  ;;  %6121 = vmatprep.mubr.msk.bf16.mxu0 %vm6557_vm0, %v6556_v2 }
0x3f4b   :  { %6119 = vmatprep.subr.bf16.mxu0 %v6556_v2 }
0x3f4e   :  { %6120 = vmatpush3.bf16.msra.mxu0 %v7360_v32 }
0x3f4f   :  { %6136 = vmatprep.subr.mxu0 %v6556_v2 }
0x4014   :  { %v4045_v23 = vpop.f32.mrb[108].mxu0 }
0x4015   :  { %v4046_v51 = vadd.f32 %v4045_v23, %v3970_v38  ;;  %v6083_v7 = vpop.f32.mrb[109].mxu0 }
0x4016   :  { %v4048_v49 = vpop.f32.mrb[110].mxu0 }
0x4017   :  { %v4051_v16 = vadd.f32 %v7387_v37, %v4046_v51  ;;  %v6084_v53 = vpop.f32.mrb[111].mxu0 }
0x4019   :  { %v4052_v52 = vmul.f32 %v4051_v16, %v6685_v10 }
0x401b   :  { %v5343_v5 = vmul.f32 -1.442695, %v4052_v52 }
0x401c   :  { %v4274_v20 = vpop.f32.mrb[112].mxu0 }
0x401d   :  { %6482 = vpow2.f32 %v5343_v5  ;;  %v6107_v54 = vpop.f32.mrb[113].mxu0 }
0x401e   :  { %v4277_v56 = vpop.f32.mrb[114].mxu0  ;;  %v7770_v54 = vld [vmem:[%s7941_s8] sm:$0x1] }
0x401f   :  { %v6108_v33 = vpop.f32.mrb[115].mxu0 }
0x4027   :  { %v6483_v4 = vpop.eup %6482 }
0x4028   :  { %v4056_v58 = vadd.f32 1.0, %v6483_v4 }
0x402a   :  { %6484 = vrcp.f32 %v4056_v58 }
0x4034   :  { %v6485_v32 = vpop.eup %6484 }
0x4035   :  { %v4059_v36 = vmul.f32 %v6485_v32, %v6685_v10  ;;  %v7780_v32 = vld [vmem:[%s7946_s13] ss:$0 sm:$0xff] }
0x4037   :  { %v4060_v6 = vadd.f32 %v4059_v36, %v6691_v21 }
0x4039   :  { %4063 = vrot.lane.b32.xlu0 %v4060_v6, %s6560_s18  ;;  %v4061_v12 = vmul.f32 %v4060_v6, %v7620_v47 }
0x40ab   :  { %v4064_v37 = vpop.permute.xlu0 %4063 }
0x40ac   :  { %v4066_v61 = vmul.f32 %v4064_v37, %v4060_v6 }
0x40ae   :  { %4068 = vrot.lane.b32.xlu1 %v4066_v61, %s6561_s19 }
0x4120   :  { %v4069_v14 = vpop.permute.xlu1 %4068 }
0x4121   :  { %v7705_v8 = vadd.f32 %v4069_v14, %v4061_v12 }
0x4123   :  { %6486 = vtanh.f32 %v7705_v8 }
0x412d   :  { %v6487_v13 = vpop.eup %6486 }
0x412e   :  { %4074 = vrot.lane.b32.xlu0 %v6487_v13, %s6560_s18 }
0x41a0   :  { %v4075_v3 = vpop.permute.xlu0 %4074 }
0x41a1   :  { %v4077_v11 = vmul.f32 %v4075_v3, %v4060_v6 }
0x41a3   :  { %4079 = vrot.lane.b32.xlu1 %v4077_v11, %s6561_s19  ;;  %v4280_v42 = vpack.c.bf16 %v4077_v11, %v4077_v11 }
0x4215   :  { %v4080_v31 = vpop.permute.xlu1 %4079 }
0x4216   :  { %6094 = vmatmul.mubr.msk.f32.vlgmr.msra.gmra.mrb[108].mxu1 %vm121_vm4, %v4080_v31 }
0x4217   :  { %6097 = vmatpush3.msk.msra.mxu1 %vm2755_vm5, %v7427_v1  ;;  %6098 = vmatprep.mubr.msk.f32.mxu1 %vm6557_vm0, %v6556_v2  ;;  %v7725_v1 = vld [vmem:[%s7945_s12] sm:$0xff]  }
0x4218   :  { %6109 = vmatprep.subr.bf16.mxu1 %v6556_v2 }
0x42e9   :  { %v4149_v47 = vpop.f32.mrb[108].mxu1 }
0x42ea   :  { %v4150_v30 = vadd.f32 %v7435_v29, %v4149_v47  ;;  %v6095_v17 = vpop.f32.mrb[109].mxu1  ;;  %v7734_v29 = vld [vmem:[%s7945_s12 + $0x8] sm:$0xff]  }
0x42ec   :  { %5345 = vst.msk [vmem:[%s7949_s16 + $0x20] sm:$0xff] %vm2746_vm6, %v4150_v30  ;;  %6099 = vmatmul.mubr.msk.f32.vlgmr.msra.gmra.mrb[110].mxu1 %vm2746_vm6, %v4150_v30 }
0x42ed   :  { %6110 = vmatpush3.bf16.msra.mxu1 %v7725_v1  ;;  %6113 = vmatprep.mubr.msk.bf16.mxu1 %vm6557_vm0, %v6556_v2 }
0x42ee   :  { %6111 = vmatprep.subr.bf16.mxu1 %v6556_v2 }
0x42f1   :  { %6112 = vmatpush3.bf16.msra.mxu1 %v7734_v29 }
0x42f2   :  { %6246 = vmatprep.subr.bf16.mxu1 %v6562_v59 }
0x43bf   :  { %v4228_v25 = vpop.f32.mrb[110].mxu1 }
0x43c0   :  { %v4238_v57 = vmul.f32 %v4237_v22, %v4228_v25  ;;  %v6100_v26 = vpop.f32.mrb[111].mxu1 }
0x43c2   :  { %v4239_v55 = vadd.f32 %v4238_v57, %v4235_v24  ;;  %v7814_v57 = vld [vmem:[%s7944_s11 + $0x8] sm:$0xff]  }
0x43c4   :  { %v4327_v27 = vadd.f32 %v4274_v20, %v4239_v55  ;;  %v7818_v55 = vld [vmem:[#allocation2] ss:$0 sm:$0xff] }
0x43c6   :  { %v4328_v28 = vadd.f32 %v7744_v43, %v4327_v27 }
0x43c8   :  { %v4329_v34 = vmul.f32 %v4328_v28, %v6685_v10 }
0x43ca   :  { %v5352_v50 = vmul.f32 -1.442695, %v4329_v34 }
0x43cc   :  { %6488 = vpow2.f32 %v5352_v50 }
0x43d6   :  { %v6489_v35 = vpop.eup %6488 }
0x43d7   :  { %v4333_v41 = vadd.f32 1.0, %v6489_v35 }
0x43d9   :  { %6490 = vrcp.f32 %v4333_v41 }
0x43e3   :  { %v6491_v15 = vpop.eup %6490 }
0x43e4   :  { %v4336_v44 = vmul.f32 %v6491_v15, %v6685_v10  ;;  %v5360_v15 = vld [vmem:[%s7935_s2 + $0x28] sm:$0xff] }
0x43e6   :  { %v4337_v39 = vadd.f32 %v4336_v44, %v6691_v21 }
0x43e8   :  { %4340 = vrot.lane.b32.xlu0 %v4337_v39, %s6560_s18  ;;  %v4338_v62 = vmul.f32 %v4337_v39, %v7662_v40 }
0x445a   :  { %v4341_v45 = vpop.permute.xlu0 %4340 }
0x445b   :  { %v4343_v38 = vmul.f32 %v4341_v45, %v4337_v39 }
0x445d   :  { %4345 = vrot.lane.b32.xlu1 %v4343_v38, %s6561_s19 }
0x4461   :  { %4282 = vrot.lane.b32.xlu1 %v4280_v42, %s6561_s19 }
0x44cf   :  { %v4346_v48 = vpop.permute.xlu1 %4345 }
0x44d0   :  { %v7754_v9 = vadd.f32 %v4346_v48, %v4338_v62 }
0x44d2   :  { %6492 = vtanh.f32 %v7754_v9 }
0x44d3   :  { %v4283_v23 = vpop.permute.xlu1 %4282 }
0x44d4   :  { %6114 = vmatmul.mubr.msk.bf16.vlgmr.msra.gmra.mrb[112].mxu1 %vm121_vm4, %v4283_v23 }
0x44d5   :  { %6248 = vmatpush3.bf16.msra.mxu1 %v7411_v60  ;;  %6133 = vmatprep.mubr.msk.f32.mxu1 %vm6557_vm0, %v6556_v2 }
0x44d6   :  { %6249 = vmatprep.subr.bf16.mxu1 %v6562_v59 }
0x44d9   :  { %6251 = vmatpush3.bf16.msra.mxu1 %v7417_v0 }
0x44da   :  { %6141 = vmatprep.subr.bf16.mxu1 %v6556_v2 }
0x44dc   :  { %v6493_v40 = vpop.eup %6492 }
0x44dd   :  { %4351 = vrot.lane.b32.xlu0 %v6493_v40, %s6560_s18 }
0x454f   :  { %v4352_v51 = vpop.permute.xlu0 %4351 }
0x4550   :  { %v4354_v7 = vmul.f32 %v4352_v51, %v4337_v39 }
0x4552   :  { %v4355_v49 = vpack.c.bf16 %v4354_v7, %v4354_v7 }
0x4554   :  { %4357 = vrot.lane.b32.xlu0 %v4355_v49, %s6561_s19 }
0x45a7   :  { %v4321_v16 = vpop.f32.mrb[112].mxu1 }
0x45a8   :  { %v6115_v53 = vpop.f32.mrb[113].mxu1 }
0x45a9   :  { %v4324_v52 = vpop.f32.mrb[114].mxu1 }
0x45aa   :  { %v6116_v5 = vpop.f32.mrb[115].mxu1 }
0x45c6   :  { %v4358_v20 = vpop.permute.xlu0 %4357 }
0x45c7   :  { %6122 = vmatmul.mubr.msk.bf16.vlgmr.msra.gmra.mrb[116].mxu0 %vm121_vm4, %v4358_v20 }
0x45c8   :  { %6137 = vmatpush3.msk.msra.mxu0 %vm2755_vm5, %v7770_v54  ;;  %6138 = vmatprep.mubr.msk.f32.mxu0 %vm6557_vm0, %v6556_v2 }
0x45c9   :  { %6149 = vmatprep.subr.bf16.mxu0 %v6556_v2 }
0x469a   :  { %v4396_v56 = vpop.f32.mrb[116].mxu0 }
0x469b   :  { %v4397_v33 = vadd.f32 %v4396_v56, %v4321_v16  ;;  %v6123_v4 = vpop.f32.mrb[117].mxu0 }
0x469c   :  { %v4399_v58 = vpop.f32.mrb[118].mxu0 }
0x469d   :  { %v4402_v36 = vadd.f32 %v7780_v32, %v4397_v33  ;;  %v6124_v6 = vpop.f32.mrb[119].mxu0 }
0x469f   :  { %v4403_v37 = vmul.f32 %v4402_v36, %v6685_v10 }
0x46a1   :  { %v5354_v61 = vmul.f32 -1.442695, %v4403_v37 }
0x46a3   :  { %6494 = vpow2.f32 %v5354_v61 }
0x46ad   :  { %v6495_v12 = vpop.eup %6494 }
0x46ae   :  { %v4407_v14 = vadd.f32 1.0, %v6495_v12 }
0x46b0   :  { %6496 = vrcp.f32 %v4407_v14 }
0x46ba   :  { %v6497_v13 = vpop.eup %6496 }
0x46bb   :  { %v4410_v3 = vmul.f32 %v6497_v13, %v6685_v10 }
0x46bd   :  { %v4411_v11 = vadd.f32 %v4410_v3, %v6691_v21 }
0x46bf   :  { %4414 = vrot.lane.b32.xlu1 %v4411_v11, %s6560_s18  ;;  %v4412_v30 = vmul.f32 %v4411_v11, %v7705_v8  ;;  %v7805_v8 = vld [vmem:[%s7944_s11] sm:$0xff]   ;;  %s5357_s11 = sld [smem:[#allocation3 + $0x5]] }
0x46c5   :  { %p4507_p10 = scmp.ne.s32.totalorder %s5357_s11, 0 }
0x46c7   :  { %s4508_s17 = scalar_select %p4507_p10, 1, 0 }
0x46c9   :  { %s4509_s4 = scvt.s32.f32 %s4508_s17 }
0x46cb   :  { %s4587_s9 = ssub.f32 1.0, %s4509_s4  ;;  %v4585_v44 = vstv %s4509_s4 }
0x46cc   :  { %v4586_v45 = vmul.f32 %v5360_v15, %v4585_v44 }
0x46cd   :  { %v4588_v39 = vstv %s4587_s9 }
0x4731   :  { %v4415_v31 = vpop.permute.xlu1 %4414 }
0x4732   :  { %v4417_v47 = vmul.f32 %v4415_v31, %v4411_v11 }
0x4734   :  { %4419 = vrot.lane.b32.xlu0 %v4417_v47, %s6561_s19 }
0x47a6   :  { %v4420_v17 = vpop.permute.xlu0 %4419 }
0x47a7   :  { %v7789_v19 = vadd.f32 %v4420_v17, %v4412_v30 }
0x47a9   :  { %6498 = vtanh.f32 %v7789_v19 }
0x47b3   :  { %v6499_v18 = vpop.eup %6498 }
0x47b4   :  { %4425 = vrot.lane.b32.xlu1 %v6499_v18, %s6560_s18 }
0x4826   :  { %v4426_v22 = vpop.permute.xlu1 %4425 }
0x4827   :  { %v4428_v24 = vmul.f32 %v4426_v22, %v4411_v11 }
0x4829   :  { %4430 = vrot.lane.b32.xlu0 %v4428_v24, %s6561_s19  ;;  %v4631_v33 = vpack.c.bf16 %v4428_v24, %v4428_v24 }
0x489b   :  { %v4431_v25 = vpop.permute.xlu0 %4430 }
0x489c   :  { %6134 = vmatmul.mubr.msk.f32.vlgmr.msra.gmra.mrb[116].mxu1 %vm121_vm4, %v4431_v25 }
0x489d   :  { %6142 = vmatpush3.bf16.msra.mxu1 %v7678_v46  ;;  %6145 = vmatprep.mubr.msk.bf16.mxu1 %vm6557_vm0, %v6556_v2 }
0x489e   :  { %6143 = vmatprep.subr.bf16.mxu1 %v6556_v2 }
0x48a1   :  { %6144 = vmatpush3.bf16.msra.mxu1 %v7687_v63 }
0x48a2   :  { %6157 = vmatprep.subr.bf16.mxu1 %v6556_v2 }
0x48a4   :  { %6146 = vmatmul.mubr.msk.bf16.vlgmr.msra.gmra.mrb[120].mxu1 %vm121_vm4, %v4358_v20 }
0x48a5   :  { %6158 = vmatpush3.bf16.msra.mxu1 %v7805_v8  ;;  %6161 = vmatprep.mubr.msk.bf16.mxu1 %vm6557_vm0, %v6556_v2 }
0x48a6   :  { %6159 = vmatprep.subr.bf16.mxu1 %v6556_v2 }
0x48a9   :  { %6160 = vmatpush3.bf16.msra.mxu1 %v7814_v57 }
0x48aa   :  { %6181 = vmatprep.subr.bf16.mxu1 %v6556_v2 }
0x496f   :  { %v4500_v26 = vpop.f32.mrb[116].mxu1 }
0x4970   :  { %v4501_v27 = vadd.f32 %v7818_v55, %v4500_v26  ;;  %v6135_v28 = vpop.f32.mrb[117].mxu1 }
0x4972   :  { %5356 = vst.msk [vmem:[%s7949_s16 + $0x28] sm:$0xff] %vm2746_vm6, %v4501_v27  ;;  %6139 = vmatmul.mubr.msk.f32.vlgmr.msra.gmra.mrb[120].mxu0 %vm2746_vm6, %v4501_v27 }
0x4973   :  { %6150 = vmatpush3.bf16.msra.mxu0 %v7725_v1  ;;  %6153 = vmatprep.mubr.msk.bf16.mxu0 %vm6557_vm0, %v6556_v2 }
0x4974   :  { %6151 = vmatprep.subr.bf16.mxu0 %v6556_v2 }
0x4977   :  { %v4625_v34 = vpop.f32.mrb[120].mxu1  ;;  %6152 = vmatpush3.bf16.msra.mxu0 %v7734_v29 }
0x4978   :  { %v6147_v50 = vpop.f32.mrb[121].mxu1  ;;  %6252 = vmatprep.subr.bf16.mxu0 %v6562_v59 }
0x4979   :  { %v4628_v35 = vpop.f32.mrb[122].mxu1 }
0x497a   :  { %v6148_v41 = vpop.f32.mrb[123].mxu1 }
0x4a45   :  { %v4579_v38 = vpop.f32.mrb[120].mxu0 }
0x4a46   :  { %v4589_v42 = vmul.f32 %v4588_v39, %v4579_v38  ;;  %v6140_v62 = vpop.f32.mrb[121].mxu0 }
0x4a48   :  { %v4590_v48 = vadd.f32 %v4589_v42, %v4586_v45 }
0x4a4a   :  { %v4678_v23 = vadd.f32 %v4625_v34, %v4590_v48 }
0x4a4c   :  { %v4679_v40 = vadd.f32 %v7744_v43, %v4678_v23 }
0x4a4e   :  { %v4680_v51 = vmul.f32 %v4679_v40, %v6685_v10 }
0x4a50   :  { %v5363_v7 = vmul.f32 -1.442695, %v4680_v51  ;;  %v4936_v51 = vstv %s4860_s14 }
0x4a52   :  { %6500 = vpow2.f32 %v5363_v7 }
0x4a5c   :  { %v6501_v49 = vpop.eup %6500 }
0x4a5d   :  { %v4684_v16 = vadd.f32 1.0, %v6501_v49 }
0x4a5f   :  { %6502 = vrcp.f32 %v4684_v16 }
0x4a69   :  { %v6503_v53 = vpop.eup %6502 }
0x4a6a   :  { %v4687_v52 = vmul.f32 %v6503_v53, %v6685_v10 }
0x4a6c   :  { %v4688_v5 = vadd.f32 %v4687_v52, %v6691_v21 }
0x4a6e   :  { %4691 = vrot.lane.b32.xlu1 %v4688_v5, %s6560_s18  ;;  %v4689_v4 = vmul.f32 %v4688_v5, %v7754_v9 }
0x4ae0   :  { %v4692_v20 = vpop.permute.xlu1 %4691 }
0x4ae1   :  { %v4694_v56 = vmul.f32 %v4692_v20, %v4688_v5 }
0x4ae3   :  { %4696 = vrot.lane.b32.xlu0 %v4694_v56, %s6561_s19 }
0x4ae7   :  { %4633 = vrot.lane.b32.xlu0 %v4631_v33, %s6561_s19 }
0x4b55   :  { %v4697_v58 = vpop.permute.xlu0 %4696 }
0x4b56   :  { %v7843_v36 = vadd.f32 %v4697_v58, %v4689_v4 }
0x4b58   :  { %6504 = vtanh.f32 %v7843_v36 }
0x4b59   :  { %v4634_v6 = vpop.permute.xlu0 %4633 }
0x4b5a   :  { %6154 = vmatmul.mubr.msk.bf16.vlgmr.msra.gmra.mrb[124].mxu0 %vm121_vm4, %v4634_v6 }
0x4b5b   :  { %6254 = vmatpush3.bf16.msra.mxu0 %v7411_v60  ;;  %6173 = vmatprep.mubr.msk.f32.mxu0 %vm6557_vm0, %v6556_v2 }
0x4b5c   :  { %6255 = vmatprep.subr.bf16.mxu0 %v6562_v59 }
0x4b5f   :  { %6257 = vmatpush3.bf16.msra.mxu0 %v7417_v0 }
0x4b60   :  { %6176 = vmatprep.subr.mxu0 %v6556_v2 }
0x4b62   :  { %v6505_v9 = vpop.eup %6504 }
0x4b63   :  { %4702 = vrot.lane.b32.xlu1 %v6505_v9, %s6560_s18 }
0x4bd5   :  { %v4703_v37 = vpop.permute.xlu1 %4702 }
0x4bd6   :  { %v4705_v61 = vmul.f32 %v4703_v37, %v4688_v5 }
0x4bd8   :  { %v4706_v12 = vpack.c.bf16 %v4705_v61, %v4705_v61 }
0x4bda   :  { %4708 = vrot.lane.b32.xlu1 %v4706_v12, %s6561_s19 }
0x4c2d   :  { %v4672_v14 = vpop.f32.mrb[124].mxu0 }
0x4c2e   :  { %v6155_v13 = vpop.f32.mrb[125].mxu0 }
0x4c2f   :  { %v4675_v3 = vpop.f32.mrb[126].mxu0 }
0x4c30   :  { %v6156_v11 = vpop.f32.mrb[127].mxu0 }
0x4c4c   :  { %v4709_v31 = vpop.permute.xlu1 %4708 }
0x4c4d   :  { %6162 = vmatmul.mubr.msk.bf16.vlgmr.msra.gmra.mrb[124].mxu1 %vm121_vm4, %v4709_v31 }
0x4c4e   :  { %6182 = vmatpush3.bf16.msra.mxu1 %v7678_v46  ;;  %6185 = vmatprep.mubr.msk.bf16.mxu1 %vm6557_vm0, %v6556_v2 }
0x4c4f   :  { %6183 = vmatprep.subr.bf16.mxu1 %v6556_v2 }
0x4c52   :  { %6184 = vmatpush3.bf16.msra.mxu1 %v7687_v63 }
0x4c53   :  { %6197 = vmatprep.subr.bf16.mxu1 %v6556_v2 }
0x4c55   :  { %6186 = vmatmul.mubr.msk.bf16.vlgmr.msra.gmra.mrb[128].mxu1 %vm121_vm4, %v4709_v31 }
0x4c56   :  { %6198 = vmatpush3.bf16.msra.mxu1 %v7805_v8  ;;  %6201 = vmatprep.mubr.msk.bf16.mxu1 %vm6557_vm0, %v6556_v2 }
0x4c57   :  { %6199 = vmatprep.subr.bf16.mxu1 %v6556_v2 }
0x4c5a   :  { %6200 = vmatpush3.bf16.msra.mxu1 %v7814_v57 }
0x4d20   :  { %v4747_v46 = vpop.f32.mrb[124].mxu1 }
0x4d21   :  { %v4748_v47 = vadd.f32 %v4747_v46, %v4672_v14  ;;  %v6163_v30 = vpop.f32.mrb[125].mxu1 }
0x4d22   :  { %v4750_v17 = vpop.f32.mrb[126].mxu1 }
0x4d23   :  { %v4753_v18 = vadd.f32 %v7780_v32, %v4748_v47  ;;  %v6164_v63 = vpop.f32.mrb[127].mxu1 }
0x4d25   :  { %v4754_v22 = vmul.f32 %v4753_v18, %v6685_v10 }
0x4d27   :  { %v5365_v24 = vmul.f32 -1.442695, %v4754_v22 }
0x4d28   :  { %v4976_v25 = vpop.f32.mrb[128].mxu1 }
0x4d29   :  { %6506 = vpow2.f32 %v5365_v24  ;;  %v6187_v8 = vpop.f32.mrb[129].mxu1 }
0x4d2a   :  { %v4979_v26 = vpop.f32.mrb[130].mxu1 }
0x4d2b   :  { %v6188_v27 = vpop.f32.mrb[131].mxu1 }
0x4d33   :  { %v6507_v28 = vpop.eup %6506 }
0x4d34   :  { %v4758_v34 = vadd.f32 1.0, %v6507_v28 }
0x4d36   :  { %6508 = vrcp.f32 %v4758_v34 }
0x4d40   :  { %v6509_v50 = vpop.eup %6508 }
0x4d41   :  { %v4761_v57 = vmul.f32 %v6509_v50, %v6685_v10 }
0x4d43   :  { %v4762_v35 = vadd.f32 %v4761_v57, %v6691_v21 }
0x4d45   :  { %4765 = vrot.lane.b32.xlu0 %v4762_v35, %s6560_s18  ;;  %v4763_v44 = vmul.f32 %v4762_v35, %v7789_v19 }
0x4db7   :  { %v4766_v41 = vpop.permute.xlu0 %4765 }
0x4db8   :  { %v4768_v15 = vmul.f32 %v4766_v41, %v4762_v35 }
0x4dba   :  { %4770 = vrot.lane.b32.xlu1 %v4768_v15, %s6561_s19 }
0x4e2c   :  { %v4771_v39 = vpop.permute.xlu1 %4770 }
0x4e2d   :  { %v7875_v45 = vadd.f32 %v4771_v39, %v4763_v44 }
0x4e2f   :  { %6510 = vtanh.f32 %v7875_v45 }
0x4e39   :  { %v6511_v38 = vpop.eup %6510 }
0x4e3a   :  { %4776 = vrot.lane.b32.xlu0 %v6511_v38, %s6560_s18 }
0x4eac   :  { %v4777_v42 = vpop.permute.xlu0 %4776 }
0x4ead   :  { %v4779_v62 = vmul.f32 %v4777_v42, %v4762_v35 }
0x4eaf   :  { %4781 = vrot.lane.b32.xlu1 %v4779_v62, %s6561_s19  ;;  %v4982_v12 = vpack.c.bf16 %v4779_v62, %v4779_v62 }
0x4f21   :  { %v4782_v48 = vpop.permute.xlu1 %4781 }
0x4f22   :  { %6174 = vmatmul.mubr.msk.f32.vlgmr.msra.gmra.mrb[122].mxu0 %vm121_vm4, %v4782_v48 }
0x4f23   :  { %6177 = vmatpush3.msk.msra.mxu0 %vm2755_vm5, %v7770_v54  ;;  %6178 = vmatprep.mubr.msk.f32.mxu0 %vm6557_vm0, %v6556_v2  ;;  %v5371_v54 = vld [vmem:[%s7935_s2 + $0x30] sm:$0xff] }
0x4f24   :  { %6189 = vmatprep.subr.bf16.mxu0 %v6556_v2  ;;  %v4937_v7 = vmul.f32 %v5371_v54, %v4936_v51 }
0x4ff5   :  { %v4851_v19 = vpop.f32.mrb[122].mxu0 }
0x4ff6   :  { %v4852_v23 = vadd.f32 %v7818_v55, %v4851_v19  ;;  %v6175_v40 = vpop.f32.mrb[123].mxu0 }
0x4ff8   :  { %5367 = vst.msk [vmem:[%s7949_s16 + $0x30] sm:$0xff] %vm2746_vm6, %v4852_v23  ;;  %6179 = vmatmul.mubr.msk.f32.vlgmr.msra.gmra.mrb[128].mxu0 %vm2746_vm6, %v4852_v23 }
0x4ff9   :  { %6190 = vmatpush3.bf16.msra.mxu0 %v7725_v1  ;;  %6193 = vmatprep.mubr.msk.bf16.mxu0 %vm6557_vm0, %v6556_v2  ;;  %v4939_v1 = vstv %s4938_s1 }
0x4ffa   :  { %6191 = vmatprep.subr.bf16.mxu0 %v6556_v2 }
0x4ffd   :  { %6192 = vmatpush3.bf16.msra.mxu0 %v7734_v29 }
0x4ffe   :  { %6258 = vmatprep.subr.bf16.mxu0 %v6562_v59 }
0x50cb   :  { %v4930_v49 = vpop.f32.mrb[128].mxu0 }
0x50cc   :  { %v4940_v16 = vmul.f32 %v4939_v1, %v4930_v49  ;;  %v6180_v53 = vpop.f32.mrb[129].mxu0 }
0x50ce   :  { %v4941_v52 = vadd.f32 %v4940_v16, %v4937_v7 }
0x50d0   :  { %v5029_v5 = vadd.f32 %v4976_v25, %v4941_v52 }
0x50d2   :  { %v5030_v29 = vadd.f32 %v7744_v43, %v5029_v5 }
0x50d4   :  { %v5031_v20 = vmul.f32 %v5030_v29, %v6685_v10 }
0x50d6   :  { %v5374_v56 = vmul.f32 -1.442695, %v5031_v20 }
0x50d8   :  { %6512 = vpow2.f32 %v5374_v56 }
0x50e2   :  { %v6513_v33 = vpop.eup %6512 }
0x50e3   :  { %v5035_v4 = vadd.f32 1.0, %v6513_v33 }
0x50e5   :  { %6514 = vrcp.f32 %v5035_v4 }
0x50ef   :  { %v6515_v58 = vpop.eup %6514 }
0x50f0   :  { %v5038_v6 = vmul.f32 %v6515_v58, %v6685_v10 }
0x50f2   :  { %v5039_v9 = vadd.f32 %v5038_v6, %v6691_v21 }
0x50f4   :  { %5042 = vrot.lane.b32.xlu0 %v5039_v9, %s6560_s18  ;;  %v5040_v43 = vmul.f32 %v5039_v9, %v7843_v36 }
0x5166   :  { %v5043_v37 = vpop.permute.xlu0 %5042 }
0x5167   :  { %v5045_v61 = vmul.f32 %v5043_v37, %v5039_v9 }
0x5169   :  { %5047 = vrot.lane.b32.xlu1 %v5045_v61, %s6561_s19 }
0x516d   :  { %4984 = vrot.lane.b32.xlu1 %v4982_v12, %s6561_s19 }
0x51db   :  { %v5048_v14 = vpop.permute.xlu1 %5047 }
0x51dc   :  { %v5050_v13 = vadd.f32 %v5048_v14, %v5040_v43 }
0x51de   :  { %6516 = vtanh.f32 %v5050_v13 }
0x51df   :  { %v4985_v3 = vpop.permute.xlu1 %4984 }
0x51e0   :  { %6194 = vmatmul.mubr.msk.bf16.vlgmr.msra.gmra.mrb[132].mxu0 %vm121_vm4, %v4985_v3 }
0x51e1   :  { %6260 = vmatpush3.bf16.msra.mxu0 %v7411_v60  ;;  %6213 = vmatprep.mubr.msk.f32.mxu0 %vm6557_vm0, %v6556_v2 }
0x51e2   :  { %6261 = vmatprep.subr.bf16.mxu0 %v6562_v59 }
0x51e5   :  { %6263 = vmatpush3.bf16.msra.mxu0 %v7417_v0 }
0x51e8   :  { %v6517_v11 = vpop.eup %6516 }
0x51e9   :  { %5053 = vrot.lane.b32.xlu0 %v6517_v11, %s6560_s18 }
0x525b   :  { %v5054_v31 = vpop.permute.xlu0 %5053 }
0x525c   :  { %v5056_v36 = vmul.f32 %v5054_v31, %v5039_v9 }
0x525e   :  { %v5057_v46 = vpack.c.bf16 %v5056_v36, %v5056_v36 }
0x5260   :  { %5059 = vrot.lane.b32.xlu0 %v5057_v46, %s6561_s19 }
0x52b3   :  { %v5023_v47 = vpop.f32.mrb[132].mxu0 }
0x52b4   :  { %v6195_v30 = vpop.f32.mrb[133].mxu0 }
0x52b5   :  { %v5026_v17 = vpop.f32.mrb[134].mxu0 }
0x52b6   :  { %v6196_v18 = vpop.f32.mrb[135].mxu0 }
0x52d2   :  { %v5060_v60 = vpop.permute.xlu0 %5059 }
0x52d3   :  { %6202 = vmatmul.mubr.msk.bf16.vlgmr.msra.gmra.mrb[132].mxu1 %vm121_vm4, %v5060_v60 }
0x53a6   :  { %v5098_v2 = vpop.f32.mrb[132].mxu1 }
0x53a7   :  { %v5099_v63 = vadd.f32 %v5098_v2, %v5023_v47  ;;  %v6203_v59 = vpop.f32.mrb[133].mxu1 }
0x53a8   :  { %v5101_v22 = vpop.f32.mrb[134].mxu1 }
0x53a9   :  { %v5104_v0 = vadd.f32 %v7780_v32, %v5099_v63  ;;  %v6204_v24 = vpop.f32.mrb[135].mxu1 }
0x53ab   :  { %v5105_v25 = vmul.f32 %v5104_v0, %v6685_v10 }
0x53ad   :  { %v5376_v8 = vmul.f32 -1.442695, %v5105_v25 }
0x53af   :  { %6518 = vpow2.f32 %v5376_v8 }
0x53b9   :  { %v6519_v26 = vpop.eup %6518 }
0x53ba   :  { %v5109_v27 = vadd.f32 1.0, %v6519_v26 }
0x53bc   :  { %6520 = vrcp.f32 %v5109_v27 }
0x53c6   :  { %v6521_v28 = vpop.eup %6520 }
0x53c7   :  { %v5112_v34 = vmul.f32 %v6521_v28, %v6685_v10 }
0x53c9   :  { %v5113_v50 = vadd.f32 %v5112_v34, %v6691_v21 }
0x53cb   :  { %5116 = vrot.lane.b32.xlu1 %v5113_v50, %s6560_s18  ;;  %v5114_v32 = vmul.f32 %v5113_v50, %v7875_v45 }
0x543d   :  { %v5117_v57 = vpop.permute.xlu1 %5116 }
0x543e   :  { %v5119_v35 = vmul.f32 %v5117_v57, %v5113_v50 }
0x5440   :  { %5121 = vrot.lane.b32.xlu0 %v5119_v35, %s6561_s19 }
0x54b2   :  { %v5122_v41 = vpop.permute.xlu0 %5121 }
0x54b3   :  { %v5124_v15 = vadd.f32 %v5122_v41, %v5114_v32 }
0x54b5   :  { %6522 = vtanh.f32 %v5124_v15 }
0x54bf   :  { %v6523_v44 = vpop.eup %6522 }
0x54c0   :  { %5127 = vrot.lane.b32.xlu1 %v6523_v44, %s6560_s18 }
0x5532   :  { %v5128_v39 = vpop.permute.xlu1 %5127 }
0x5533   :  { %v5130_v38 = vmul.f32 %v5128_v39, %v5113_v50 }
0x5535   :  { %5132 = vrot.lane.b32.xlu0 %v5130_v38, %s6561_s19 }
0x55a7   :  { %v5133_v10 = vpop.permute.xlu0 %5132 }
0x55a8   :  { %6214 = vmatmul.mubr.msk.f32.vlgmr.msra.gmra.mrb[130].mxu0 %vm121_vm4, %v5133_v10 }
0x567b   :  { %v5202_v21 = vpop.f32.mrb[130].mxu0 }
0x567c   :  { %v5203_v42 = vadd.f32 %v7818_v55, %v5202_v21  ;;  %v6215_v62 = vpop.f32.mrb[131].mxu0 }
0x567e   :  { %5378 = vst.msk [vmem:[%s7949_s16 + $0x38] sm:$0xff] %vm2746_vm6, %v5203_v42 }
0x567f   :  { %5212 = vsyncpa [#allocation4], 1 }

</bundles_post_ra>
